<compile_context>
chip_gen: v7x
topology: tpu7x:2x2x1
jax: 0.10.0
libtpu: 0.0.40
codegen_flags: <defaults>
</compile_context>

<pallas_src>
import jax
import jax.numpy as jnp
from jax.experimental import pallas as pl
from jax.experimental.pallas import tpu as pltpu


def conv3x3_relu_kernel(x_ref, w_ref, b_ref, o_ref, pad_ref, col_ref):
    """One batch block of a 3x3 same-padding conv + bias + ReLU (NHWC, im2col).

    x_ref  : (NB, H, W, Cin)       bf16 activations (unpadded)
    w_ref  : (9*Cin, Cout)         bf16 weights, K ordered (kh, kw, cin)
    b_ref  : (1, Cout)             f32 bias
    o_ref  : (NB, H, W, Cout)      output (input dtype)
    pad_ref: (NB, H+2, W+2, Cin)   bf16 VMEM scratch (zero halo)
    col_ref: (NB*H*W, 9*Cin)       bf16 VMEM im2col scratch
    """
    nb, hh, ww, cout = o_ref.shape
    cin = x_ref.shape[-1]
    m = nb * hh * ww

    # In-kernel zero padding: clear the scratch, then write the interior.
    # (Cheap VMEM passes vs. a full HBM pad pass in the wrapper.  Zeroed every
    # step so it is megacore-safe with the "parallel" batch axis.)
    pad_ref[...] = jnp.zeros_like(pad_ref)
    pad_ref[:, 1:1 + hh, 1:1 + ww, :] = x_ref[...]

    # im2col: fold all 9 taps into the contraction dim.  Each tap is a static
    # shifted window of the padded scratch written into its K-slice.
    for kh in range(3):
        for kw in range(3):
            t = 3 * kh + kw
            patch = pad_ref[:, kh:kh + hh, kw:kw + ww, :]          # (NB,H,W,Cin)
            col_ref[:, t * cin:(t + 1) * cin] = patch.reshape(m, cin)

    # Single MXU matmul with K = 9*Cin, f32 accumulation, then bias + ReLU.
    acc = jnp.dot(col_ref[...], w_ref[...],
                  preferred_element_type=jnp.float32)              # (M, Cout)
    acc = jnp.maximum(acc + b_ref[...], 0.0)
    o_ref[...] = acc.reshape(nb, hh, ww, cout).astype(o_ref.dtype)


def _vmem_limit_bytes():
    """Generation-aware VMEM limit: ~85% of physical, capped at 96 MiB."""
    cap = 128 * 1024 * 1024
    try:
        cap = int(getattr(pltpu.get_tpu_info(), "vmem_capacity_bytes", cap))
    except Exception:
        pass
    return int(max(32 * 1024 * 1024, min(cap * 0.85, 96 * 1024 * 1024)))


def _pick_batch_block(n, cin, cout, h, w, out_itemsize, budget_bytes):
    """Largest NB dividing N whose real per-step working set fits the budget,
    keeping >= 2 grid steps so the DMA pipeline / megacore stay busy."""
    per_batch = (
        2 * (h * w * cin * 2)                  # double-buffered bf16 input block
        + 2 * (h * w * cout * out_itemsize)    # double-buffered output block
        + (h + 2) * (w + 2) * cin * 2          # padded bf16 scratch
        + h * w * 9 * cin * 2                  # bf16 im2col scratch
        + h * w * cout * 4                     # f32 matmul result temporary
    )
    nb = max(1, min(n, budget_bytes // max(per_batch, 1)))
    while nb > 1 and (n // nb) < 2:            # keep >= 2 grid steps
        nb -= 1
    while n % nb != 0:
        nb -= 1
    return nb


def conv_relu(x_nchw, weight, bias, *, nb=None):
    """x_nchw: (N, Cin, H, W); weight: (Cout, Cin, 3, 3); bias: (Cout,)."""
    N, Cin, H, W = x_nchw.shape
    Cout = weight.shape[0]
    assert weight.shape == (Cout, Cin, 3, 3)

    out_dtype = x_nchw.dtype
    vmem_limit = _vmem_limit_bytes()
    if nb is None:
        nb = _pick_batch_block(N, Cin, Cout, H, W,
                               out_itemsize=jnp.dtype(out_dtype).itemsize,
                               budget_bytes=int(vmem_limit * 0.85))
    assert N % nb == 0

    # Layout plumbing (wrapper only): NCHW -> NHWC so channels sit on lanes,
    # and bf16 activations/weights (f32 accumulation happens in the kernel).
    x = jnp.transpose(x_nchw, (0, 2, 3, 1)).astype(jnp.bfloat16)     # (N,H,W,Cin)
    # (Cout,Cin,3,3) -> (kh,kw,Cin,Cout) -> (9*Cin,Cout); K index = (3*kh+kw)*Cin+ci,
    # matching the im2col fill order in the kernel.
    w_t = jnp.transpose(weight, (2, 3, 1, 0)).reshape(9 * Cin, Cout)
    w_t = w_t.astype(jnp.bfloat16)
    b2 = bias.reshape(1, Cout).astype(jnp.float32)

    out_nhwc = pl.pallas_call(
        conv3x3_relu_kernel,
        out_shape=jax.ShapeDtypeStruct((N, H, W, Cout), out_dtype),
        grid_spec=pltpu.PrefetchScalarGridSpec(
            num_scalar_prefetch=0,
            grid=(N // nb,),
            in_specs=[
                # Trailing block dims equal full array dims -> (8,128) rule ok.
                pl.BlockSpec((nb, H, W, Cin), lambda n: (n, 0, 0, 0)),
                pl.BlockSpec((9 * Cin, Cout), lambda n: (0, 0)),   # weights (resident)
                pl.BlockSpec((1, Cout), lambda n: (0, 0)),         # bias (resident)
            ],
            out_specs=pl.BlockSpec((nb, H, W, Cout), lambda n: (n, 0, 0, 0)),
            scratch_shapes=[
                pltpu.VMEM((nb, H + 2, W + 2, Cin), jnp.bfloat16),   # padded input
                pltpu.VMEM((nb * H * W, 9 * Cin), jnp.bfloat16),     # im2col
            ],
        ),
        compiler_params=pltpu.CompilerParams(
            dimension_semantics=("parallel",),          # batch axis -> megacore
            vmem_limit_bytes=vmem_limit,                # generation-aware cap
        ),
    )(x, w_t, b2)

    # TODO(synk): for very large H*W on v7x, add an H-tiled grid axis with a
    # 2-row halo so the per-step working set stays within 64 MiB VMEM; keep
    # activations NHWC between layers to drop these transposes entirely.
    return jnp.transpose(out_nhwc, (0, 3, 1, 2))                  # back to NCHW


def conv_relu_ref(x, weight, bias):
    """Pure-JAX reference mirroring the PyTorch forward."""
    y = jax.lax.conv_general_dilated(
        x, weight, window_strides=(1, 1), padding=((1, 1), (1, 1)),
        dimension_numbers=("NCHW", "OIHW", "NCHW"))
    y = y + bias.reshape(1, -1, 1, 1)
    return jnp.maximum(y, 0.0)


if __name__ == "__main__":
    # Small shapes consistent with ConvRelu(in_=4, out=8): x = (2, 4, 16, 16).
    N, Cin, Cout, H, W = 2, 4, 8, 16, 16

    key = jax.random.PRNGKey(0)
    kx, kw, kb = jax.random.split(key, 3)

    def bf16_exact(a):
        # Quantize test data to bf16-representable values so the kernel's bf16
        # MXU inputs introduce no rounding vs the f32 XLA reference.
        return a.astype(jnp.bfloat16).astype(jnp.float32)

    x = bf16_exact(jax.random.normal(kx, (N, Cin, H, W), dtype=jnp.float32))
    weight = bf16_exact(jax.random.normal(kw, (Cout, Cin, 3, 3), dtype=jnp.float32) * 0.1)
    bias = bf16_exact(jax.random.normal(kb, (Cout,), dtype=jnp.float32) * 0.1)

    out = conv_relu(x, weight, bias)
    out = jax.block_until_ready(out)

    ref = conv_relu_ref(x, weight, bias)
    assert out.shape == (N, Cout, H, W)
    assert jnp.allclose(out, ref, atol=1e-5, rtol=1e-5), "mismatch vs reference"

    print("KERNEL_OK")
</pallas_src>

<mosaic_0001>
module attributes {stable_mosaic.version = 11 : i64} {
  func.func @conv3x3_relu_kernel(%arg0: i32, %arg1: memref<1x16x16x4xbf16, #tpu.memory_space<vmem>>, %arg2: memref<36x8xbf16, #tpu.memory_space<vmem>>, %arg3: memref<1x8xf32, #tpu.memory_space<vmem>>, %arg4: memref<1x16x16x8xf32, #tpu.memory_space<vmem>>, %arg5: memref<1x18x18x4xbf16, #tpu.memory_space<vmem>>, %arg6: memref<256x36xbf16, #tpu.memory_space<vmem>>) attributes {dimension_semantics = [#tpu.dimension_semantics<parallel>], iteration_bounds = array<i64: 2>, scalar_prefetch = 0 : i64, scratch_operands = 2 : i64, tpu.core_type = #tpu.core_type<tc>, window_params = [{transform_indices = @transform_0, window_bounds = array<i64: 1, 16, 16, 4>}, {pipeline_mode = #tpu.pipeline_mode<synchronous>, transform_indices = @transform_1, window_bounds = array<i64: 36, 8>}, {pipeline_mode = #tpu.pipeline_mode<synchronous>, transform_indices = @transform_2, window_bounds = array<i64: 1, 8>}, {transform_indices = @transform_3, window_bounds = array<i64: 1, 16, 16, 8>}]} {
    %cst = arith.constant 0.000000e+00 : bf16
    %0 = vector.broadcast %cst : bf16 to vector<1x18x18x4xbf16>
    %c0 = arith.constant 0 : index
    %c0_0 = arith.constant 0 : index
    %c0_1 = arith.constant 0 : index
    %c0_2 = arith.constant 0 : index
    %1 = vector.load %arg5[%c0, %c0_0, %c0_1, %c0_2] : memref<1x18x18x4xbf16, #tpu.memory_space<vmem>>, vector<1x18x18x4xbf16>
    tpu.vector_store %arg5[%c0, %c0_0, %c0_1, %c0_2], %0 {strides = array<i32>} : memref<1x18x18x4xbf16, #tpu.memory_space<vmem>>, vector<1x18x18x4xbf16>,
    %c0_3 = arith.constant 0 : index
    %c0_4 = arith.constant 0 : index
    %c0_5 = arith.constant 0 : index
    %c0_6 = arith.constant 0 : index
    %2 = vector.load %arg1[%c0_3, %c0_4, %c0_5, %c0_6] : memref<1x16x16x4xbf16, #tpu.memory_space<vmem>>, vector<1x16x16x4xbf16>
    %c0_7 = arith.constant 0 : index
    %c1 = arith.constant 1 : index
    %c1_8 = arith.constant 1 : index
    %c0_9 = arith.constant 0 : index
    %3 = vector.load %arg5[%c0_7, %c1, %c1_8, %c0_9] : memref<1x18x18x4xbf16, #tpu.memory_space<vmem>>, vector<1x16x16x4xbf16>
    tpu.vector_store %arg5[%c0_7, %c1, %c1_8, %c0_9], %2 {strides = array<i32>} : memref<1x18x18x4xbf16, #tpu.memory_space<vmem>>, vector<1x16x16x4xbf16>,
    %c0_10 = arith.constant 0 : index
    %c0_11 = arith.constant 0 : index
    %c0_12 = arith.constant 0 : index
    %c0_13 = arith.constant 0 : index
    %4 = vector.load %arg5[%c0_10, %c0_11, %c0_12, %c0_13] : memref<1x18x18x4xbf16, #tpu.memory_space<vmem>>, vector<1x16x16x4xbf16>
    %5 = vector.shape_cast %4 : vector<1x16x16x4xbf16> to vector<256x4xbf16>
    %c0_14 = arith.constant 0 : index
    %c0_15 = arith.constant 0 : index
    %6 = vector.load %arg6[%c0_14, %c0_15] : memref<256x36xbf16, #tpu.memory_space<vmem>>, vector<256x4xbf16>
    tpu.vector_store %arg6[%c0_14, %c0_15], %5 {strides = array<i32>} : memref<256x36xbf16, #tpu.memory_space<vmem>>, vector<256x4xbf16>,
    %c0_16 = arith.constant 0 : index
    %c0_17 = arith.constant 0 : index
    %c1_18 = arith.constant 1 : index
    %c0_19 = arith.constant 0 : index
    %7 = vector.load %arg5[%c0_16, %c0_17, %c1_18, %c0_19] : memref<1x18x18x4xbf16, #tpu.memory_space<vmem>>, vector<1x16x16x4xbf16>
    %8 = vector.shape_cast %7 : vector<1x16x16x4xbf16> to vector<256x4xbf16>
    %c0_20 = arith.constant 0 : index
    %c4 = arith.constant 4 : index
    %9 = vector.load %arg6[%c0_20, %c4] : memref<256x36xbf16, #tpu.memory_space<vmem>>, vector<256x4xbf16>
    tpu.vector_store %arg6[%c0_20, %c4], %8 {strides = array<i32>} : memref<256x36xbf16, #tpu.memory_space<vmem>>, vector<256x4xbf16>,
    %c0_21 = arith.constant 0 : index
    %c0_22 = arith.constant 0 : index
    %c2 = arith.constant 2 : index
    %c0_23 = arith.constant 0 : index
    %10 = vector.load %arg5[%c0_21, %c0_22, %c2, %c0_23] : memref<1x18x18x4xbf16, #tpu.memory_space<vmem>>, vector<1x16x16x4xbf16>
    %11 = vector.shape_cast %10 : vector<1x16x16x4xbf16> to vector<256x4xbf16>
    %c0_24 = arith.constant 0 : index
    %c8 = arith.constant 8 : index
    %12 = vector.load %arg6[%c0_24, %c8] : memref<256x36xbf16, #tpu.memory_space<vmem>>, vector<256x4xbf16>
    tpu.vector_store %arg6[%c0_24, %c8], %11 {strides = array<i32>} : memref<256x36xbf16, #tpu.memory_space<vmem>>, vector<256x4xbf16>,
    %c0_25 = arith.constant 0 : index
    %c1_26 = arith.constant 1 : index
    %c0_27 = arith.constant 0 : index
    %c0_28 = arith.constant 0 : index
    %13 = vector.load %arg5[%c0_25, %c1_26, %c0_27, %c0_28] : memref<1x18x18x4xbf16, #tpu.memory_space<vmem>>, vector<1x16x16x4xbf16>
    %14 = vector.shape_cast %13 : vector<1x16x16x4xbf16> to vector<256x4xbf16>
    %c0_29 = arith.constant 0 : index
    %c12 = arith.constant 12 : index
    %15 = vector.load %arg6[%c0_29, %c12] : memref<256x36xbf16, #tpu.memory_space<vmem>>, vector<256x4xbf16>
    tpu.vector_store %arg6[%c0_29, %c12], %14 {strides = array<i32>} : memref<256x36xbf16, #tpu.memory_space<vmem>>, vector<256x4xbf16>,
    %c0_30 = arith.constant 0 : index
    %c1_31 = arith.constant 1 : index
    %c1_32 = arith.constant 1 : index
    %c0_33 = arith.constant 0 : index
    %16 = vector.load %arg5[%c0_30, %c1_31, %c1_32, %c0_33] : memref<1x18x18x4xbf16, #tpu.memory_space<vmem>>, vector<1x16x16x4xbf16>
    %17 = vector.shape_cast %16 : vector<1x16x16x4xbf16> to vector<256x4xbf16>
    %c0_34 = arith.constant 0 : index
    %c16 = arith.constant 16 : index
    %18 = vector.load %arg6[%c0_34, %c16] : memref<256x36xbf16, #tpu.memory_space<vmem>>, vector<256x4xbf16>
    tpu.vector_store %arg6[%c0_34, %c16], %17 {strides = array<i32>} : memref<256x36xbf16, #tpu.memory_space<vmem>>, vector<256x4xbf16>,
    %c0_35 = arith.constant 0 : index
    %c1_36 = arith.constant 1 : index
    %c2_37 = arith.constant 2 : index
    %c0_38 = arith.constant 0 : index
    %19 = vector.load %arg5[%c0_35, %c1_36, %c2_37, %c0_38] : memref<1x18x18x4xbf16, #tpu.memory_space<vmem>>, vector<1x16x16x4xbf16>
    %20 = vector.shape_cast %19 : vector<1x16x16x4xbf16> to vector<256x4xbf16>
    %c0_39 = arith.constant 0 : index
    %c20 = arith.constant 20 : index
    %21 = vector.load %arg6[%c0_39, %c20] : memref<256x36xbf16, #tpu.memory_space<vmem>>, vector<256x4xbf16>
    tpu.vector_store %arg6[%c0_39, %c20], %20 {strides = array<i32>} : memref<256x36xbf16, #tpu.memory_space<vmem>>, vector<256x4xbf16>,
    %c0_40 = arith.constant 0 : index
    %c2_41 = arith.constant 2 : index
    %c0_42 = arith.constant 0 : index
    %c0_43 = arith.constant 0 : index
    %22 = vector.load %arg5[%c0_40, %c2_41, %c0_42, %c0_43] : memref<1x18x18x4xbf16, #tpu.memory_space<vmem>>, vector<1x16x16x4xbf16>
    %23 = vector.shape_cast %22 : vector<1x16x16x4xbf16> to vector<256x4xbf16>
    %c0_44 = arith.constant 0 : index
    %c24 = arith.constant 24 : index
    %24 = vector.load %arg6[%c0_44, %c24] : memref<256x36xbf16, #tpu.memory_space<vmem>>, vector<256x4xbf16>
    tpu.vector_store %arg6[%c0_44, %c24], %23 {strides = array<i32>} : memref<256x36xbf16, #tpu.memory_space<vmem>>, vector<256x4xbf16>,
    %c0_45 = arith.constant 0 : index
    %c2_46 = arith.constant 2 : index
    %c1_47 = arith.constant 1 : index
    %c0_48 = arith.constant 0 : index
    %25 = vector.load %arg5[%c0_45, %c2_46, %c1_47, %c0_48] : memref<1x18x18x4xbf16, #tpu.memory_space<vmem>>, vector<1x16x16x4xbf16>
    %26 = vector.shape_cast %25 : vector<1x16x16x4xbf16> to vector<256x4xbf16>
    %c0_49 = arith.constant 0 : index
    %c28 = arith.constant 28 : index
    %27 = vector.load %arg6[%c0_49, %c28] : memref<256x36xbf16, #tpu.memory_space<vmem>>, vector<256x4xbf16>
    tpu.vector_store %arg6[%c0_49, %c28], %26 {strides = array<i32>} : memref<256x36xbf16, #tpu.memory_space<vmem>>, vector<256x4xbf16>,
    %c0_50 = arith.constant 0 : index
    %c2_51 = arith.constant 2 : index
    %c2_52 = arith.constant 2 : index
    %c0_53 = arith.constant 0 : index
    %28 = vector.load %arg5[%c0_50, %c2_51, %c2_52, %c0_53] : memref<1x18x18x4xbf16, #tpu.memory_space<vmem>>, vector<1x16x16x4xbf16>
    %29 = vector.shape_cast %28 : vector<1x16x16x4xbf16> to vector<256x4xbf16>
    %c0_54 = arith.constant 0 : index
    %c32 = arith.constant 32 : index
    %30 = vector.load %arg6[%c0_54, %c32] : memref<256x36xbf16, #tpu.memory_space<vmem>>, vector<256x4xbf16>
    tpu.vector_store %arg6[%c0_54, %c32], %29 {strides = array<i32>} : memref<256x36xbf16, #tpu.memory_space<vmem>>, vector<256x4xbf16>,
    %c0_55 = arith.constant 0 : index
    %c0_56 = arith.constant 0 : index
    %31 = vector.load %arg6[%c0_55, %c0_56] : memref<256x36xbf16, #tpu.memory_space<vmem>>, vector<256x36xbf16>
    %c0_57 = arith.constant 0 : index
    %c0_58 = arith.constant 0 : index
    %32 = vector.load %arg2[%c0_57, %c0_58] : memref<36x8xbf16, #tpu.memory_space<vmem>>, vector<36x8xbf16>
    %cst_59 = arith.constant dense<0.000000e+00> : vector<256x8xf32>
    %33 = tpu.matmul %31, %32, %cst_59 {dimension_numbers = #tpu.dot_dimension_numbers<[1], [0], [0], [1], [0, 0, 1, 1], [], []>} : vector<256x36xbf16>, vector<36x8xbf16>, vector<256x8xf32> -> vector<256x8xf32>
    %c0_60 = arith.constant 0 : index
    %c0_61 = arith.constant 0 : index
    %34 = vector.load %arg3[%c0_60, %c0_61] : memref<1x8xf32, #tpu.memory_space<vmem>>, vector<1x8xf32>
    %35 = vector.broadcast %34 : vector<1x8xf32> to vector<256x8xf32>
    %36 = arith.addf %33, %35 : vector<256x8xf32>
    %cst_62 = arith.constant 0.000000e+00 : f32
    %37 = vector.broadcast %cst_62 : f32 to vector<256x8xf32>
    %38 = arith.maximumf %36, %37 : vector<256x8xf32>
    %39 = vector.shape_cast %38 : vector<256x8xf32> to vector<1x16x16x8xf32>
    %c0_63 = arith.constant 0 : index
    %c0_64 = arith.constant 0 : index
    %c0_65 = arith.constant 0 : index
    %c0_66 = arith.constant 0 : index
    %40 = vector.load %arg4[%c0_63, %c0_64, %c0_65, %c0_66] : memref<1x16x16x8xf32, #tpu.memory_space<vmem>>, vector<1x16x16x8xf32>
    tpu.vector_store %arg4[%c0_63, %c0_64, %c0_65, %c0_66], %39 {strides = array<i32>} : memref<1x16x16x8xf32, #tpu.memory_space<vmem>>, vector<1x16x16x8xf32>,
    return
  }
  func.func @transform_0(%arg0: i32) -> (i32, i32, i32, i32) {
    %c0_i32 = arith.constant 0 : i32
    %c0_i32_0 = arith.constant 0 : i32
    %c0_i32_1 = arith.constant 0 : i32
    %c0_i32_2 = arith.constant 0 : i32
    return %arg0, %c0_i32, %c0_i32_0, %c0_i32_1 : i32, i32, i32, i32
  }
  func.func @transform_1(%arg0: i32) -> (i32, i32) {
    %c0_i32 = arith.constant 0 : i32
    %c0_i32_0 = arith.constant 0 : i32
    %c0_i32_1 = arith.constant 0 : i32
    return %c0_i32, %c0_i32_0 : i32, i32
  }
  func.func @transform_2(%arg0: i32) -> (i32, i32) {
    %c0_i32 = arith.constant 0 : i32
    %c0_i32_0 = arith.constant 0 : i32
    %c0_i32_1 = arith.constant 0 : i32
    return %c0_i32, %c0_i32_0 : i32, i32
  }
  func.func @transform_3(%arg0: i32) -> (i32, i32, i32, i32) {
    %c0_i32 = arith.constant 0 : i32
    %c0_i32_0 = arith.constant 0 : i32
    %c0_i32_1 = arith.constant 0 : i32
    %c0_i32_2 = arith.constant 0 : i32
    return %arg0, %c0_i32, %c0_i32_0, %c0_i32_1 : i32, i32, i32, i32
  }
}

</mosaic_0001>

<bundles_post_ra>
// kernel: tpu_custom_call.1
= control target key start
LH: loop header
LB: loop body
LE: loop exit
PB: predicated region body
PF: predicated region fallthrough
CT: control target
= control target key end

     0   :  { %8 = vsyncpa [#allocation5], 0  ;;  %s6303_s0 = inlined_call_operand.hbm [shape: bf16[2,16,16,4], index: 0, kind: input, shape index: {}]   ;;  %s6304_s1 = inlined_call_operand.hbm [shape: bf16[36,8], index: 1, kind: input, shape index: {}]   ;;  %s6305_s2 = inlined_call_operand.hbm [shape: f32[1,8], index: 2, kind: input, shape index: {}]   ;;  %s6306_s3 = inlined_call_operand.hbm [shape: f32[2,16,16,8], index: 3, kind: output, shape index: {}]  }
   0x1   :  { %10 = vsyncpa [#allocation5 + $0x1], 0 }
   0x2   :  { %11 = vsyncpa [#allocation8], 0 }
   0x3   :  { %12 = vsyncpa [#allocation6], 0 }
   0x4   :  { %14 = vsyncpa [#allocation6 + $0x1], 0  ;;  %s4899_s12 = smov 0   ;;  %s4901_s13 = smov 0  }
   0x5   :  { %s4903_s14 = smov 0   ;;  %s4905_s15 = smov 0  }
   0x6 LB: > { %s4920_s16 = sadd.s32 4294967295, %s4861_s15   ;;  %s4278_s17 = sadd.s32 4294967294, %s4861_s15   ;;  %s4861_s15 = sphi %s4905_s15, %s6345_s15   ;;  %s4857_s14 = sphi %s4903_s14, %s6344_s14   ;;  %s4853_s13 = sphi %s4901_s13, %s6343_s13   ;;  %s4849_s12 = sphi %s4899_s12, %s6342_s12  }
   0x7   : > { %p40_p0 = scmp.ne.s32.totalorder %s4853_s13, %s4849_s12  ;;  %p6307_p1 = scmp.eq.s32.totalorder %s4920_s16, 0 }
   0x8   : > { %p112_p3 = scmp.eq.s32.totalorder %s4278_s17, 1  ;;  %p4279_p5 = scmp.ge.s32.totalorder %s4861_s15, 1 }
   0x9   : > { %p4929_p4 = por %p6307_p1, %p40_p0  ;;  %p119_p7 = scmp.lt.s32.totalorder %s4861_s15, 3 }
   0xa   : > { %p4934_p6 = por %p112_p3, %p40_p0  ;;  %s4863_s21 = smov [#allocation7]  }
   0xb   : > { %s6311_s18 = scalar_select %p4929_p4, 1, 0 }
   0xc   : > { %s6312_s19 = scalar_select %p4934_p6, 1, 0 }
   0xd   : > { %p4939_p8 = pnand %p4279_p5, %p119_p7  ;;  %s131_s22 = sshll.u32 %s4863_s21, 4  ;;  %s4943_s22 = int_to_ptr.vmem [resolvable:$true] %s131_s22 }
   0xe   : > { %s4864_s24 = smov [#allocation9]   ;;  %s4705_s28 = scalar_lea.hbm %s6304_s1, 320 }
   0xf   : > { %p4587_p9 = pneg %p4939_p8  ;;  %s145_s25 = sshll.u32 %s4864_s24, 4  ;;  %s4954_s25 = int_to_ptr.vmem [resolvable:$true] %s145_s25 }
  0x10   : > { %p4706_p12 = scmp.ne.s32.totalorder %s6304_s1, %s4705_s28  ;;  %p4712_p5 = scmp.lt.u32.totalorder %s4705_s28, %s6304_s1 }
  0x11   : > { %p4950_p11 = pnand %p4587_p9, %p6307_p1 }
  0x13   : > { %p4707_p13 = pneg %p4950_p11 }
  0x15   : > { %p4708_p0 = pnand %p4707_p13, %p4706_p12 }
  0x17   : > { %p4709_p3 = pneg %p4708_p0 }
  0x19   : > { %p4714_p7 = pnand %p4712_p5, %p4709_p3 }
  0x1b   : > { %4717 = shalt.err (!%p4714_p7)
}
  0x1c   : > { %s4718_s6 = scalar_lea.vmem %s4943_s22, 320  ;;  %p4726_p2 = scmp.lt.s32.totalorder %s4943_s22, %s4943_s22 }
  0x1d   : > { %p4719_p9 = scmp.ne.s32.totalorder %s4943_s22, %s4718_s6  ;;  %p4727_p12 = scmp.lt.s32.totalorder %s4718_s6, %s4718_s6 }
  0x1f   : > { %p4721_p10 = pnand %p4719_p9, %p4707_p13  ;;  %p4728_p0 = por %p4727_p12, %p4726_p2 }
  0x21   : > { %p4722_p1 = pneg %p4721_p10 }
  0x23   : > { %p4729_p6 = pnand %p4728_p0, %p4722_p1 }
  0x25   : > { %4732 = shalt.err (!%p4729_p6)
}
  0x26   : > { %s4865_s7 = smov 64   ;;  %s4866_s8 = smov 4  }
  0x27   : > { %4590 = dma.hbm_to_vmem [thread:$0]  (!%p4950_p11), %s6304_s1, 320, %s4943_s22, [#allocation8], %s4865_s7, %s4865_s7, %s4866_s8  }
  0x28   : > { %s4733_s21 = scalar_lea.hbm %s6305_s2, 16 }
  0x29   : > { %p4734_p1 = scmp.ne.s32.totalorder %s6305_s2, %s4733_s21  ;;  %p4740_p10 = scmp.lt.u32.totalorder %s4733_s21, %s6305_s2 }
  0x2b   : > { %p4736_p2 = pnand %p4734_p1, %p4707_p13 }
  0x2d   : > { %p4737_p6 = pneg %p4736_p2 }
  0x2f   : > { %p4742_p3 = pnand %p4740_p10, %p4737_p6 }
  0x31   : > { %4745 = shalt.err (!%p4742_p3)
}
  0x32   : > { %s4746_s22 = scalar_lea.vmem %s4954_s25, 16  ;;  %s4753_s29 = scalar_lea.vmem %s4954_s25, 32 }
  0x33   : > { %p4747_p5 = scmp.ne.s32.totalorder %s4954_s25, %s4746_s22  ;;  %p4754_p12 = scmp.lt.s32.totalorder %s4954_s25, %s4954_s25 }
  0x34   : > { %p4755_p0 = scmp.lt.s32.totalorder %s4753_s29, %s4746_s22 }
  0x35   : > { %p4749_p7 = pnand %p4747_p5, %p4707_p13 }
  0x36   : > { %p4756_p1 = por %p4755_p0, %p4754_p12 }
  0x37   : > { %p4750_p9 = pneg %p4749_p7 }
  0x39   : > { %p4757_p2 = pnand %p4756_p1, %p4750_p9 }
  0x3b   : > { %4760 = shalt.err (!%p4757_p2)
}
  0x3c   : > { %4593 = dma.hbm_to_vmem [thread:$0]  (!%p4950_p11), %s6305_s2, 16, %s4954_s25, [#allocation8]  }
  0x3d   : > { %s5013_s5 = sadd.s32 1, %s4861_s15   ;;  %s27_s23 = sadd.s32 1, %s4857_s14 }
  0x3e   : > { %s24_s6 = ssub.s32 %s4861_s15, %s5013_s5  ;;  %p34_p13 = scmp.ne.s32.totalorder %s4857_s14, %s4853_s13 }
  0x3f   : > { %p25_p6 = scmp.eq.s32.totalorder %s24_s6, 0  ;;  %p35_p10 = scmp.eq.s32.totalorder %s4861_s15, 0 }
  0x40   : > { %p6315_p3 = scmp.eq.s32.totalorder %s4920_s16, 1  ;;  %p4604_p7 = scmp.lt.s32.totalorder %s4861_s15, 2 }
  0x41   : > { %s5029_s10 = scalar_select %p25_p6, %s4857_s14, %s27_s23  }
  0x42   : > { %p5023_p5 = por %p6315_p3, %p34_p13  ;;  %p36_p9 = por %p35_p10, %p34_p13 }
  0x43   : > { %s156_s11 = sand.u32 1, %s4857_s14   ;;  %s4508_s25 = sshll.u32 %s4861_s15, 11 }
  0x44   : > { %s6316_s9 = scalar_select %p5023_p5, 1, 0 }
  0x45   : > { %s4283_s17 = sshll.u32 %s156_s11, 7  ;;  %s5036_s26 = scalar_lea.hbm %s6303_s0, %s4508_s25 }
  0x46   : > { %s160_s27 = scalar_lea.vmem [#allocation4], %s4283_s17  ;;  %p5040_p11 = pnand %p4604_p7, %p36_p9 }
  0x47   : > { %s167_s28 = sshll.u32 %s160_s27, 4  ;;  %s5044_s29 = scalar_lea.sflag [#allocation5], %s156_s11  ;;  %s5038_s28 = int_to_ptr.vmem [resolvable:$true] %s167_s28 }
  0x48   : > { %s4761_s30 = scalar_lea.hbm %s5036_s26, 2048  ;;  %p4763_p0 = pneg %p5040_p11 }
  0x49   : > { %p4762_p12 = scmp.ne.s32.totalorder %s5036_s26, %s4761_s30  ;;  %s4766_s6 = scalar_lea.hbm %s6303_s0, 4096 }
  0x4a   : > { %p4767_p13 = scmp.lt.u32.totalorder %s5036_s26, %s6303_s0  ;;  %p4768_p6 = scmp.lt.u32.totalorder %s4766_s6, %s4761_s30 }
  0x4b   : > { %p4764_p1 = pnand %p4763_p0, %p4762_p12  ;;  %p4770_p3 = scmp.lt.u32.totalorder %s4761_s30, %s5036_s26 }
  0x4c   : > { %p4769_p10 = por %p4768_p6, %p4767_p13 }
  0x4d   : > { %p4765_p2 = pneg %p4764_p1 }
  0x4e   : > { %p4771_p7 = por %p4770_p3, %p4769_p10 }
  0x50   : > { %p4772_p9 = pnand %p4771_p7, %p4765_p2 }
  0x52   : > { %4775 = shalt.err (!%p4772_p9)
}
  0x53   : > { %s4776_s11 = scalar_lea.vmem %s5038_s28, 2048  ;;  %s4867_s21 = smov [#allocation4]  }
  0x54   : > { %p4777_p12 = scmp.ne.s32.totalorder %s5038_s28, %s4776_s11  ;;  %s4781_s24 = sshll.u32 %s4867_s21, 4  ;;  %s4782_s24 = int_to_ptr.vmem [resolvable:$false] %s4781_s24 }
  0x55   : > { %s4783_s27 = scalar_lea.vmem %s4782_s24, 4096  ;;  %p4784_p4 = scmp.lt.s32.totalorder %s5038_s28, %s4782_s24 }
  0x56   : > { %p4779_p1 = pnand %p4777_p12, %p4763_p0  ;;  %p4785_p13 = scmp.lt.s32.totalorder %s4783_s27, %s4776_s11 }
  0x58   : > { %p4780_p5 = pneg %p4779_p1  ;;  %p4786_p6 = por %p4785_p13, %p4784_p4 }
  0x5a   : > { %p4787_p10 = pnand %p4786_p6, %p4780_p5 }
  0x5c   : > { %4790 = shalt.err (!%p4787_p10)
}
  0x5d   : > { %4597 = dma.hbm_to_vmem [thread:$0]  (!%p5040_p11), %s5036_s26, 2048, %s5038_s28, %s5044_s29, %s4865_s7, %s4865_s7, %s4866_s8  }
  0x5e   : > { %179 = sbr.rel (%p4939_p8) target bundleno = 844 (0x34c), region = 32  ;;  %s5078_s30 = sand.u32 (!%p4939_p8), 1, %s4853_s13  }
  0x5f   : > { %s4287_s4 = sshll.u32 (!%p4939_p8), %s5078_s30, 7  ;;  %s182_s23 = scalar_lea.sflag (!%p4939_p8), [#allocation5], %s5078_s30 }
  0x60   : > { %s5082_s6 = scalar_lea.vmem (!%p4939_p8), [#allocation4], %s4287_s4  ;;  %p6318_p4 = scmp.ne.s32.totalorder (!%p4939_p8), %s6311_s18, 0 }
  0x65   : > { %4836 = dma.done.wait (%p6318_p4), %s182_s23, 2048  }
  0x66   : > { %4838 = vsyncadd (%p6318_p4), %s182_s23, 4294965248  ;;  %p6319_p5 = scmp.eq.s32.totalorder %s4920_s16, 0 }
  0x68   : > { %4840 = dma.done.wait (%p6319_p5), [#allocation8], 336   ;;  %p6320_p8 = pmov %p6319_p5 }
  0x69   : > { %vm217_vm0 = vcmask 27648   ;;  %vm220_vm1 = vcmask 24576   ;;  %v4868_v0 = vmov 0   ;;  %vm1535_vm2 = vcmask 1042432   ;;  %v289_v2 = vld [vmem:[%s5082_s6 + $0x40] sm:$0xf] }
  0x6a   : > { %4842 = vsyncadd (%p6320_p8), [#allocation8], 4294966960  ;;  %218 = vst.msk [vmem:[#allocation2] sm:$0xf] %vm217_vm0, %v4868_v0  ;;  %vm1536_vm3 = vcmask 1046532   ;;  %v445_v10 = vshrl.u32 %v289_v2, 16 }
  0x6b   : > { %219 = vst.msk [vmem:[#allocation2 + $0x4] sm:$0xf] %vm217_vm0, %v4868_v0  ;;  %222 = vst.msk [vmem:[#allocation2 + $0xc] sm:$0xf] %vm217_vm0, %v4868_v0  ;;  %vm939_vm4 = vsmask.f32 3328 }
  0x6c   : > { %221 = vst.msk [vmem:[#allocation2 + $0x8] sm:$0x1] %vm220_vm1, %v4868_v0  ;;  %224 = vst.msk [vmem:[#allocation2 + $0x14] sm:$0x1] %vm220_vm1, %v4868_v0  ;;  %vm940_vm5 = vsmask.f32 7440 }
  0x6d   : > { %223 = vst.msk [vmem:[#allocation2 + $0x10] sm:$0xf] %vm217_vm0, %v4868_v0  ;;  %225 = vst.msk [vmem:[#allocation2 + $0x18] sm:$0xf] %vm217_vm0, %v4868_v0  ;;  %vm305_vm7 = vsmask.f32 256 }
  0x6e   : > { %226 = vst.msk [vmem:[#allocation2 + $0x1c] sm:$0xf] %vm217_vm0, %v4868_v0  ;;  %228 = vst.msk [vmem:[#allocation2 + $0x24] sm:$0xf] %vm217_vm0, %v4868_v0  ;;  %vm306_vm8 = vsmask.f32 4368 }
  0x6f   : > { %227 = vst.msk [vmem:[#allocation2 + $0x20] sm:$0x1] %vm220_vm1, %v4868_v0  ;;  %230 = vst.msk [vmem:[#allocation2 + $0x2c] sm:$0x1] %vm220_vm1, %v4868_v0  ;;  %vm630_vm9 = vsmask.f32 7938 }
  0x70   : > { %229 = vst.msk [vmem:[#allocation2 + $0x28] sm:$0xf] %vm217_vm0, %v4868_v0  ;;  %231 = vst.msk [vmem:[#allocation2 + $0x30] sm:$0xf] %vm217_vm0, %v4868_v0  ;;  %v290_v19 = vld [vmem:[%s5082_s6 + $0x44] sm:$0xf] }
  0x71   : > { %232 = vst.msk [vmem:[#allocation2 + $0x34] sm:$0xf] %vm217_vm0, %v4868_v0  ;;  %234 = vst.msk [vmem:[#allocation2 + $0x3c] sm:$0xf] %vm217_vm0, %v4868_v0  ;;  %v1439_v3 = vld [vmem:[#allocation2] sm:$0xe] }
  0x72   : > { %233 = vst.msk [vmem:[#allocation2 + $0x38] sm:$0x1] %vm220_vm1, %v4868_v0  ;;  %236 = vst.msk [vmem:[#allocation2 + $0x44] sm:$0x1] %vm220_vm1, %v4868_v0  ;;  %v1440_v4 = vld [vmem:[#allocation2 + $0x4] sm:$0xf] }
  0x73   : > { %235 = vst.msk [vmem:[#allocation2 + $0x40] sm:$0xf] %vm217_vm0, %v4868_v0  ;;  %237 = vst.msk [vmem:[#allocation2 + $0x48] sm:$0xf] %vm217_vm0, %v4868_v0  ;;  %v1441_v5 = vld [vmem:[#allocation2 + $0x8] sm:$0x1] }
  0x74   : > { %238 = vst.msk [vmem:[#allocation2 + $0x4c] sm:$0xf] %vm217_vm0, %v4868_v0  ;;  %240 = vst.msk [vmem:[#allocation2 + $0x54] sm:$0xf] %vm217_vm0, %v4868_v0  ;;  %v4323_v6 = vrot.slane %v1439_v3, 9  ;;  %v1540_v7 = vrot.slane %v1440_v4, 5 }
  0x75   : > { %239 = vst.msk [vmem:[#allocation2 + $0x50] sm:$0x1] %vm220_vm1, %v4868_v0  ;;  %242 = vst.msk [vmem:[#allocation2 + $0x5c] sm:$0x1] %vm220_vm1, %v4868_v0  ;;  %v1543_v8 = vrot.slane %v1441_v5, 5  ;;  %v447_v23 = vrot.slane %v445_v10, 7 }
  0x76   : > { %241 = vst.msk [vmem:[#allocation2 + $0x58] sm:$0xf] %vm217_vm0, %v4868_v0  ;;  %243 = vst.msk [vmem:[#allocation2 + $0x60] sm:$0xf] %vm217_vm0, %v4868_v0  ;;  %v891_v9 = vld [vmem:[#allocation2] sm:$0xf] }
  0x77   : > { %244 = vst.msk [vmem:[#allocation2 + $0x64] sm:$0xf] %vm217_vm0, %v4868_v0  ;;  %246 = vst.msk [vmem:[#allocation2 + $0x6c] sm:$0xf] %vm217_vm0, %v4868_v0  ;;  %v892_v11 = vld [vmem:[#allocation2 + $0x4] sm:$0xf] }
  0x78   : > { %245 = vst.msk [vmem:[#allocation2 + $0x68] sm:$0x1] %vm220_vm1, %v4868_v0  ;;  %248 = vst.msk [vmem:[#allocation2 + $0x74] sm:$0x1] %vm220_vm1, %v4868_v0  ;;  %v893_v12 = vld [vmem:[#allocation2 + $0x8] sm:$0x1] }
  0x79   : > { %247 = vst.msk [vmem:[#allocation2 + $0x70] sm:$0xf] %vm217_vm0, %v4868_v0  ;;  %249 = vst.msk [vmem:[#allocation2 + $0x78] sm:$0xf] %vm217_vm0, %v4868_v0  ;;  %v943_v13 = vshrl.u32 %v891_v9, 16  ;;  %v946_v14 = vshll.u32 %v891_v9, 16 }
  0x7a   : > { %250 = vst.msk [vmem:[#allocation2 + $0x7c] sm:$0xf] %vm217_vm0, %v4868_v0  ;;  %252 = vst.msk [vmem:[#allocation2 + $0x84] sm:$0xf] %vm217_vm0, %v4868_v0  ;;  %v1542_v16 = vrot.slane %v1540_v7, 4  ;;  %v952_v17 = vshll.u32 %v892_v11, 16 }
  0x7b   : > { %251 = vst.msk [vmem:[#allocation2 + $0x80] sm:$0x1] %vm220_vm1, %v4868_v0  ;;  %254 = vst.msk [vmem:[#allocation2 + $0x8c] sm:$0x1] %vm220_vm1, %v4868_v0  ;;  %v956_v18 = vshrl.u32 %v892_v11, 16  ;;  %v945_v20 = vrot.slane %v943_v13, 4 }
  0x7c   : > { %253 = vst.msk [vmem:[#allocation2 + $0x88] sm:$0xf] %vm217_vm0, %v4868_v0  ;;  %255 = vst.msk [vmem:[#allocation2 + $0x90] sm:$0xf] %vm217_vm0, %v4868_v0  ;;  %v948_v21 = vrot.slane %v946_v14, 5  ;;  %v962_v22 = vshll.u32 %v893_v12, 16 }
  0x7d   : > { %256 = vst.msk [vmem:[#allocation2 + $0x94] sm:$0xf] %vm217_vm0, %v4868_v0  ;;  %258 = vst.msk [vmem:[#allocation2 + $0x9c] sm:$0xf] %vm217_vm0, %v4868_v0  ;;  %v273_v24 = vld [vmem:[%s5082_s6] sm:$0xf] }
  0x7e   : > { %257 = vst.msk [vmem:[#allocation2 + $0x98] sm:$0x1] %vm220_vm1, %v4868_v0  ;;  %260 = vst.msk [vmem:[#allocation2 + $0xa4] sm:$0x1] %vm220_vm1, %v4868_v0  ;;  %v954_v26 = vrot.slane %v952_v17, 5  ;;  %v958_v27 = vrot.slane %v956_v18, 4  ;;  %v949_v31 = vor.u32 %v948_v21, %v945_v20 }
  0x7f   : > { %259 = vst.msk [vmem:[#allocation2 + $0xa0] sm:$0xf] %vm217_vm0, %v4868_v0  ;;  %261 = vst.msk [vmem:[#allocation2 + $0xa8] sm:$0xf] %vm217_vm0, %v4868_v0  ;;  %v448_v28 = vshll.u32 %v289_v2, 16  ;;  %v964_v32 = vrot.slane %v962_v22, 5 }
  0x80   : > { %262 = vst.msk [vmem:[#allocation2 + $0xac] sm:$0xf] %vm217_vm0, %v4868_v0  ;;  %264 = vst.msk [vmem:[#allocation2 + $0xb4] sm:$0xf] %vm217_vm0, %v4868_v0  ;;  %v274_v29 = vld [vmem:[%s5082_s6 + $0x4] sm:$0xf]  ;;  %v959_v37 = vor.u32 %v958_v27, %v954_v26 }
  0x81   : > { %263 = vst.msk [vmem:[#allocation2 + $0xb0] sm:$0x1] %vm220_vm1, %v4868_v0  ;;  %266 = vst.msk [vmem:[#allocation2 + $0xbc] sm:$0x1] %vm220_vm1, %v4868_v0  ;;  %v451_v33 = vrot.slane %v447_v23, 4  ;;  %v450_v38 = vor.u32 %v448_v28, %v447_v23  ;;  %v453_v39 = vshrl.u32 %v290_v19, 16 }
  0x82   : > { %265 = vst.msk [vmem:[#allocation2 + $0xb8] sm:$0xf] %vm217_vm0, %v4868_v0  ;;  %267 = vst.msk [vmem:[#allocation2 + $0xc0] sm:$0xf] %vm217_vm0, %v4868_v0  ;;  %v690_v35 = vld [vmem:[#allocation2 + $0x6c] sm:$0xf] }
  0x83   : > { %268 = vst.msk [vmem:[#allocation2 + $0xc4] sm:$0xf] %vm217_vm0, %v4868_v0  ;;  %270 = vst.msk [vmem:[#allocation2 + $0xcc] sm:$0xf] %vm217_vm0, %v4868_v0  ;;  %v456_v40 = vshll.u32 %v290_v19, 16  ;;  %s4869_s18 = smov 8  }
  0x84   : > { %269 = vst.msk [vmem:[#allocation2 + $0xc8] sm:$0x1] %vm220_vm1, %v4868_v0  ;;  %272 = vst.msk [vmem:[#allocation2 + $0xd4] sm:$0x1] %vm220_vm1, %v4868_v0  ;;  %v291_v41 = vld [vmem:[%s5082_s6 + $0x48] sm:$0xf] }
  0x85   : > { %271 = vst.msk [vmem:[#allocation2 + $0xd0] sm:$0xf] %vm217_vm0, %v4868_v0  ;;  %vm5146_vm6 = vmor %vm1535_vm2, %vm1536_vm3  ;;  %v950_v42 = vrot.slane %v949_v31, 4  ;;  %v309_v43 = vshrl.u32 %v273_v24, 16  ;;  %v312_v44 = vshll.u32 %v273_v24, 16  ;;  %v317_v45 = vshrl.u32 %v274_v29, 16 }
  0x86   : > { %v1541_v15 = vsel %vm5146_vm6, %v4323_v6, %v1540_v7  ;;  %v1544_v25 = vsel %vm5146_vm6, %v1542_v16, %v1543_v8  ;;  %vm5160_vm10 = vmand %vm217_vm0, %vm630_vm9  ;;  %v960_v46 = vrot.slane %v959_v37, 4  ;;  %v5172_v47 = vrot.slane %v453_v39, 7  ;;  %v292_v54 = vld [vmem:[%s5082_s6 + $0x4c] sm:$0xf]  ;;  %v632_v59 = vld [vmem:[#allocation2 + $0xc] sm:$0xf] }
  0x87   : > { %v4339_v30 = vcombine.low %v1541_v15, %v1544_v25  ;;  %vm5166_vm11 = vmor %vm939_vm4, %vm940_vm5  ;;  %v691_v48 = vsel %vm5160_vm10, %v450_v38, %v690_v35  ;;  %v320_v49 = vshll.u32 %v274_v29, 16  ;;  %v311_v52 = vrot.slane %v309_v43, 7  ;;  %v275_v61 = vld [vmem:[%s5082_s6 + $0x8] sm:$0xf]  ;;  %v276_v3 = vld [vmem:[%s5082_s6 + $0xc] sm:$0xf] }
  0x88   : > { %v955_v50 = vsel %vm5166_vm11, %v950_v42, %v954_v26  ;;  %vm5180_vm12 = vmor %vm305_vm7, %vm306_vm8  ;;  %692 = vst [vmem:[#allocation2 + $0x6c] sm:$0xf] %v691_v48  ;;  %v319_v53 = vrot.slane %v317_v45, 7  ;;  %v462_v55 = vshrl.u32 %v291_v41, 16  ;;  %v965_v56 = vsel %vm5166_vm11, %v960_v46, %v964_v32  ;;  %v287_v8 = vld [vmem:[%s5082_s6 + $0x38] sm:$0xf] }
  0x89   : > { %1698 = vrot.lane.b32.xlu0 %v4339_v30, %s4869_s18  ;;  %v458_v57 = vor.u32 %v456_v40, %v5172_v47  ;;  %v460_v58 = vrot.slane %v5172_v47, 4  ;;  %v465_v60 = vshll.u32 %v291_v41, 16  ;;  %v4307_v62 = vcombine.low %v955_v50, %v965_v56  ;;  %s4870_s20 = smov 4   ;;  %v697_v12 = vld [vmem:[#allocation2 + $0x78] sm:$0xf]  ;;  %vm5204_vm13 = vmand %vm220_vm1, %vm305_vm7  ;;  %s4871_s7 = smov 12  }
  0x8a   : > { %v314_v63 = vor.u32 %v312_v44, %v311_v52  ;;  %v315_v0 = vrot.slane %v311_v52, 4  ;;  %v322_v2 = vor.u32 %v320_v49, %v319_v53  ;;  %v324_v5 = vrot.slane %v319_v53, 4  ;;  %v288_v18 = vld [vmem:[%s5082_s6 + $0x3c] sm:$0xf]  ;;  %v641_v28 = vld [vmem:[#allocation2 + $0x18] sm:$0xf] }
  0x8b   : > { %v459_v4 = vsel %vm5180_vm12, %v451_v33, %v458_v57  ;;  %v464_v6 = vrot.slane %v462_v55, 7  ;;  %v470_v7 = vshrl.u32 %v292_v54, 16  ;;  %v473_v11 = vshll.u32 %v292_v54, 16  ;;  %v638_v24 = vld [vmem:[#allocation2 + $0x14] sm:$0x1]  ;;  %s4872_s8 = smov 20  }
  0x8c   : > { %693 = vst.msk [vmem:[#allocation2 + $0x70] sm:$0xf] %vm217_vm0, %v459_v4  ;;  %v323_v9 = vsel %vm5180_vm12, %v315_v0, %v322_v2  ;;  %v633_v10 = vsel %vm5160_vm10, %v314_v63, %v632_v59  ;;  %v326_v13 = vshrl.u32 %v275_v61, 16  ;;  %v329_v17 = vshll.u32 %v275_v61, 16  ;;  %v694_v35 = vld [vmem:[#allocation2 + $0x74] sm:$0x1] }
  0x8d   : > { %1374 = vrot.lane.b32.xlu0 %v4307_v62, %s4870_s20  ;;  %634 = vst [vmem:[#allocation2 + $0xc] sm:$0xf] %v633_v10  ;;  %635 = vst.msk [vmem:[#allocation2 + $0x10] sm:$0xf] %vm217_vm0, %v323_v9  ;;  %v467_v14 = vor.u32 %v465_v60, %v464_v6  ;;  %v468_v15 = vrot.slane %v464_v6, 4  ;;  %v472_v16 = vrot.slane %v470_v7, 7  ;;  %v639_v41 = vsel %vm5204_vm13, %v324_v5, %v638_v24 }
  0x8e   : > { %v328_v20 = vrot.slane %v326_v13, 7  ;;  %v334_v21 = vshrl.u32 %v276_v3, 16  ;;  %v337_v22 = vshll.u32 %v276_v3, 16  ;;  %v428_v23 = vshrl.u32 %v287_v8, 16  ;;  %v683_v40 = vld [vmem:[#allocation2 + $0x60] sm:$0xf] }
  0x8f   : > { %v475_v25 = vor.u32 %v473_v11, %v472_v16  ;;  %v477_v26 = vrot.slane %v472_v16, 4  ;;  %v698_v27 = vsel %vm5160_vm10, %v467_v14, %v697_v12  ;;  %v431_v29 = vshll.u32 %v287_v8, 16  ;;  %v645_v42 = vld [vmem:[#allocation2 + $0x20] sm:$0x1]  ;;  %v687_v48 = vld [vmem:[#allocation2 + $0x68] sm:$0x1] }
  0x90   : > { %699 = vst [vmem:[#allocation2 + $0x78] sm:$0xf] %v698_v27  ;;  %v331_v30 = vor.u32 %v329_v17, %v328_v20  ;;  %v332_v31 = vrot.slane %v328_v20, 4  ;;  %v336_v32 = vrot.slane %v334_v21, 7  ;;  %v430_v33 = vrot.slane %v428_v23, 7  ;;  %s4873_s26 = smov 16  }
  0x91   : > { %v476_v37 = vsel %vm5180_vm12, %v468_v15, %v475_v25  ;;  %v436_v38 = vshrl.u32 %v288_v18, 16  ;;  %v439_v39 = vshll.u32 %v288_v18, 16  ;;  %640 = vst [vmem:[#allocation2 + $0x14] sm:$0x1] %v639_v41  ;;  %v1466_v49 = vld [vmem:[#allocation2 + $0x6c] sm:$0xe]  ;;  %v695_v55 = vsel %vm5204_vm13, %v460_v58, %v694_v35 }
  0x92   : > { %700 = vst.msk [vmem:[#allocation2 + $0x7c] sm:$0xf] %vm217_vm0, %v476_v37  ;;  %v339_v43 = vor.u32 %v337_v22, %v336_v32  ;;  %v341_v44 = vrot.slane %v336_v32, 4  ;;  %v642_v45 = vsel %vm5160_vm10, %v331_v30, %v641_v28  ;;  %v433_v46 = vor.u32 %v431_v29, %v430_v33  ;;  %v701_v50 = vld [vmem:[#allocation2 + $0x80] sm:$0x1]  ;;  %s4874_s28 = smov 24  }
  0x93   : > { %v4654_v52 = vld [vmem:[#allocation2 + $0x6c] sm:$0xff]   ;;  %643 = vst [vmem:[#allocation2 + $0x18] sm:$0xf] %v642_v45  ;;  %v434_v53 = vrot.slane %v430_v33, 4  ;;  %v438_v54 = vrot.slane %v436_v38, 7  ;;  %v702_v0 = vsel %vm5204_vm13, %v477_v26, %v701_v50  ;;  %v4332_v8 = vrot.slane %v1466_v49, 9 }
  0x94   : > { %v2509_v56 = vld [vmem:[#allocation2 + $0x6c] sm:$0xe]  ;;  %v340_v59 = vsel %vm5180_vm12, %v332_v31, %v339_v43  ;;  %v684_v60 = vsel %vm5160_vm10, %v433_v46, %v683_v40  ;;  %696 = vst [vmem:[#allocation2 + $0x74] sm:$0x1] %v695_v55  ;;  %v646_v61 = vsel %vm5204_vm13, %v341_v44, %v645_v42  ;;  %1891 = vrot.lane.b32.xlu1 %v4654_v52, %s4871_s7  ;;  %v1443_v63 = vld [vmem:[#allocation2 + $0x10] sm:$0xf] }
  0x95   : > { %v4655_v57 = vld [vmem:[#allocation2 + $0xc] sm:$0xff]   ;;  %644 = vst.msk [vmem:[#allocation2 + $0x1c] sm:$0xf] %vm217_vm0, %v340_v59  ;;  %v441_v47 = vor.u32 %v439_v39, %v438_v54  ;;  %v443_v62 = vrot.slane %v438_v54, 4  ;;  %685 = vst [vmem:[#allocation2 + $0x60] sm:$0xf] %v684_v60 }
  0x96   : > { %v1442_v58 = vld [vmem:[#allocation2 + $0xc] sm:$0xe]  ;;  %647 = vst [vmem:[#allocation2 + $0x20] sm:$0x1] %v646_v61  ;;  %1875 = vrot.lane.b32.xlu0 %v4655_v57, %s4871_s7  ;;  %v1547_v3 = vrot.slane %v1443_v63, 5  ;;  %v4395_v15 = vrot.slane %v2509_v56, 9 }
  0x97   : > { %v4324_v2 = vrot.slane %v1442_v58, 9  ;;  %v1467_v4 = vld [vmem:[#allocation2 + $0x70] sm:$0xf]  ;;  %v2485_v5 = vld [vmem:[#allocation2 + $0xc] sm:$0xe]  ;;  %v442_v6 = vsel %vm5180_vm12, %v434_v53, %v441_v47  ;;  %v688_v7 = vsel %vm5204_vm13, %v443_v62, %v687_v48  ;;  %s4875_s22 = smov 28  }
  0x98   : > { %703 = vst [vmem:[#allocation2 + $0x80] sm:$0x1] %v702_v0  ;;  %v1603_v9 = vrot.slane %v1467_v4, 5  ;;  %v2486_v10 = vld [vmem:[#allocation2 + $0x10] sm:$0xf]  ;;  %v1549_v11 = vrot.slane %v1547_v3, 4 }
  0x99   : > { %686 = vst.msk [vmem:[#allocation2 + $0x64] sm:$0xf] %vm217_vm0, %v442_v6  ;;  %689 = vst [vmem:[#allocation2 + $0x68] sm:$0x1] %v688_v7  ;;  %v4387_v12 = vrot.slane %v2485_v5, 9  ;;  %v2583_v13 = vrot.slane %v2486_v10, 5  ;;  %v1548_v21 = vsel %vm5146_vm6, %v4324_v2, %v1547_v3 }
  0x9a   : > { %v2510_v14 = vld [vmem:[#allocation2 + $0x70] sm:$0xf]  ;;  %v5237_v16 = vld [vmem:[#allocation2 + $0x6c] sm:$0xf]  ;;  %v4656_v17 = vld [vmem:[#allocation2 + $0x78] sm:$0xff]   ;;  %v1605_v20 = vrot.slane %v1603_v9, 4  ;;  %v5246_v32 = vsel %vm5146_vm6, %v4332_v8, %v1603_v9 }
  0x9b   : > { %v1444_v18 = vld [vmem:[#allocation2 + $0x14] sm:$0x1]  ;;  %v2585_v24 = vrot.slane %v2583_v13, 4  ;;  %1893 = vrot.lane.b32.xlu1 %v4656_v17, %s4871_s7  ;;  %v2639_v28 = vrot.slane %v2510_v14, 5  ;;  %v2584_v35 = vsel %vm5146_vm6, %v4387_v12, %v2583_v13  ;;  %v1159_v41 = vshrl.u32 %v5237_v16, 16  ;;  %s4876_s29 = smov 32  }
  0x9c   : > { %v1550_v22 = vrot.slane %v1444_v18, 5  ;;  %v2487_v23 = vld [vmem:[#allocation2 + $0x14] sm:$0x1]  ;;  %v4657_v29 = vld [vmem:[#allocation2 + $0x18] sm:$0xff]   ;;  %v1463_v30 = vld [vmem:[#allocation2 + $0x60] sm:$0xe] }
  0x9d   : > { %v1468_v25 = vld [vmem:[#allocation2 + $0x74] sm:$0x1]  ;;  %v2586_v26 = vrot.slane %v2487_v23, 5  ;;  %v4331_v37 = vrot.slane %v1463_v30, 9  ;;  %v915_v40 = vld [vmem:[#allocation2 + $0x60] sm:$0xf]  ;;  %1877 = vrot.lane.b32.xlu0 %v4657_v29, %s4871_s7  ;;  %v5260_v43 = vsel %vm5146_vm6, %v4395_v15, %v2639_v28 }
  0x9e   : > { %v2511_v27 = vld [vmem:[#allocation2 + $0x74] sm:$0x1]  ;;  %v1551_v31 = vsel %vm5146_vm6, %v1549_v11, %v1550_v22  ;;  %v1606_v33 = vrot.slane %v1468_v25, 5  ;;  %v2641_v44 = vrot.slane %v2639_v28, 4  ;;  %v894_v46 = vld [vmem:[#allocation2 + $0xc] sm:$0xf] }
  0x9f   : > { %v4340_v38 = vcombine.low %v1548_v21, %v1551_v31  ;;  %v2587_v39 = vsel %vm5146_vm6, %v2585_v24, %v2586_v26  ;;  %v2642_v45 = vrot.slane %v2511_v27, 5  ;;  %v1135_v59 = vshrl.u32 %v915_v40, 16  ;;  %v895_v58 = vld [vmem:[#allocation2 + $0x10] sm:$0xf]  ;;  %v896_v7 = vld [vmem:[#allocation2 + $0x14] sm:$0x1] }
  0xa0   : > { %v5256_v42 = vsel %vm5146_vm6, %v1605_v20, %v1606_v33  ;;  %v1464_v48 = vld [vmem:[#allocation2 + $0x64] sm:$0xf]  ;;  %v1465_v49 = vld [vmem:[#allocation2 + $0x68] sm:$0x1]  ;;  %v4403_v52 = vcombine.low %v2584_v35, %v2587_v39  ;;  %v1138_v61 = vshll.u32 %v915_v40, 16  ;;  %v967_v8 = vshrl.u32 %v894_v46, 16 }
  0xa1   : > { %v4348_v50 = vcombine.low %v5246_v32, %v5256_v42  ;;  %v916_v53 = vld [vmem:[#allocation2 + $0x64] sm:$0xf]  ;;  %v1596_v54 = vrot.slane %v1464_v48, 5  ;;  %v1599_v55 = vrot.slane %v1465_v49, 5  ;;  %v5266_v56 = vsel %vm5146_vm6, %v2641_v44, %v2642_v45  ;;  %v917_v57 = vld [vmem:[#allocation2 + $0x68] sm:$0x1]  ;;  %1700 = vrot.lane.b32.xlu0 %v4340_v38, %s4869_s18 }
  0xa2   : > { %v4411_v60 = vcombine.low %v5260_v43, %v5266_v56  ;;  %v1144_v47 = vshll.u32 %v916_v53, 16  ;;  %v1148_v62 = vshrl.u32 %v916_v53, 16  ;;  %v1137_v2 = vrot.slane %v1135_v59, 4  ;;  %v1940_v13 = vld [vmem:[#allocation2 + $0xc] sm:$0xf]  ;;  %s4290_s17 = sshll.u32 %s5078_s30, 8 }
  0xa3   : > { %v1597_v63 = vsel %vm5146_vm6, %v4331_v37, %v1596_v54  ;;  %v1598_v0 = vrot.slane %v1596_v54, 4  ;;  %v1154_v3 = vshll.u32 %v917_v57, 16  ;;  %v1140_v4 = vrot.slane %v1138_v61, 5  ;;  %v1941_v20 = vld [vmem:[#allocation2 + $0x10] sm:$0xf]  ;;  %s6157_s25 = scalar_lea.vmem [#allocation10], %s4290_s17 }
  0xa4   : > { %v1146_v5 = vrot.slane %v1144_v47, 5  ;;  %v1150_v6 = vrot.slane %v1148_v62, 4  ;;  %v970_v11 = vshll.u32 %v894_v46, 16  ;;  %v976_v12 = vshll.u32 %v895_v58, 16  ;;  %v1942_v32 = vld [vmem:[#allocation2 + $0x14] sm:$0x1] }
  0xa5   : > { %v1600_v9 = vsel %vm5146_vm6, %v1598_v0, %v1599_v55  ;;  %v1156_v10 = vrot.slane %v1154_v3, 5  ;;  %v1141_v15 = vor.u32 %v1140_v4, %v1137_v2  ;;  %v969_v18 = vrot.slane %v967_v8, 4  ;;  %2741 = vrot.lane.b32.xlu0 %v4403_v52, %s4872_s8  ;;  %v919_v40 = vld [vmem:[#allocation2 + $0x70] sm:$0xf]  ;;  %v920_v53 = vld [vmem:[#allocation2 + $0x74] sm:$0x1] }
  0xa6   : > { %v4347_v14 = vcombine.low %v1597_v63, %v1600_v9  ;;  %v1151_v17 = vor.u32 %v1150_v6, %v1146_v5  ;;  %v972_v21 = vrot.slane %v970_v11, 5  ;;  %v978_v22 = vrot.slane %v976_v12, 5  ;;  %v1964_v63 = vld [vmem:[#allocation2 + $0x6c] sm:$0xf]  ;;  %v1965_v4 = vld [vmem:[#allocation2 + $0x70] sm:$0xf] }
  0xa7   : > { %v980_v23 = vshrl.u32 %v895_v58, 16  ;;  %v986_v24 = vshll.u32 %v896_v7, 16  ;;  %v1142_v25 = vrot.slane %v1141_v15, 4  ;;  %v1989_v27 = vshrl.u32 %v1940_v13, 16  ;;  %v1966_v8 = vld [vmem:[#allocation2 + $0x74] sm:$0x1] }
  0xa8   : > { %1714 = vrot.lane.b32.xlu1 %v4347_v14, %s4869_s18  ;;  %v1152_v26 = vrot.slane %v1151_v17, 4  ;;  %v1992_v28 = vshll.u32 %v1940_v13, 16  ;;  %v973_v29 = vor.u32 %v972_v21, %v969_v18  ;;  %v1998_v33 = vshll.u32 %v1941_v20, 16  ;;  %v1943_v13 = vld [vmem:[#allocation2 + $0x18] sm:$0xf]  ;;  %s4509_s11 = sshll.u32 %s4920_s16, 12 }
  0xa9   : > { %v982_v30 = vrot.slane %v980_v23, 4  ;;  %v988_v31 = vrot.slane %v986_v24, 5  ;;  %v1147_v35 = vsel %vm5166_vm11, %v1142_v25, %v1146_v5  ;;  %v1991_v38 = vrot.slane %v1989_v27, 4  ;;  %v1944_v25 = vld [vmem:[#allocation2 + $0x1c] sm:$0xf]  ;;  %s4186_s21 = sshll.u32 %s6157_s25, 4  ;;  %s6250_s4 = scalar_lea.hbm %s6306_s3, %s4509_s11  ;;  %s6254_s21 = int_to_ptr.vmem [resolvable:$true] %s4186_s21 }
  0xaa   : > { %v1157_v37 = vsel %vm5166_vm11, %v1152_v26, %v1156_v10  ;;  %v1994_v39 = vrot.slane %v1992_v28, 5  ;;  %v974_v44 = vrot.slane %v973_v29, 4  ;;  %v2000_v46 = vrot.slane %v1998_v33, 5  ;;  %s4173_s16 = scalar_lea.sflag [#allocation6], %s5078_s30  ;;  %s4791_s23 = scalar_lea.vmem %s6254_s21, 4096 }
  0xab   : > { %v4315_v42 = vcombine.low %v1147_v35, %v1157_v37  ;;  %v983_v45 = vor.u32 %v982_v30, %v978_v22  ;;  %v2002_v49 = vshrl.u32 %v1941_v20, 16  ;;  %v2008_v52 = vshll.u32 %v1942_v32, 16  ;;  %v1945_v30 = vld [vmem:[#allocation2 + $0x20] sm:$0x1]  ;;  %v1967_v37 = vld [vmem:[#allocation2 + $0x78] sm:$0xf]  ;;  %p4792_p11 = scmp.ne.s32.totalorder %s6254_s21, %s4791_s23 }
  0xac   : > { %1716 = vrot.lane.b32.xlu1 %v4348_v50, %s4869_s18  ;;  %v1995_v48 = vor.u32 %v1994_v39, %v1991_v38  ;;  %v1161_v54 = vrot.slane %v1159_v41, 4  ;;  %v979_v55 = vsel %vm5166_vm11, %v974_v44, %v978_v22  ;;  %v1162_v59 = vshll.u32 %v5237_v16, 16  ;;  %p6339_p0 = scmp.ne.s32.totalorder %s6316_s9, 0 }
  0xad   : > { %1390 = vrot.lane.b32.xlu0 %v4315_v42, %s4870_s20  ;;  %v984_v57 = vrot.slane %v983_v45, 4  ;;  %v1168_v61 = vshll.u32 %v919_v40, 16  ;;  %v2004_v62 = vrot.slane %v2002_v49, 4  ;;  %v2010_v58 = vrot.slane %v2008_v52, 5  ;;  %v1968_v49 = vld [vmem:[#allocation2 + $0x7c] sm:$0xf] }
  0xae   : > { %v1996_v47 = vrot.slane %v1995_v48, 4  ;;  %v1172_v50 = vshrl.u32 %v919_v40, 16  ;;  %v1164_v2 = vrot.slane %v1162_v59, 5  ;;  %v1178_v41 = vshll.u32 %v920_v53, 16  ;;  %p4793_p2 = pnand %p4792_p11, %p6339_p0 }
  0xaf   : > { %v989_v0 = vsel %vm5166_vm11, %v984_v57, %v988_v31  ;;  %v1170_v3 = vrot.slane %v1168_v61, 5  ;;  %v2005_v6 = vor.u32 %v2004_v62, %v2000_v46  ;;  %v2181_v11 = vshrl.u32 %v1964_v63, 16 }
  0xb0   : > { %2757 = vrot.lane.b32.xlu1 %v4411_v60, %s4872_s8  ;;  %v4308_v5 = vcombine.low %v979_v55, %v989_v0  ;;  %v2001_v16 = vsel %vm5166_vm11, %v1996_v47, %v2000_v46  ;;  %v1174_v7 = vrot.slane %v1172_v50, 4  ;;  %v1165_v9 = vor.u32 %v1164_v2, %v1161_v54  ;;  %v1969_v55 = vld [vmem:[#allocation2 + $0x80] sm:$0x1]  ;;  %v2489_v50 = vld [vmem:[#allocation2 + $0x1c] sm:$0xf]  ;;  %p4794_p3 = pneg %p4793_p2 }
  0xb1   : > { %v1180_v10 = vrot.slane %v1178_v41, 5  ;;  %v2184_v12 = vshll.u32 %v1964_v63, 16  ;;  %v2006_v14 = vrot.slane %v2005_v6, 4  ;;  %v2190_v17 = vshll.u32 %v1965_v4, 16  ;;  %v2490_v6 = vld [vmem:[#allocation2 + $0x20] sm:$0x1] }
  0xb2   : > { %v1175_v15 = vor.u32 %v1174_v7, %v1170_v3  ;;  %v2194_v18 = vshrl.u32 %v1965_v4, 16  ;;  %v1166_v20 = vrot.slane %v1165_v9, 4  ;;  %v2183_v21 = vrot.slane %v2181_v11, 4  ;;  %v277_v7 = vld [vmem:[%s5082_s6 + $0x10] sm:$0xf] }
  0xb3   : > { %v2186_v43 = vrot.slane %v2184_v12, 5  ;;  %v2200_v56 = vshll.u32 %v1966_v8, 16  ;;  %v2011_v60 = vsel %vm5166_vm11, %v2006_v14, %v2010_v58  ;;  %v2192_v23 = vrot.slane %v2190_v17, 5  ;;  %v2488_v58 = vld [vmem:[#allocation2 + $0x18] sm:$0xe] }
  0xb4   : > { %1376 = vrot.lane.b32.xlu1 %v4308_v5, %s4870_s20  ;;  %v1176_v22 = vrot.slane %v1175_v15, 4  ;;  %v2196_v24 = vrot.slane %v2194_v18, 4  ;;  %v4371_v26 = vcombine.low %v2001_v16, %v2011_v60  ;;  %v1171_v27 = vsel %vm5166_vm11, %v1166_v20, %v1170_v3  ;;  %v2512_v12 = vld [vmem:[#allocation2 + $0x78] sm:$0xe]  ;;  %v2513_v18 = vld [vmem:[#allocation2 + $0x7c] sm:$0xf] }
  0xb5   : > { %v2187_v28 = vor.u32 %v2186_v43, %v2183_v21  ;;  %v2202_v29 = vrot.slane %v2200_v56, 5  ;;  %v2013_v33 = vshrl.u32 %v1943_v13, 16  ;;  %v2016_v35 = vshll.u32 %v1943_v13, 16  ;;  %v2514_v20 = vld [vmem:[#allocation2 + $0x80] sm:$0x1] }
  0xb6   : > { %v1181_v31 = vsel %vm5166_vm11, %v1176_v22, %v1180_v10  ;;  %v2197_v32 = vor.u32 %v2196_v24, %v2192_v23  ;;  %2420 = vrot.lane.b32.xlu0 %v4371_v26, %s4873_s26  ;;  %v2022_v40 = vshll.u32 %v1944_v25, 16  ;;  %v2026_v42 = vshrl.u32 %v1944_v25, 16  ;;  %v278_v26 = vld [vmem:[%s5082_s6 + $0x14] sm:$0xf] }
  0xb7   : > { %v4316_v38 = vcombine.low %v1171_v27, %v1181_v31  ;;  %v2188_v39 = vrot.slane %v2187_v28, 4  ;;  %v2015_v45 = vrot.slane %v2013_v33, 4  ;;  %v2018_v46 = vrot.slane %v2016_v35, 5  ;;  %v293_v31 = vld [vmem:[%s5082_s6 + $0x50] sm:$0xf] }
  0xb8   : > { %v2198_v44 = vrot.slane %v2197_v32, 4  ;;  %v2032_v48 = vshll.u32 %v1945_v30, 16  ;;  %v2024_v53 = vrot.slane %v2022_v40, 5  ;;  %v2028_v54 = vrot.slane %v2026_v42, 4 }
  0xb9   : > { %1392 = vrot.lane.b32.xlu1 %v4316_v38, %s4870_s20  ;;  %v2193_v52 = vsel %vm5166_vm11, %v2188_v39, %v2192_v23  ;;  %v2205_v57 = vshrl.u32 %v1967_v37, 16  ;;  %v2019_v61 = vor.u32 %v2018_v46, %v2015_v45  ;;  %v2208_v62 = vshll.u32 %v1967_v37, 16  ;;  %v648_v38 = vld [vmem:[#allocation2 + $0x24] sm:$0xf]  ;;  %v294_v45 = vld [vmem:[%s5082_s6 + $0x54] sm:$0xf] }
  0xba   : > { %v2203_v59 = vsel %vm5166_vm11, %v2198_v44, %v2202_v29  ;;  %v2034_v47 = vrot.slane %v2032_v48, 5  ;;  %v2029_v0 = vor.u32 %v2028_v54, %v2024_v53  ;;  %v2214_v3 = vshll.u32 %v1968_v49, 16 }
  0xbb   : > { %v4379_v63 = vcombine.low %v2193_v52, %v2203_v59  ;;  %v2207_v2 = vrot.slane %v2205_v57, 4  ;;  %v2020_v41 = vrot.slane %v2019_v61, 4  ;;  %v2210_v4 = vrot.slane %v2208_v62, 5  ;;  %v704_v61 = vld [vmem:[#allocation2 + $0x84] sm:$0xf]  ;;  %v4658_v62 = vld [vmem:[#allocation2 + $0x18] sm:$0xff]  }
  0xbc   : > { %v2218_v5 = vshrl.u32 %v1968_v49, 16  ;;  %v2224_v16 = vshll.u32 %v1969_v55, 16  ;;  %v2030_v8 = vrot.slane %v2029_v0, 4  ;;  %v2216_v9 = vrot.slane %v2214_v3, 5  ;;  %v2985_v0 = vld [vmem:[#allocation2 + $0x1c] sm:$0xf] }
  0xbd   : > { %2436 = vrot.lane.b32.xlu1 %v4379_v63, %s4873_s26  ;;  %v4388_v10 = vrot.slane %v2488_v58, 9  ;;  %v2590_v11 = vrot.slane %v2489_v50, 5  ;;  %v2025_v13 = vsel %vm5166_vm11, %v2020_v41, %v2024_v53  ;;  %v2211_v14 = vor.u32 %v2210_v4, %v2207_v2  ;;  %v2984_v53 = vld [vmem:[#allocation2 + $0x18] sm:$0xf]  ;;  %v2986_v41 = vld [vmem:[#allocation2 + $0x20] sm:$0x1] }
  0xbe   : > { %v2220_v15 = vrot.slane %v2218_v5, 4  ;;  %v2226_v17 = vrot.slane %v2224_v16, 5  ;;  %v2035_v21 = vsel %vm5166_vm11, %v2030_v8, %v2034_v47  ;;  %v2593_v60 = vrot.slane %v2490_v6, 5 }
  0xbf   : > { %v2591_v43 = vsel %vm5146_vm6, %v4388_v10, %v2590_v11  ;;  %v2592_v56 = vrot.slane %v2590_v11, 4  ;;  %v4372_v22 = vcombine.low %v2025_v13, %v2035_v21  ;;  %v2212_v23 = vrot.slane %v2211_v14, 4  ;;  %v3008_v13 = vld [vmem:[#allocation2 + $0x78] sm:$0xf] }
  0xc0   : > { %v2221_v24 = vor.u32 %v2220_v15, %v2216_v9  ;;  %v4396_v25 = vrot.slane %v2512_v12, 9  ;;  %v2646_v28 = vrot.slane %v2513_v18, 5  ;;  %v2649_v29 = vrot.slane %v2514_v20, 5  ;;  %v3009_v20 = vld [vmem:[#allocation2 + $0x7c] sm:$0xf] }
  0xc1   : > { %v2594_v27 = vsel %vm5146_vm6, %v2592_v56, %v2593_v60  ;;  %v343_v30 = vshrl.u32 %v277_v7, 16  ;;  %2422 = vrot.lane.b32.xlu0 %v4372_v22, %s4873_s26  ;;  %v2217_v32 = vsel %vm5166_vm11, %v2212_v23, %v2216_v9  ;;  %v346_v37 = vshll.u32 %v277_v7, 16  ;;  %v4659_v21 = vld [vmem:[#allocation2 + $0x78] sm:$0xff]   ;;  %v3010_v23 = vld [vmem:[#allocation2 + $0x80] sm:$0x1] }
  0xc2   : > { %v2222_v33 = vrot.slane %v2221_v24, 4  ;;  %v4404_v35 = vcombine.low %v2591_v43, %v2594_v27  ;;  %v2647_v39 = vsel %vm5146_vm6, %v4396_v25, %v2646_v28  ;;  %v2648_v40 = vrot.slane %v2646_v28, 4  ;;  %v652_v28 = vld [vmem:[#allocation2 + $0x2c] sm:$0x1] }
  0xc3   : > { %v345_v42 = vrot.slane %v343_v30, 7  ;;  %v351_v44 = vshrl.u32 %v278_v26, 16  ;;  %v354_v48 = vshll.u32 %v278_v26, 16  ;;  %v479_v49 = vshrl.u32 %v293_v31, 16 }
  0xc4   : > { %v2227_v46 = vsel %vm5166_vm11, %v2222_v33, %v2226_v17  ;;  %v482_v52 = vshll.u32 %v293_v31, 16  ;;  %v2650_v55 = vsel %vm5146_vm6, %v2648_v40, %v2649_v29  ;;  %v487_v63 = vshrl.u32 %v294_v45, 16  ;;  %v708_v33 = vld [vmem:[#allocation2 + $0x8c] sm:$0x1]  ;;  %v3529_v40 = vld [vmem:[#allocation2 + $0x18] sm:$0xe] }
  0xc5   : > { %v4380_v54 = vcombine.low %v2217_v32, %v2227_v46  ;;  %v348_v57 = vor.u32 %v346_v37, %v345_v42  ;;  %v349_v59 = vrot.slane %v345_v42, 4  ;;  %2743 = vrot.lane.b32.xlu0 %v4404_v35, %s4872_s8  ;;  %v4412_v47 = vcombine.low %v2647_v39, %v2650_v55 }
  0xc6   : > { %v353_v58 = vrot.slane %v351_v44, 7  ;;  %v481_v50 = vrot.slane %v479_v49, 7  ;;  %v490_v3 = vshll.u32 %v294_v45, 16  ;;  %v3033_v4 = vshrl.u32 %v2984_v53, 16 }
  0xc7   : > { %2438 = vrot.lane.b32.xlu1 %v4380_v54, %s4873_s26  ;;  %v649_v2 = vsel %vm5160_vm10, %v348_v57, %v648_v38  ;;  %v3036_v5 = vshll.u32 %v2984_v53, 16  ;;  %v489_v9 = vrot.slane %v487_v63, 7  ;;  %v3042_v12 = vshll.u32 %v2985_v0, 16 }
  0xc8   : > { %v356_v16 = vor.u32 %v354_v48, %v353_v58  ;;  %v358_v6 = vrot.slane %v353_v58, 4  ;;  %650 = vst [vmem:[#allocation2 + $0x24] sm:$0xf] %v649_v2  ;;  %v484_v7 = vor.u32 %v482_v52, %v481_v50  ;;  %v485_v8 = vrot.slane %v481_v50, 4 }
  0xc9   : > { %v3035_v10 = vrot.slane %v3033_v4, 4  ;;  %v3038_v11 = vrot.slane %v3036_v5, 5  ;;  %2919 = vrot.lane.b32.xlu0 %v4658_v62, %s4874_s28  ;;  %v3046_v17 = vshrl.u32 %v2985_v0, 16  ;;  %v3052_v18 = vshll.u32 %v2986_v41, 16 }
  0xca   : > { %v357_v14 = vsel %vm5180_vm12, %v349_v59, %v356_v16  ;;  %v705_v15 = vsel %vm5160_vm10, %v484_v7, %v704_v61  ;;  %v492_v43 = vor.u32 %v490_v3, %v489_v9  ;;  %v494_v56 = vrot.slane %v489_v9, 4  ;;  %v3530_v61 = vld [vmem:[#allocation2 + $0x1c] sm:$0xf] }
  0xcb   : > { %2759 = vrot.lane.b32.xlu1 %v4412_v47, %s4872_s8  ;;  %651 = vst.msk [vmem:[#allocation2 + $0x28] sm:$0xf] %vm217_vm0, %v357_v14  ;;  %706 = vst [vmem:[#allocation2 + $0x84] sm:$0xf] %v705_v15  ;;  %v3039_v60 = vor.u32 %v3038_v11, %v3035_v10  ;;  %v3044_v22 = vrot.slane %v3042_v12, 5  ;;  %v3048_v24 = vrot.slane %v3046_v17, 4  ;;  %v653_v46 = vsel %vm5204_vm13, %v358_v6, %v652_v28 }
  0xcc   : > { %v3054_v25 = vrot.slane %v3052_v18, 5  ;;  %v3225_v26 = vshrl.u32 %v3008_v13, 16  ;;  %v3228_v27 = vshll.u32 %v3008_v13, 16  ;;  %v493_v29 = vsel %vm5180_vm12, %v485_v8, %v492_v43  ;;  %654 = vst [vmem:[#allocation2 + $0x2c] sm:$0x1] %v653_v46 }
  0xcd   : > { %v3040_v30 = vrot.slane %v3039_v60, 4  ;;  %v3234_v31 = vshll.u32 %v3009_v20, 16  ;;  %v3238_v32 = vshrl.u32 %v3009_v20, 16  ;;  %707 = vst.msk [vmem:[#allocation2 + $0x88] sm:$0xf] %vm217_vm0, %v493_v29  ;;  %v3049_v35 = vor.u32 %v3048_v24, %v3044_v22 }
  0xce   : > { %v3227_v37 = vrot.slane %v3225_v26, 4  ;;  %v3230_v38 = vrot.slane %v3228_v27, 5  ;;  %v3244_v39 = vshll.u32 %v3010_v23, 16  ;;  %v709_v59 = vsel %vm5204_vm13, %v494_v56, %v708_v33  ;;  %v3531_v18 = vld [vmem:[#allocation2 + $0x20] sm:$0x1] }
  0xcf   : > { %2935 = vrot.lane.b32.xlu1 %v4659_v21, %s4874_s28  ;;  %v3045_v42 = vsel %vm5166_vm11, %v3040_v30, %v3044_v22  ;;  %v3236_v44 = vrot.slane %v3234_v31, 5  ;;  %v3240_v45 = vrot.slane %v3238_v32, 4  ;;  %v2987_v48 = vld [vmem:[#allocation2 + $0x24] sm:$0xf]  ;;  %v3050_v49 = vrot.slane %v3049_v35, 4 }
  0xd0   : > { %v3231_v52 = vor.u32 %v3230_v38, %v3227_v37  ;;  %v3246_v53 = vrot.slane %v3244_v39, 5  ;;  %v3057_v54 = vshrl.u32 %v2987_v48, 16  ;;  %v3060_v57 = vshll.u32 %v2987_v48, 16  ;;  %710 = vst [vmem:[#allocation2 + $0x8c] sm:$0x1] %v709_v59 }
  0xd1   : > { %v3241_v55 = vor.u32 %v3240_v45, %v3236_v44  ;;  %v4451_v47 = vrot.slane %v3529_v40, 9  ;;  %v3055_v58 = vsel %vm5166_vm11, %v3050_v49, %v3054_v25  ;;  %v3627_v7 = vrot.slane %v3530_v61, 5  ;;  %v3553_v20 = vld [vmem:[#allocation2 + $0x78] sm:$0xe]  ;;  %v3554_v27 = vld [vmem:[#allocation2 + $0x7c] sm:$0xf] }
  0xd2   : > { %v4660_v62 = vld [vmem:[#allocation2 + $0x24] sm:$0xff]   ;;  %v3232_v50 = vrot.slane %v3231_v52, 4  ;;  %v4435_v63 = vcombine.low %v3045_v42, %v3055_v58  ;;  %v3059_v3 = vrot.slane %v3057_v54, 4  ;;  %v3062_v41 = vrot.slane %v3060_v57, 5  ;;  %v3555_v28 = vld [vmem:[#allocation2 + $0x80] sm:$0x1] }
  0xd3   : > { %v3242_v0 = vrot.slane %v3241_v55, 4  ;;  %v2988_v2 = vld [vmem:[#allocation2 + $0x28] sm:$0xf]  ;;  %2921 = vrot.lane.b32.xlu0 %v4660_v62, %s4874_s28  ;;  %v3011_v6 = vld [vmem:[#allocation2 + $0x84] sm:$0xf]  ;;  %v3628_v26 = vsel %vm5146_vm6, %v4451_v47, %v3627_v7  ;;  %v3629_v33 = vrot.slane %v3627_v7, 4 }
  0xd4   : > { %v3237_v4 = vsel %vm5166_vm11, %v3232_v50, %v3236_v44  ;;  %v3066_v5 = vshll.u32 %v2988_v2, 16  ;;  %v3070_v16 = vshrl.u32 %v2988_v2, 16  ;;  %v4661_v8 = vld [vmem:[#allocation2 + $0x84] sm:$0xff]   ;;  %v3063_v10 = vor.u32 %v3062_v41, %v3059_v3  ;;  %v2989_v21 = vld [vmem:[#allocation2 + $0x2c] sm:$0x1] }
  0xd5   : > { %v3247_v9 = vsel %vm5166_vm11, %v3242_v0, %v3246_v53  ;;  %v3012_v11 = vld [vmem:[#allocation2 + $0x88] sm:$0xf]  ;;  %v3249_v12 = vshrl.u32 %v3011_v6, 16  ;;  %v3252_v17 = vshll.u32 %v3011_v6, 16  ;;  %2937 = vrot.lane.b32.xlu1 %v4661_v8, %s4874_s28  ;;  %v3076_v24 = vshll.u32 %v2989_v21, 16 }
  0xd6   : > { %v4443_v13 = vcombine.low %v3237_v4, %v3247_v9  ;;  %v3068_v14 = vrot.slane %v3066_v5, 5  ;;  %v3072_v15 = vrot.slane %v3070_v16, 4  ;;  %v3064_v43 = vrot.slane %v3063_v10, 4  ;;  %v897_v46 = vld [vmem:[#allocation2 + $0x18] sm:$0xf] }
  0xd7   : > { %v3251_v56 = vrot.slane %v3249_v12, 4  ;;  %v3258_v60 = vshll.u32 %v3012_v11, 16  ;;  %v3262_v22 = vshrl.u32 %v3012_v11, 16  ;;  %3464 = vrot.lane.b32.xlu0 %v4435_v63, %s4875_s22  ;;  %v3254_v25 = vrot.slane %v3252_v17, 5  ;;  %v3013_v30 = vld [vmem:[#allocation2 + $0x8c] sm:$0x1] }
  0xd8   : > { %v3073_v23 = vor.u32 %v3072_v15, %v3068_v14  ;;  %v3069_v29 = vsel %vm5166_vm11, %v3064_v43, %v3068_v14  ;;  %v3078_v37 = vrot.slane %v3076_v24, 5  ;;  %v3268_v39 = vshll.u32 %v3013_v30, 16  ;;  %v898_v54 = vld [vmem:[#allocation2 + $0x1c] sm:$0xf]  ;;  %v899_v47 = vld [vmem:[#allocation2 + $0x20] sm:$0x1] }
  0xd9   : > { %v3260_v31 = vrot.slane %v3258_v60, 5  ;;  %v3264_v32 = vrot.slane %v3262_v22, 4  ;;  %v3255_v38 = vor.u32 %v3254_v25, %v3251_v56  ;;  %3480 = vrot.lane.b32.xlu1 %v4443_v13, %s4875_s22  ;;  %v3630_v42 = vrot.slane %v3531_v18, 5  ;;  %v921_v0 = vld [vmem:[#allocation2 + $0x78] sm:$0xf] }
  0xda   : > { %v3074_v35 = vrot.slane %v3073_v23, 4  ;;  %v4459_v44 = vrot.slane %v3553_v20, 9  ;;  %v3683_v45 = vrot.slane %v3554_v27, 5  ;;  %v3270_v52 = vrot.slane %v3268_v39, 5  ;;  %v922_v5 = vld [vmem:[#allocation2 + $0x7c] sm:$0xf] }
  0xdb   : > { %v3265_v40 = vor.u32 %v3264_v32, %v3260_v31  ;;  %v3256_v49 = vrot.slane %v3255_v38, 4  ;;  %v3686_v53 = vrot.slane %v3555_v28, 5  ;;  %v3631_v59 = vsel %vm5146_vm6, %v3629_v33, %v3630_v42  ;;  %v923_v9 = vld [vmem:[#allocation2 + $0x80] sm:$0x1]  ;;  %v3532_v10 = vld [vmem:[#allocation2 + $0x24] sm:$0xe] }
  0xdc   : > { %v3079_v48 = vsel %vm5166_vm11, %v3074_v35, %v3078_v37  ;;  %v3684_v61 = vsel %vm5146_vm6, %v4459_v44, %v3683_v45  ;;  %v4467_v58 = vcombine.low %v3628_v26, %v3631_v59  ;;  %v3685_v50 = vrot.slane %v3683_v45, 4  ;;  %v3533_v15 = vld [vmem:[#allocation2 + $0x28] sm:$0xf]  ;;  %v3534_v17 = vld [vmem:[#allocation2 + $0x2c] sm:$0x1] }
  0xdd   : > { %v4436_v55 = vcombine.low %v3069_v29, %v3079_v48  ;;  %v3266_v57 = vrot.slane %v3265_v40, 4  ;;  %v3261_v62 = vsel %vm5166_vm11, %v3256_v49, %v3260_v31  ;;  %v991_v63 = vshrl.u32 %v897_v46, 16  ;;  %v3556_v18 = vld [vmem:[#allocation2 + $0x84] sm:$0xe]  ;;  %v3557_v60 = vld [vmem:[#allocation2 + $0x88] sm:$0xf] }
  0xde   : > { %v994_v3 = vshll.u32 %v897_v46, 16  ;;  %v1000_v41 = vshll.u32 %v898_v54, 16  ;;  %v1004_v4 = vshrl.u32 %v898_v54, 16  ;;  %v3687_v6 = vsel %vm5146_vm6, %v3685_v50, %v3686_v53  ;;  %v3558_v39 = vld [vmem:[#allocation2 + $0x8c] sm:$0x1] }
  0xdf   : > { %3466 = vrot.lane.b32.xlu0 %v4436_v55, %s4875_s22  ;;  %v3271_v2 = vsel %vm5166_vm11, %v3266_v57, %v3270_v52  ;;  %v993_v7 = vrot.slane %v991_v63, 4  ;;  %v1010_v8 = vshll.u32 %v899_v47, 16  ;;  %v4475_v11 = vcombine.low %v3684_v61, %v3687_v6  ;;  %v900_v48 = vld [vmem:[#allocation2 + $0x24] sm:$0xf]  ;;  %v901_v55 = vld [vmem:[#allocation2 + $0x28] sm:$0xf] }
  0xe0   : > { %v4444_v16 = vcombine.low %v3261_v62, %v3271_v2  ;;  %v996_v12 = vrot.slane %v994_v3, 5  ;;  %v1002_v13 = vrot.slane %v1000_v41, 5  ;;  %v1006_v14 = vrot.slane %v1004_v4, 4  ;;  %v902_v50 = vld [vmem:[#allocation2 + $0x2c] sm:$0x1] }
  0xe1   : > { %v1012_v20 = vrot.slane %v1010_v8, 5  ;;  %v1183_v21 = vshrl.u32 %v921_v0, 16  ;;  %v1186_v43 = vshll.u32 %v921_v0, 16  ;;  %v1192_v56 = vshll.u32 %v922_v5, 16  ;;  %v924_v2 = vld [vmem:[#allocation2 + $0x84] sm:$0xf] }
  0xe2   : > { %3482 = vrot.lane.b32.xlu1 %v4444_v16, %s4875_s22  ;;  %v997_v22 = vor.u32 %v996_v12, %v993_v7  ;;  %v1007_v23 = vor.u32 %v1006_v14, %v1002_v13  ;;  %v1196_v24 = vshrl.u32 %v922_v5, 16  ;;  %v1202_v25 = vshll.u32 %v923_v9, 16  ;;  %v925_v16 = vld [vmem:[#allocation2 + $0x88] sm:$0xf]  ;;  %v1446_v12 = vld [vmem:[#allocation2 + $0x1c] sm:$0xf] }
  0xe3   : > { %3785 = vrot.lane.b32.xlu0 %v4467_v58, %s4876_s29  ;;  %v1185_v26 = vrot.slane %v1183_v21, 4  ;;  %v1188_v27 = vrot.slane %v1186_v43, 5  ;;  %v1194_v28 = vrot.slane %v1192_v56, 5  ;;  %v4452_v29 = vrot.slane %v3532_v10, 9  ;;  %v926_v10 = vld [vmem:[#allocation2 + $0x8c] sm:$0x1] }
  0xe4   : > { %v998_v30 = vrot.slane %v997_v22, 4  ;;  %v1008_v31 = vrot.slane %v1007_v23, 4  ;;  %v1198_v32 = vrot.slane %v1196_v24, 4  ;;  %v1204_v33 = vrot.slane %v1202_v25, 5 }
  0xe5   : > { %v1189_v35 = vor.u32 %v1188_v27, %v1185_v26  ;;  %v3634_v37 = vrot.slane %v3533_v15, 5  ;;  %v3637_v38 = vrot.slane %v3534_v17, 5  ;;  %v4460_v40 = vrot.slane %v3556_v18, 9  ;;  %v1447_v18 = vld [vmem:[#allocation2 + $0x20] sm:$0x1] }
  0xe6   : > { %3801 = vrot.lane.b32.xlu1 %v4475_v11, %s4876_s29  ;;  %v1003_v42 = vsel %vm5166_vm11, %v998_v30, %v1002_v13  ;;  %v1013_v44 = vsel %vm5166_vm11, %v1008_v31, %v1012_v20  ;;  %v1199_v45 = vor.u32 %v1198_v32, %v1194_v28  ;;  %v3690_v46 = vrot.slane %v3557_v60, 5  ;;  %v1445_v11 = vld [vmem:[#allocation2 + $0x18] sm:$0xe]  ;;  %v1470_v26 = vld [vmem:[#allocation2 + $0x7c] sm:$0xf] }
  0xe7   : > { %v4309_v49 = vcombine.low %v1003_v42, %v1013_v44  ;;  %v1190_v52 = vrot.slane %v1189_v35, 4  ;;  %v3635_v53 = vsel %vm5146_vm6, %v4452_v29, %v3634_v37  ;;  %v3636_v54 = vrot.slane %v3634_v37, 4  ;;  %v1469_v60 = vld [vmem:[#allocation2 + $0x78] sm:$0xe]  ;;  %v1471_v27 = vld [vmem:[#allocation2 + $0x80] sm:$0x1] }
  0xe8   : > { %v1200_v57 = vrot.slane %v1199_v45, 4  ;;  %v3691_v59 = vsel %vm5146_vm6, %v4460_v40, %v3690_v46  ;;  %v3692_v61 = vrot.slane %v3690_v46, 4  ;;  %v3693_v47 = vrot.slane %v3558_v39, 5  ;;  %v1448_v44 = vld [vmem:[#allocation2 + $0x24] sm:$0xe] }
  0xe9   : > { %1378 = vrot.lane.b32.xlu0 %v4309_v49, %s4870_s20  ;;  %v1195_v62 = vsel %vm5166_vm11, %v1190_v52, %v1194_v28  ;;  %v3638_v58 = vsel %vm5146_vm6, %v3636_v54, %v3637_v38  ;;  %v1015_v63 = vshrl.u32 %v900_v48, 16  ;;  %v1018_v0 = vshll.u32 %v900_v48, 16  ;;  %v1449_v45 = vld [vmem:[#allocation2 + $0x28] sm:$0xf]  ;;  %v1472_v54 = vld [vmem:[#allocation2 + $0x84] sm:$0xe] }
  0xea   : > { %v1205_v3 = vsel %vm5166_vm11, %v1200_v57, %v1204_v33  ;;  %v4468_v41 = vcombine.low %v3635_v53, %v3638_v58  ;;  %v3694_v4 = vsel %vm5146_vm6, %v3692_v61, %v3693_v47  ;;  %v1024_v5 = vshll.u32 %v901_v55, 16  ;;  %v1450_v53 = vld [vmem:[#allocation2 + $0x2c] sm:$0x1] }
  0xeb   : > { %v4317_v6 = vcombine.low %v1195_v62, %v1205_v3  ;;  %v4476_v7 = vcombine.low %v3691_v59, %v3694_v4  ;;  %v1017_v8 = vrot.slane %v1015_v63, 4  ;;  %v1020_v9 = vrot.slane %v1018_v0, 5  ;;  %v279_v62 = vld [vmem:[%s5082_s6 + $0x18] sm:$0xf] }
  0xec   : > { %v1026_v13 = vrot.slane %v1024_v5, 5  ;;  %v1028_v14 = vshrl.u32 %v901_v55, 16  ;;  %v1034_v15 = vshll.u32 %v902_v50, 16  ;;  %v1207_v17 = vshrl.u32 %v924_v2, 16  ;;  %v1473_v55 = vld [vmem:[#allocation2 + $0x88] sm:$0xf] }
  0xed   : > { %1394 = vrot.lane.b32.xlu1 %v4317_v6, %s4870_s20  ;;  %3787 = vrot.lane.b32.xlu0 %v4468_v41, %s4876_s29  ;;  %v1021_v20 = vor.u32 %v1020_v9, %v1017_v8  ;;  %v1210_v21 = vshll.u32 %v924_v2, 16  ;;  %v1216_v43 = vshll.u32 %v925_v16, 16  ;;  %v1220_v56 = vshrl.u32 %v925_v16, 16  ;;  %v1474_v5 = vld [vmem:[#allocation2 + $0x8c] sm:$0x1] }
  0xee   : > { %v1030_v22 = vrot.slane %v1028_v14, 4  ;;  %v1036_v23 = vrot.slane %v1034_v15, 5  ;;  %v1209_v24 = vrot.slane %v1207_v17, 4  ;;  %v1226_v25 = vshll.u32 %v926_v10, 16  ;;  %v280_v9 = vld [vmem:[%s5082_s6 + $0x1c] sm:$0xf] }
  0xef   : > { %v1022_v28 = vrot.slane %v1021_v20, 4  ;;  %v1212_v29 = vrot.slane %v1210_v21, 5  ;;  %v1218_v30 = vrot.slane %v1216_v43, 5  ;;  %v1222_v31 = vrot.slane %v1220_v56, 4  ;;  %v295_v14 = vld [vmem:[%s5082_s6 + $0x58] sm:$0xf] }
  0xf0   : > { %v1031_v32 = vor.u32 %v1030_v22, %v1026_v13  ;;  %v1228_v33 = vrot.slane %v1226_v25, 5  ;;  %v4325_v35 = vrot.slane %v1445_v11, 9  ;;  %v1554_v37 = vrot.slane %v1446_v12, 5  ;;  %v296_v21 = vld [vmem:[%s5082_s6 + $0x5c] sm:$0xf] }
  0xf1   : > { %3803 = vrot.lane.b32.xlu1 %v4476_v7, %s4876_s29  ;;  %v1027_v38 = vsel %vm5166_vm11, %v1022_v28, %v1026_v13  ;;  %v1213_v39 = vor.u32 %v1212_v29, %v1209_v24  ;;  %v1223_v40 = vor.u32 %v1222_v31, %v1218_v30  ;;  %v1557_v42 = vrot.slane %v1447_v18, 5  ;;  %v655_v29 = vld [vmem:[#allocation2 + $0x30] sm:$0xf] }
  0xf2   : > { %v1032_v46 = vrot.slane %v1031_v32, 4  ;;  %v1555_v48 = vsel %vm5146_vm6, %v4325_v35, %v1554_v37  ;;  %v1556_v49 = vrot.slane %v1554_v37, 4  ;;  %v4333_v52 = vrot.slane %v1469_v60, 9 }
  0xf3   : > { %v1214_v57 = vrot.slane %v1213_v39, 4  ;;  %v1224_v59 = vrot.slane %v1223_v40, 4  ;;  %v1610_v61 = vrot.slane %v1470_v26, 5  ;;  %v1613_v47 = vrot.slane %v1471_v27, 5  ;;  %v1946_v27 = vld [vmem:[#allocation2 + $0x24] sm:$0xf] }
  0xf4   : > { %v1037_v58 = vsel %vm5166_vm11, %v1032_v46, %v1036_v23  ;;  %v1558_v50 = vsel %vm5146_vm6, %v1556_v49, %v1557_v42  ;;  %v4326_v63 = vrot.slane %v1448_v44, 9  ;;  %v1561_v0 = vrot.slane %v1449_v45, 5  ;;  %v711_v39 = vld [vmem:[#allocation2 + $0x90] sm:$0xf]  ;;  %v1947_v40 = vld [vmem:[#allocation2 + $0x28] sm:$0xf] }
  0xf5   : > { %v4310_v2 = vcombine.low %v1027_v38, %v1037_v58  ;;  %v1219_v3 = vsel %vm5166_vm11, %v1214_v57, %v1218_v30  ;;  %v1229_v41 = vsel %vm5166_vm11, %v1224_v59, %v1228_v33  ;;  %v4341_v4 = vcombine.low %v1555_v48, %v1558_v50  ;;  %v1948_v42 = vld [vmem:[#allocation2 + $0x2c] sm:$0x1]  ;;  %v4662_v44 = vld [vmem:[#allocation2 + $0x24] sm:$0xff]  }
  0xf6   : > { %v4318_v16 = vcombine.low %v1219_v3, %v1229_v41  ;;  %v1611_v6 = vsel %vm5146_vm6, %v4333_v52, %v1610_v61  ;;  %v1612_v7 = vrot.slane %v1610_v61, 4  ;;  %v1562_v8 = vsel %vm5146_vm6, %v4326_v63, %v1561_v0  ;;  %v1970_v58 = vld [vmem:[#allocation2 + $0x84] sm:$0xf]  ;;  %v1971_v41 = vld [vmem:[#allocation2 + $0x88] sm:$0xf] }
  0xf7   : > { %1380 = vrot.lane.b32.xlu0 %v4310_v2, %s4870_s20  ;;  %v1563_v10 = vrot.slane %v1561_v0, 4  ;;  %v1564_v11 = vrot.slane %v1450_v53, 5  ;;  %v4334_v12 = vrot.slane %v1472_v54, 9  ;;  %v1617_v13 = vrot.slane %v1473_v55, 5  ;;  %v4663_v50 = vld [vmem:[#allocation2 + $0x84] sm:$0xff]  }
  0xf8   : > { %1396 = vrot.lane.b32.xlu1 %v4318_v16, %s4870_s20  ;;  %v1614_v15 = vsel %vm5146_vm6, %v1612_v7, %v1613_v47  ;;  %v1620_v17 = vrot.slane %v1474_v5, 5  ;;  %v360_v18 = vshrl.u32 %v279_v62, 16  ;;  %v363_v20 = vshll.u32 %v279_v62, 16 }
  0xf9   : > { %v4349_v43 = vcombine.low %v1611_v6, %v1614_v15  ;;  %v1565_v56 = vsel %vm5146_vm6, %v1563_v10, %v1564_v11  ;;  %v1618_v60 = vsel %vm5146_vm6, %v4334_v12, %v1617_v13  ;;  %v1619_v22 = vrot.slane %v1617_v13, 4  ;;  %v4682_v10 = vld [vmem:[#allocation7] sm:$0xff]  }
  0xfa   : > { %v4342_v23 = vcombine.low %v1562_v8, %v1565_v56  ;;  %v362_v24 = vrot.slane %v360_v18, 7  ;;  %v368_v25 = vshrl.u32 %v280_v9, 16  ;;  %v371_v26 = vshll.u32 %v280_v9, 16  ;;  %v1972_v8 = vld [vmem:[#allocation2 + $0x8c] sm:$0x1]  ;;  %4529 = vmatprep.subr.bf16.mxu0 %v4682_v10  ;;  %4567 = vmatprep.subr.bf16.mxu1 %v4682_v10 }
  0xfb   : > { %1702 = vrot.lane.b32.xlu0 %v4341_v4, %s4869_s18  ;;  %v1621_v28 = vsel %vm5146_vm6, %v1619_v22, %v1620_v17  ;;  %v496_v30 = vshrl.u32 %v295_v14, 16  ;;  %v499_v31 = vshll.u32 %v295_v14, 16  ;;  %v504_v32 = vshrl.u32 %v296_v21, 16  ;;  %v5438_v57 = vpop.permute.xlu0 %1698  ;;  %v659_v4 = vld [vmem:[#allocation2 + $0x38] sm:$0x1]  ;;  %4530 = vmatpush3.bf16.msra.mxu0 %v4682_v10 }
  0xfc   : > { %1718 = vrot.lane.b32.xlu1 %v4349_v43, %s4869_s18  ;;  %v4350_v33 = vcombine.low %v1618_v60, %v1621_v28  ;;  %v365_v35 = vor.u32 %v363_v20, %v362_v24  ;;  %v366_v37 = vrot.slane %v362_v24, 4  ;;  %v370_v38 = vrot.slane %v368_v25, 7  ;;  %v715_v9 = vld [vmem:[#allocation2 + $0x98] sm:$0x1]  ;;  %4570 = vmatpush3.bf16.msra.mxu1 %v4682_v10 }
  0xfd   : > { %v498_v45 = vrot.slane %v496_v30, 7  ;;  %v5434_v46 = vrot.slane %v504_v32, 7  ;;  %v507_v48 = vshll.u32 %v296_v21, 16  ;;  %v2037_v49 = vshrl.u32 %v1946_v27, 16 }
  0xfe   : > { %v373_v52 = vor.u32 %v371_v26, %v370_v38  ;;  %v375_v53 = vrot.slane %v370_v38, 4  ;;  %v656_v54 = vsel %vm5160_vm10, %v365_v35, %v655_v29  ;;  %v2040_v55 = vshll.u32 %v1946_v27, 16  ;;  %v4685_v27 = vld [vmem:[#allocation7 + $0x8] sm:$0xff]  }
  0xff   : > { %1704 = vrot.lane.b32.xlu0 %v4342_v23, %s4869_s18  ;;  %657 = vst [vmem:[#allocation2 + $0x30] sm:$0xf] %v656_v54  ;;  %v501_v59 = vor.u32 %v499_v31, %v498_v45  ;;  %v502_v61 = vrot.slane %v498_v45, 4  ;;  %v509_v47 = vor.u32 %v507_v48, %v5434_v46  ;;  %v511_v62 = vrot.slane %v5434_v46, 4  ;;  %v5454_v22 = vpop.permute.xlu0 %1374  ;;  %4531 = vmatprep.subr.bf16.mxu0 %v4685_v27 }
 0x100   : > { %1720 = vrot.lane.b32.xlu1 %v4350_v33, %s4869_s18  ;;  %v374_v63 = vsel %vm5180_vm12, %v366_v37, %v373_v52  ;;  %v2039_v0 = vrot.slane %v2037_v49, 4  ;;  %v2042_v2 = vrot.slane %v2040_v55, 5  ;;  %v2046_v3 = vshll.u32 %v1947_v40, 16  ;;  %4568 = vmatprep.subr.bf16.mxu1 %v4685_v27 }
 0x101   : > { %658 = vst.msk [vmem:[#allocation2 + $0x34] sm:$0xf] %vm217_vm0, %v374_v63  ;;  %v510_v5 = vsel %vm5180_vm12, %v502_v61, %v509_v47  ;;  %v712_v16 = vsel %vm5160_vm10, %v501_v59, %v711_v39  ;;  %v2050_v6 = vshrl.u32 %v1947_v40, 16  ;;  %v2056_v7 = vshll.u32 %v1948_v42, 16  ;;  %4532 = vmatpush3.bf16.msra.mxu0 %v4685_v27  ;;  %4571 = vmatpush3.bf16.msra.mxu1 %v4685_v27 }
 0x102   : > { %713 = vst [vmem:[#allocation2 + $0x90] sm:$0xf] %v712_v16  ;;  %714 = vst.msk [vmem:[#allocation2 + $0x94] sm:$0xf] %vm217_vm0, %v510_v5  ;;  %v2043_v11 = vor.u32 %v2042_v2, %v2039_v0  ;;  %v2048_v12 = vrot.slane %v2046_v3, 5  ;;  %v2229_v13 = vshrl.u32 %v1970_v58, 16  ;;  %v660_v26 = vsel %vm5204_vm13, %v375_v53, %v659_v4 }
 0x103   : > { %v2232_v14 = vshll.u32 %v1970_v58, 16  ;;  %1879 = vrot.lane.b32.xlu0 %v4662_v44, %s4871_s7  ;;  %v2052_v15 = vrot.slane %v2050_v6, 4  ;;  %v2058_v17 = vrot.slane %v2056_v7, 5  ;;  %v2238_v18 = vshll.u32 %v1971_v41, 16  ;;  %661 = vst [vmem:[#allocation2 + $0x38] sm:$0x1] %v660_v26 }
 0x104   : > { %v2242_v20 = vshrl.u32 %v1971_v41, 16  ;;  %1895 = vrot.lane.b32.xlu1 %v4663_v50, %s4871_s7  ;;  %v2044_v21 = vrot.slane %v2043_v11, 4  ;;  %v2231_v43 = vrot.slane %v2229_v13, 4  ;;  %v2248_v60 = vshll.u32 %v1972_v8, 16  ;;  %v2491_v50 = vld [vmem:[#allocation2 + $0x24] sm:$0xe] }
 0x105   : > { %v2234_v56 = vrot.slane %v2232_v14, 5  ;;  %v2053_v23 = vor.u32 %v2052_v15, %v2048_v12  ;;  %v2240_v24 = vrot.slane %v2238_v18, 5  ;;  %v716_v32 = vsel %vm5204_vm13, %v511_v62, %v715_v9  ;;  %v2492_v41 = vld [vmem:[#allocation2 + $0x28] sm:$0xf]  ;;  %v2493_v4 = vld [vmem:[#allocation2 + $0x2c] sm:$0x1] }
 0x106   : > { %v2244_v25 = vrot.slane %v2242_v20, 4  ;;  %v2049_v28 = vsel %vm5166_vm11, %v2044_v21, %v2048_v12  ;;  %v2250_v30 = vrot.slane %v2248_v60, 5  ;;  %v1949_v31 = vld [vmem:[#allocation2 + $0x30] sm:$0xf]  ;;  %717 = vst [vmem:[#allocation2 + $0x98] sm:$0x1] %v716_v32  ;;  %v5472_v10 = vpop.permute.xlu1 %1891 }
 0x107   : > { %v2235_v29 = vor.u32 %v2234_v56, %v2231_v43  ;;  %v2054_v33 = vrot.slane %v2053_v23, 4  ;;  %v2061_v37 = vshrl.u32 %v1949_v31, 16  ;;  %v2064_v38 = vshll.u32 %v1949_v31, 16  ;;  %v2515_v9 = vld [vmem:[#allocation2 + $0x84] sm:$0xe] }
 0x108   : > { %v2245_v35 = vor.u32 %v2244_v25, %v2240_v24  ;;  %v4664_v39 = vld [vmem:[#allocation2 + $0x30] sm:$0xff]   ;;  %v5467_v59 = vpop.permute.xlu0 %1875  ;;  %v4389_v43 = vrot.slane %v2491_v50, 9  ;;  %v2517_v56 = vld [vmem:[#allocation2 + $0x8c] sm:$0x1]  ;;  %v2597_v25 = vrot.slane %v2492_v41, 5  ;;  %v2600_v31 = vrot.slane %v2493_v4, 5 }
 0x109   : > { %v2236_v40 = vrot.slane %v2235_v29, 4  ;;  %v1950_v42 = vld [vmem:[#allocation2 + $0x34] sm:$0xf]  ;;  %v2059_v45 = vsel %vm5166_vm11, %v2054_v33, %v2058_v17  ;;  %1881 = vrot.lane.b32.xlu0 %v4664_v39, %s4871_s7  ;;  %v2063_v52 = vrot.slane %v2061_v37, 4  ;;  %v2066_v53 = vrot.slane %v2064_v38, 5 }
 0x10a   : > { %v4665_v44 = vld [vmem:[#allocation2 + $0x90] sm:$0xff]   ;;  %v2246_v46 = vrot.slane %v2245_v35, 4  ;;  %v4373_v48 = vcombine.low %v2049_v28, %v2059_v45  ;;  %v2070_v47 = vshll.u32 %v1950_v42, 16  ;;  %v2074_v62 = vshrl.u32 %v1950_v42, 16  ;;  %v1951_v5 = vld [vmem:[#allocation2 + $0x38] sm:$0x1] }
 0x10b   : > { %v2241_v49 = vsel %vm5166_vm11, %v2236_v40, %v2240_v24  ;;  %v1973_v54 = vld [vmem:[#allocation2 + $0x90] sm:$0xf]  ;;  %v1974_v55 = vld [vmem:[#allocation2 + $0x94] sm:$0xf]  ;;  %1897 = vrot.lane.b32.xlu1 %v4665_v44, %s4871_s7  ;;  %v2067_v0 = vor.u32 %v2066_v53, %v2063_v52  ;;  %v2080_v12 = vshll.u32 %v1951_v5, 16  ;;  %v2598_v38 = vsel %vm5146_vm6, %v4389_v43, %v2597_v25 }
 0x10c   : > { %v2251_v61 = vsel %vm5166_vm11, %v2246_v46, %v2250_v30  ;;  %v2253_v58 = vshrl.u32 %v1973_v54, 16  ;;  %v2256_v2 = vshll.u32 %v1973_v54, 16  ;;  %v2262_v3 = vshll.u32 %v1974_v55, 16  ;;  %v2516_v17 = vld [vmem:[#allocation2 + $0x88] sm:$0xf] }
 0x10d   : > { %v4381_v63 = vcombine.low %v2241_v49, %v2251_v61  ;;  %v2072_v16 = vrot.slane %v2070_v47, 5  ;;  %v2076_v6 = vrot.slane %v2074_v62, 4  ;;  %v2266_v8 = vshrl.u32 %v1974_v55, 16  ;;  %2424 = vrot.lane.b32.xlu0 %v4373_v48, %s4873_s26  ;;  %v1975_v13 = vld [vmem:[#allocation2 + $0x98] sm:$0x1]  ;;  %v5485_v49 = vpop.permute.xlu1 %1893 }
 0x10e   : > { %v2255_v7 = vrot.slane %v2253_v58, 4  ;;  %v2068_v11 = vrot.slane %v2067_v0, 4  ;;  %v2258_v14 = vrot.slane %v2256_v2, 5  ;;  %v2264_v15 = vrot.slane %v2262_v3, 5  ;;  %v2494_v26 = vld [vmem:[#allocation2 + $0x30] sm:$0xe] }
 0x10f   : > { %2440 = vrot.lane.b32.xlu1 %v4381_v63, %s4873_s26  ;;  %v2077_v18 = vor.u32 %v2076_v6, %v2072_v16  ;;  %v2268_v20 = vrot.slane %v2266_v8, 4  ;;  %v2272_v21 = vshll.u32 %v1975_v13, 16  ;;  %v2082_v23 = vrot.slane %v2080_v12, 5  ;;  %v5478_v27 = vpop.permute.xlu0 %1877  ;;  %v2495_v32 = vld [vmem:[#allocation2 + $0x34] sm:$0xf] }
 0x110   : > { %v2073_v60 = vsel %vm5166_vm11, %v2068_v11, %v2072_v16  ;;  %v2259_v24 = vor.u32 %v2258_v14, %v2255_v7  ;;  %v2496_v33 = vld [vmem:[#allocation2 + $0x38] sm:$0x1]  ;;  %v2518_v35 = vld [vmem:[#allocation2 + $0x90] sm:$0xe]  ;;  %v2599_v39 = vrot.slane %v2597_v25, 4  ;;  %v4397_v40 = vrot.slane %v2515_v9, 9 }
 0x111   : > { %v2078_v28 = vrot.slane %v2077_v18, 4  ;;  %v2269_v29 = vor.u32 %v2268_v20, %v2264_v15  ;;  %v2274_v30 = vrot.slane %v2272_v21, 5  ;;  %v281_v42 = vld [vmem:[%s5082_s6 + $0x20] sm:$0xf]  ;;  %v2653_v46 = vrot.slane %v2516_v17, 5 }
 0x112   : > { %v2260_v37 = vrot.slane %v2259_v24, 4  ;;  %v2656_v48 = vrot.slane %v2517_v56, 5  ;;  %v2601_v54 = vsel %vm5146_vm6, %v2599_v39, %v2600_v31  ;;  %v4390_v55 = vrot.slane %v2494_v26, 9  ;;  %v2519_v61 = vld [vmem:[#allocation2 + $0x94] sm:$0xf] }
 0x113   : > { %v2083_v44 = vsel %vm5166_vm11, %v2078_v28, %v2082_v23  ;;  %v2270_v45 = vrot.slane %v2269_v29, 4  ;;  %v2520_v47 = vld [vmem:[#allocation2 + $0x98] sm:$0x1]  ;;  %v4405_v58 = vcombine.low %v2598_v38, %v2601_v54  ;;  %v2654_v50 = vsel %vm5146_vm6, %v4397_v40, %v2653_v46  ;;  %v5495_v0 = vpop.permute.xlu0 %1700  ;;  %v282_v5 = vld [vmem:[%s5082_s6 + $0x24] sm:$0xf]  ;;  %v4671_v54 = vld [vmem:[#allocation2 + $0x60] sm:$0xff]  }
 0x114   : > { %v4374_v52 = vcombine.low %v2073_v60, %v2083_v44  ;;  %v2265_v53 = vsel %vm5166_vm11, %v2260_v37, %v2264_v15  ;;  %v2655_v63 = vrot.slane %v2653_v46, 4  ;;  %v2604_v3 = vrot.slane %v2495_v32, 5  ;;  %v297_v9 = vld [vmem:[%s5082_s6 + $0x60] sm:$0xf]  ;;  %v662_v15 = vld [vmem:[#allocation2 + $0x3c] sm:$0xf] }
 0x115   : > { %v2275_v62 = vsel %vm5166_vm11, %v2270_v45, %v2274_v30  ;;  %v2607_v41 = vrot.slane %v2496_v33, 5  ;;  %v4398_v4 = vrot.slane %v2518_v35, 9  ;;  %v2660_v6 = vrot.slane %v2519_v61, 5  ;;  %v298_v43 = vld [vmem:[%s5082_s6 + $0x64] sm:$0xf]  ;;  %v4673_v61 = vld [vmem:[#allocation2 + $0x6c] sm:$0xff]  }
 0x116   : > { %2426 = vrot.lane.b32.xlu0 %v4374_v52, %s4873_s26  ;;  %v4382_v2 = vcombine.low %v2265_v53, %v2275_v62  ;;  %v2657_v16 = vsel %vm5146_vm6, %v2655_v63, %v2656_v48  ;;  %v2663_v7 = vrot.slane %v2520_v47, 5  ;;  %v377_v8 = vshrl.u32 %v281_v42, 16  ;;  %v2990_v26 = vld [vmem:[#allocation2 + $0x30] sm:$0xf]  ;;  %v718_v32 = vld [vmem:[#allocation2 + $0x9c] sm:$0xf] }
 0x117   : > { %v4413_v11 = vcombine.low %v2654_v50, %v2657_v16  ;;  %v2605_v12 = vsel %vm5146_vm6, %v4390_v55, %v2604_v3  ;;  %v2606_v13 = vrot.slane %v2604_v3, 4  ;;  %v380_v14 = vshll.u32 %v281_v42, 16  ;;  %v5515_v33 = vpop.permute.xlu0 %2741  ;;  %v2991_v40 = vld [vmem:[#allocation2 + $0x34] sm:$0xf]  ;;  %v2992_v45 = vld [vmem:[#allocation2 + $0x38] sm:$0x1] }
 0x118   : > { %2442 = vrot.lane.b32.xlu1 %v4382_v2, %s4873_s26  ;;  %v2661_v17 = vsel %vm5146_vm6, %v4398_v4, %v2660_v6  ;;  %v2662_v18 = vrot.slane %v2660_v6, 4  ;;  %v379_v20 = vrot.slane %v377_v8, 7  ;;  %v385_v21 = vshrl.u32 %v282_v5, 16  ;;  %v4670_v52 = vld [vmem:[#allocation2] sm:$0xff]   ;;  %v4672_v55 = vld [vmem:[#allocation2 + $0xc] sm:$0xff]   ;;  %v4681_v2 = vld [vmem:[#allocation2 + $0x18] sm:$0xff]  }
 0x119   : > { %v2608_v60 = vsel %vm5146_vm6, %v2606_v13, %v2607_v41  ;;  %v388_v23 = vshll.u32 %v282_v5, 16  ;;  %v513_v24 = vshrl.u32 %v297_v9, 16  ;;  %v516_v25 = vshll.u32 %v297_v9, 16  ;;  %v4666_v47 = vld [vmem:[#allocation2 + $0x30] sm:$0xff]   ;;  %v4684_v3 = vld [vmem:[#allocation2 + $0x78] sm:$0xff]   ;;  %v4686_v6 = vld [vmem:[#allocation2 + $0x24] sm:$0xff]  }
 0x11a   : > { %v5508_v56 = vpop.permute.xlu1 %1714  ;;  %2745 = vrot.lane.b32.xlu0 %v4405_v58, %s4872_s8  ;;  %v4406_v28 = vcombine.low %v2605_v12, %v2608_v60  ;;  %v2664_v29 = vsel %vm5146_vm6, %v2662_v18, %v2663_v7  ;;  %v382_v30 = vor.u32 %v380_v14, %v379_v20  ;;  %v383_v31 = vrot.slane %v379_v20, 4  ;;  %v4688_v7 = vld [vmem:[#allocation2 + $0x84] sm:$0xff]   ;;  %v4667_v8 = vld [vmem:[#allocation2 + $0x90] sm:$0xff]  }
 0x11b   : > { %v4414_v35 = vcombine.low %v2661_v17, %v2664_v29  ;;  %v5518_v37 = vrot.slane %v385_v21, 7  ;;  %v515_v38 = vrot.slane %v513_v24, 7  ;;  %v521_v39 = vshrl.u32 %v298_v43, 16  ;;  %v3014_v14 = vld [vmem:[#allocation2 + $0x90] sm:$0xf] }
 0x11c   : > { %2761 = vrot.lane.b32.xlu1 %v4413_v11, %s4872_s8  ;;  %v663_v42 = vsel %vm5160_vm10, %v382_v30, %v662_v15  ;;  %v524_v44 = vshll.u32 %v298_v43, 16  ;;  %v3081_v46 = vshrl.u32 %v2990_v26, 16  ;;  %v3084_v48 = vshll.u32 %v2990_v26, 16  ;;  %v3015_v21 = vld [vmem:[#allocation2 + $0x94] sm:$0xf] }
 0x11d   : > { %v390_v62 = vor.u32 %v388_v23, %v5518_v37  ;;  %v392_v58 = vrot.slane %v5518_v37, 4  ;;  %664 = vst [vmem:[#allocation2 + $0x3c] sm:$0xf] %v663_v42  ;;  %v518_v50 = vor.u32 %v516_v25, %v515_v38  ;;  %v519_v63 = vrot.slane %v515_v38, 4  ;;  %v3016_v43 = vld [vmem:[#allocation2 + $0x98] sm:$0x1] }
 0x11e   : > { %v5522_v53 = vpop.permute.xlu1 %1716  ;;  %2747 = vrot.lane.b32.xlu0 %v4406_v28, %s4872_s8  ;;  %v5527_v41 = vrot.slane %v521_v39, 7  ;;  %v3083_v4 = vrot.slane %v3081_v46, 4  ;;  %v3086_v5 = vrot.slane %v3084_v48, 5  ;;  %v3090_v16 = vshll.u32 %v2991_v40, 16  ;;  %v666_v26 = vld [vmem:[#allocation2 + $0x44] sm:$0x1] }
 0x11f   : > { %v391_v9 = vsel %vm5180_vm12, %v383_v31, %v390_v62  ;;  %v719_v11 = vsel %vm5160_vm10, %v518_v50, %v718_v32  ;;  %v3094_v12 = vshrl.u32 %v2991_v40, 16  ;;  %v3100_v13 = vshll.u32 %v2992_v45, 16  ;;  %v1391_v23 = vpop.permute.xlu0 %1390  ;;  %v722_v39 = vld [vmem:[#allocation2 + $0xa4] sm:$0x1]  ;;  %v5560_v50 = vld [vmem:[#allocation2 + $0x30] sm:$0xe] }
 0x120   : > { %2763 = vrot.lane.b32.xlu1 %v4414_v35, %s4872_s8  ;;  %665 = vst.msk [vmem:[#allocation2 + $0x40] sm:$0xf] %vm217_vm0, %v391_v9  ;;  %v526_v15 = vor.u32 %v524_v44, %v5527_v41  ;;  %v528_v17 = vrot.slane %v5527_v41, 4  ;;  %720 = vst [vmem:[#allocation2 + $0x9c] sm:$0xf] %v719_v11  ;;  %v3087_v18 = vor.u32 %v3086_v5, %v3083_v4  ;;  %v3092_v20 = vrot.slane %v3090_v16, 5 }
 0x121   : > { %v3096_v24 = vrot.slane %v3094_v12, 4  ;;  %v3102_v25 = vrot.slane %v3100_v13, 5  ;;  %vm874_vm14 = vcmask 31744   ;;  %vm1422_vm15 = vcmask 64544   ;;  %v3537_v9 = vld [vmem:[#allocation2 + $0x38] sm:$0x1] }
 0x122   : > { %v5537_v60 = vpop.permute.xlu1 %2757  ;;  %2923 = vrot.lane.b32.xlu0 %v4666_v47, %s4874_s28  ;;  %v527_v28 = vsel %vm5180_vm12, %v519_v63, %v526_v15  ;;  %v3088_v29 = vrot.slane %v3087_v18, 4  ;;  %875 = vst.msk [vmem:[#allocation3] sm:$0xff] %vm874_vm14, %v4670_v52  ;;  %v3273_v30 = vshrl.u32 %v3014_v14, 16  ;;  %v3276_v31 = vshll.u32 %v3014_v14, 16  ;;  %883 = vst.msk [vmem:[#allocation3 + $0x40] sm:$0xff] %vm874_vm14, %v4671_v54 }
 0x123   : > { %876 = vst.msk [vmem:[#allocation3 + $0x8] sm:$0xff] %vm874_vm14, %v4672_v55  ;;  %884 = vst.msk [vmem:[#allocation3 + $0x48] sm:$0xff] %vm874_vm14, %v4673_v61  ;;  %v3097_v32 = vor.u32 %v3096_v24, %v3092_v20  ;;  %v3282_v35 = vshll.u32 %v3015_v21, 16  ;;  %v3286_v37 = vshrl.u32 %v3015_v21, 16  ;;  %v3292_v38 = vshll.u32 %v3016_v43, 16 }
 0x124   : > { %877 = vst.msk [vmem:[#allocation3 + $0x10] sm:$0xff] %vm874_vm14, %v4681_v2  ;;  %885 = vst.msk [vmem:[#allocation3 + $0x50] sm:$0xff] %vm874_vm14, %v4684_v3  ;;  %2939 = vrot.lane.b32.xlu1 %v4667_v8, %s4874_s28  ;;  %v3093_v40 = vsel %vm5166_vm11, %v3088_v29, %v3092_v20  ;;  %v3275_v42 = vrot.slane %v3273_v30, 4  ;;  %v3278_v44 = vrot.slane %v3276_v31, 5  ;;  %v667_v45 = vsel %vm5204_vm13, %v392_v58, %v666_v26  ;;  %v2993_v46 = vld [vmem:[#allocation2 + $0x3c] sm:$0xf] }
 0x125   : > { %878 = vst.msk [vmem:[#allocation3 + $0x18] sm:$0xff] %vm874_vm14, %v4686_v6  ;;  %886 = vst.msk [vmem:[#allocation3 + $0x58] sm:$0xff] %vm874_vm14, %v4688_v7  ;;  %v3098_v52 = vrot.slane %v3097_v32, 4  ;;  %v3284_v54 = vrot.slane %v3282_v35, 5  ;;  %v3288_v55 = vrot.slane %v3286_v37, 4  ;;  %v3105_v47 = vshrl.u32 %v2993_v46, 16 }
 0x126   : > { %721 = vst.msk [vmem:[#allocation2 + $0xa0] sm:$0xf] %vm217_vm0, %v527_v28  ;;  %v1377_v48 = vpop.permute.xlu1 %1376  ;;  %668 = vst [vmem:[#allocation2 + $0x44] sm:$0x1] %v667_v45  ;;  %v3279_v61 = vor.u32 %v3278_v44, %v3275_v42  ;;  %v3108_v62 = vshll.u32 %v2993_v46, 16  ;;  %vm6310_vm1 = vcmask 97344   ;;  %v723_v3 = vsel %vm5204_vm13, %v528_v17, %v722_v39 }
 0x127   : > { %1423 = vst.msk [vmem:[#allocation3] sm:$0xff] %vm1422_vm15, %v5454_v22  ;;  %1431 = vst.msk [vmem:[#allocation3 + $0x40] sm:$0xff] %vm1422_vm15, %v1391_v23  ;;  %v3294_v22 = vrot.slane %v3292_v38, 5  ;;  %v4668_v63 = vld [vmem:[#allocation2 + $0x3c] sm:$0xff]   ;;  %v3103_v2 = vsel %vm5166_vm11, %v3098_v52, %v3102_v25  ;;  %v3289_v58 = vor.u32 %v3288_v55, %v3284_v54  ;;  %vm1923_vm2 = vcmask 130144  }
 0x128   : > { %1424 = vst.msk [vmem:[#allocation3 + $0x8] sm:$0xff] %vm1422_vm15, %v1377_v48  ;;  %v4437_v41 = vcombine.low %v3093_v40, %v3103_v2  ;;  %v3280_v4 = vrot.slane %v3279_v61, 4  ;;  %v2994_v5 = vld [vmem:[#allocation2 + $0x40] sm:$0xf]  ;;  %v3107_v16 = vrot.slane %v3105_v47, 4  ;;  %v3110_v6 = vrot.slane %v3108_v62, 5  ;;  %2925 = vrot.lane.b32.xlu0 %v4668_v63, %s4874_s28  ;;  %v5593_v40 = vpop.permute.xlu0 %2420 }
 0x129   : > { %1747 = vst.msk [vmem:[#allocation3] sm:$0xff] %vm6310_vm1, %v5438_v57  ;;  %1755 = vst.msk [vmem:[#allocation3 + $0x40] sm:$0xff] %vm6310_vm1, %v5508_v56  ;;  %v3290_v57 = vrot.slane %v3289_v58, 4  ;;  %v3114_v56 = vshll.u32 %v2994_v5, 16  ;;  %v3017_v7 = vld [vmem:[#allocation2 + $0x9c] sm:$0xf] }
 0x12a   : > { %1748 = vst.msk [vmem:[#allocation3 + $0x8] sm:$0xff] %vm6310_vm1, %v5495_v0  ;;  %724 = vst [vmem:[#allocation2 + $0xa4] sm:$0x1] %v723_v3  ;;  %v3118_v0 = vshrl.u32 %v2994_v5, 16  ;;  %v3536_v8 = vld [vmem:[#allocation2 + $0x34] sm:$0xf]  ;;  %v3111_v14 = vor.u32 %v3110_v6, %v3107_v16 }
 0x12b   : > { %1924 = vst.msk [vmem:[#allocation3] sm:$0xff] %vm1923_vm2, %v5467_v59  ;;  %1932 = vst.msk [vmem:[#allocation3 + $0x40] sm:$0xff] %vm1923_vm2, %v5472_v10  ;;  %v4453_v11 = vrot.slane %v5560_v50, 9  ;;  %v1393_v12 = vpop.permute.xlu1 %1392  ;;  %v3285_v59 = vsel %vm5166_vm11, %v3280_v4, %v3284_v54  ;;  %v3297_v15 = vshrl.u32 %v3017_v7, 16  ;;  %v3116_v17 = vrot.slane %v3114_v56, 5 }
 0x12c   : > { %1925 = vst.msk [vmem:[#allocation3 + $0x8] sm:$0xff] %vm1923_vm2, %v5478_v27  ;;  %v3295_v27 = vsel %vm5166_vm11, %v3290_v57, %v3294_v22  ;;  %v3120_v18 = vrot.slane %v3118_v0, 4  ;;  %v3300_v20 = vshll.u32 %v3017_v7, 16  ;;  %v3559_v21 = vld [vmem:[#allocation2 + $0x90] sm:$0xe]  ;;  %v3112_v24 = vrot.slane %v3111_v14, 4  ;;  %3468 = vrot.lane.b32.xlu0 %v4437_v41, %s4875_s22 }
 0x12d   : > { %v4669_v13 = vld [vmem:[#allocation2 + $0x9c] sm:$0xff]   ;;  %1432 = vst.msk [vmem:[#allocation3 + $0x48] sm:$0xff] %vm1422_vm15, %v1393_v12  ;;  %v4445_v43 = vcombine.low %v3285_v59, %v3295_v27  ;;  %v2995_v23 = vld [vmem:[#allocation2 + $0x44] sm:$0x1]  ;;  %v3299_v25 = vrot.slane %v3297_v15, 4  ;;  %v3641_v37 = vrot.slane %v3536_v8, 5 }
 0x12e   : > { %v3018_v10 = vld [vmem:[#allocation2 + $0xa0] sm:$0xf]  ;;  %1756 = vst.msk [vmem:[#allocation3 + $0x48] sm:$0xff] %vm6310_vm1, %v5522_v53  ;;  %2941 = vrot.lane.b32.xlu1 %v4669_v13, %s4874_s28  ;;  %v3121_v28 = vor.u32 %v3120_v18, %v3116_v17  ;;  %v3124_v29 = vshll.u32 %v2995_v23, 16  ;;  %v3302_v30 = vrot.slane %v3300_v20, 5  ;;  %v3117_v53 = vsel %vm5166_vm11, %v3112_v24, %v3116_v17 }
 0x12f   : > { %v3306_v26 = vshll.u32 %v3018_v10, 16  ;;  %1933 = vst.msk [vmem:[#allocation3 + $0x48] sm:$0xff] %vm1923_vm2, %v5485_v49  ;;  %v3310_v31 = vshrl.u32 %v3018_v10, 16  ;;  %v3560_v32 = vld [vmem:[#allocation2 + $0x94] sm:$0xf]  ;;  %v3644_v38 = vrot.slane %v3537_v9, 5  ;;  %v3642_v52 = vsel %vm5146_vm6, %v4453_v11, %v3641_v37  ;;  %v5600_v2 = vpop.permute.xlu1 %2436 }
 0x130   : > { %v3561_v39 = vld [vmem:[#allocation2 + $0x98] sm:$0x1]  ;;  %v3122_v42 = vrot.slane %v3121_v28, 4  ;;  %v3126_v44 = vrot.slane %v3124_v29, 5  ;;  %v3303_v49 = vor.u32 %v3302_v30, %v3299_v25  ;;  %v3643_v54 = vrot.slane %v3641_v37, 4 }
 0x131   : > { %v3308_v35 = vrot.slane %v3306_v26, 5  ;;  %v3019_v45 = vld [vmem:[#allocation2 + $0xa4] sm:$0x1]  ;;  %v3312_v46 = vrot.slane %v3310_v31, 4  ;;  %v4461_v55 = vrot.slane %v3559_v21, 9  ;;  %v3697_v62 = vrot.slane %v3560_v32, 5 }
 0x132   : > { %3484 = vrot.lane.b32.xlu1 %v4445_v43, %s4875_s22  ;;  %v3316_v48 = vshll.u32 %v3019_v45, 16  ;;  %v3127_v22 = vsel %vm5166_vm11, %v3122_v42, %v3126_v44  ;;  %v3304_v61 = vrot.slane %v3303_v49, 4  ;;  %v903_v50 = vld [vmem:[#allocation2 + $0x30] sm:$0xf]  ;;  %v904_v63 = vld [vmem:[#allocation2 + $0x34] sm:$0xf]  ;;  %v3645_v41 = vsel %vm5146_vm6, %v3643_v54, %v3644_v38 }
 0x133   : > { %v3313_v47 = vor.u32 %v3312_v46, %v3308_v35  ;;  %v4438_v58 = vcombine.low %v3117_v53, %v3127_v22  ;;  %v3700_v4 = vrot.slane %v3561_v39, 5  ;;  %v905_v5 = vld [vmem:[#allocation2 + $0x38] sm:$0x1]  ;;  %v927_v16 = vld [vmem:[#allocation2 + $0x90] sm:$0xf]  ;;  %v5604_v6 = vpop.permute.xlu0 %2422  ;;  %v4469_v0 = vcombine.low %v3642_v52, %v3645_v41 }
 0x134   : > { %v3318_v3 = vrot.slane %v3316_v48, 5  ;;  %v3309_v57 = vsel %vm5166_vm11, %v3304_v61, %v3308_v35  ;;  %v3698_v7 = vsel %vm5146_vm6, %v4461_v55, %v3697_v62  ;;  %v3699_v8 = vrot.slane %v3697_v62, 4  ;;  %v928_v13 = vld [vmem:[#allocation2 + $0x94] sm:$0xf]  ;;  %v929_v15 = vld [vmem:[#allocation2 + $0x98] sm:$0x1] }
 0x135   : > { %v3314_v56 = vrot.slane %v3313_v47, 4  ;;  %3470 = vrot.lane.b32.xlu0 %v4438_v58, %s4875_s22  ;;  %v1039_v9 = vshrl.u32 %v903_v50, 16  ;;  %v1042_v11 = vshll.u32 %v903_v50, 16  ;;  %v1048_v12 = vshll.u32 %v904_v63, 16  ;;  %v3538_v43 = vld [vmem:[#allocation2 + $0x3c] sm:$0xe] }
 0x136   : > { %v1052_v14 = vshrl.u32 %v904_v63, 16  ;;  %v1058_v10 = vshll.u32 %v905_v5, 16  ;;  %v1231_v27 = vshrl.u32 %v927_v16, 16  ;;  %v3701_v18 = vsel %vm5146_vm6, %v3699_v8, %v3700_v4  ;;  %v3539_v23 = vld [vmem:[#allocation2 + $0x40] sm:$0xf] }
 0x137   : > { %v3319_v59 = vsel %vm5166_vm11, %v3314_v56, %v3318_v3  ;;  %v1041_v20 = vrot.slane %v1039_v9, 4  ;;  %v1044_v21 = vrot.slane %v1042_v11, 5  ;;  %v4477_v24 = vcombine.low %v3698_v7, %v3701_v18  ;;  %v3540_v29 = vld [vmem:[#allocation2 + $0x44] sm:$0x1]  ;;  %v3562_v37 = vld [vmem:[#allocation2 + $0x9c] sm:$0xe]  ;;  %v5619_v39 = vpop.permute.xlu0 %2743 }
 0x138   : > { %v4446_v17 = vcombine.low %v3309_v57, %v3319_v59  ;;  %v1050_v25 = vrot.slane %v1048_v12, 5  ;;  %v1054_v26 = vrot.slane %v1052_v14, 4  ;;  %v1060_v28 = vrot.slane %v1058_v10, 5  ;;  %v3563_v38 = vld [vmem:[#allocation2 + $0xa0] sm:$0xf] }
 0x139   : > { %v5615_v30 = vpop.permute.xlu1 %2438  ;;  %3789 = vrot.lane.b32.xlu0 %v4469_v0, %s4876_s29  ;;  %v1045_v31 = vor.u32 %v1044_v21, %v1041_v20  ;;  %v1233_v32 = vrot.slane %v1231_v27, 4  ;;  %v1234_v53 = vshll.u32 %v927_v16, 16  ;;  %v1240_v35 = vshll.u32 %v928_v13, 16  ;;  %v3564_v46 = vld [vmem:[#allocation2 + $0xa4] sm:$0x1] }
 0x13a   : > { %3486 = vrot.lane.b32.xlu1 %v4446_v17, %s4875_s22  ;;  %v1055_v42 = vor.u32 %v1054_v26, %v1050_v25  ;;  %v1244_v44 = vshrl.u32 %v928_v13, 16  ;;  %v1250_v45 = vshll.u32 %v929_v15, 16  ;;  %v4454_v49 = vrot.slane %v3538_v43, 9  ;;  %v906_v56 = vld [vmem:[#allocation2 + $0x3c] sm:$0xf] }
 0x13b   : > { %v1046_v48 = vrot.slane %v1045_v31, 4  ;;  %v1236_v52 = vrot.slane %v1234_v53, 5  ;;  %v1242_v54 = vrot.slane %v1240_v35, 5  ;;  %v3648_v55 = vrot.slane %v3539_v23, 5  ;;  %v907_v0 = vld [vmem:[#allocation2 + $0x40] sm:$0xf]  ;;  %v5632_v13 = vpop.permute.xlu0 %2919 }
 0x13c   : > { %v1056_v22 = vrot.slane %v1055_v42, 4  ;;  %v1246_v61 = vrot.slane %v1244_v44, 4  ;;  %v1252_v47 = vrot.slane %v1250_v45, 5  ;;  %v3651_v62 = vrot.slane %v3540_v29, 5  ;;  %v908_v12 = vld [vmem:[#allocation2 + $0x44] sm:$0x1] }
 0x13d   : > { %v5621_v50 = vpop.permute.xlu1 %2759  ;;  %v1051_v63 = vsel %vm5166_vm11, %v1046_v48, %v1050_v25  ;;  %v1237_v58 = vor.u32 %v1236_v52, %v1233_v32  ;;  %v3649_v3 = vsel %vm5146_vm6, %v4454_v49, %v3648_v55  ;;  %v3650_v41 = vrot.slane %v3648_v55, 4  ;;  %v930_v21 = vld [vmem:[#allocation2 + $0x9c] sm:$0xf]  ;;  %v931_v26 = vld [vmem:[#allocation2 + $0xa0] sm:$0xf] }
 0x13e   : > { %3805 = vrot.lane.b32.xlu1 %v4477_v24, %s4876_s29  ;;  %v1061_v4 = vsel %vm5166_vm11, %v1056_v22, %v1060_v28  ;;  %v1247_v5 = vor.u32 %v1246_v61, %v1242_v54  ;;  %v4462_v16 = vrot.slane %v3562_v37, 9  ;;  %v3704_v57 = vrot.slane %v3563_v38, 5  ;;  %v1451_v28 = vld [vmem:[#allocation2 + $0x30] sm:$0xe]  ;;  %v932_v37 = vld [vmem:[#allocation2 + $0xa4] sm:$0x1] }
 0x13f   : > { %v4311_v7 = vcombine.low %v1051_v63, %v1061_v4  ;;  %v1238_v8 = vrot.slane %v1237_v58, 4  ;;  %v3652_v9 = vsel %vm5146_vm6, %v3650_v41, %v3651_v62  ;;  %v3707_v11 = vrot.slane %v3564_v46, 5  ;;  %v1452_v38 = vld [vmem:[#allocation2 + $0x34] sm:$0xf]  ;;  %v1453_v46 = vld [vmem:[#allocation2 + $0x38] sm:$0x1] }
 0x140   : > { %v1248_v59 = vrot.slane %v1247_v5, 4  ;;  %v4470_v14 = vcombine.low %v3649_v3, %v3652_v9  ;;  %v3705_v10 = vsel %vm5146_vm6, %v4462_v16, %v3704_v57  ;;  %v3706_v15 = vrot.slane %v3704_v57, 4  ;;  %v1475_v22 = vld [vmem:[#allocation2 + $0x90] sm:$0xe]  ;;  %v1476_v3 = vld [vmem:[#allocation2 + $0x94] sm:$0xf] }
 0x141   : > { %1382 = vrot.lane.b32.xlu0 %v4311_v7, %s4870_s20  ;;  %v1243_v27 = vsel %vm5166_vm11, %v1238_v8, %v1242_v54  ;;  %v1063_v17 = vshrl.u32 %v906_v56, 16  ;;  %v1066_v18 = vshll.u32 %v906_v56, 16  ;;  %v1072_v20 = vshll.u32 %v907_v0, 16  ;;  %v5643_v29 = vpop.permute.xlu1 %2935  ;;  %v1477_v57 = vld [vmem:[#allocation2 + $0x98] sm:$0x1] }
 0x142   : > { %v1253_v43 = vsel %vm5166_vm11, %v1248_v59, %v1252_v47  ;;  %v3708_v23 = vsel %vm5146_vm6, %v3706_v15, %v3707_v11  ;;  %v1076_v24 = vshrl.u32 %v907_v0, 16  ;;  %v1082_v25 = vshll.u32 %v908_v12, 16  ;;  %v1454_v9 = vld [vmem:[#allocation2 + $0x3c] sm:$0xe] }
 0x143   : > { %v4319_v31 = vcombine.low %v1243_v27, %v1253_v43  ;;  %v4478_v32 = vcombine.low %v3705_v10, %v3708_v23  ;;  %v1065_v53 = vrot.slane %v1063_v17, 4  ;;  %v1068_v35 = vrot.slane %v1066_v18, 5  ;;  %v1455_v10 = vld [vmem:[#allocation2 + $0x40] sm:$0xf] }
 0x144   : > { %v1074_v42 = vrot.slane %v1072_v20, 5  ;;  %v1078_v44 = vrot.slane %v1076_v24, 4  ;;  %v1084_v45 = vrot.slane %v1082_v25, 5  ;;  %v1255_v49 = vshrl.u32 %v930_v21, 16  ;;  %v1456_v20 = vld [vmem:[#allocation2 + $0x44] sm:$0x1] }
 0x145   : > { %1398 = vrot.lane.b32.xlu1 %v4319_v31, %s4870_s20  ;;  %3791 = vrot.lane.b32.xlu0 %v4470_v14, %s4876_s29  ;;  %v1069_v48 = vor.u32 %v1068_v35, %v1065_v53  ;;  %v1258_v52 = vshll.u32 %v930_v21, 16  ;;  %v1264_v54 = vshll.u32 %v931_v26, 16  ;;  %v1268_v55 = vshrl.u32 %v931_v26, 16  ;;  %v5647_v61 = vpop.permute.xlu0 %2921  ;;  %v1478_v21 = vld [vmem:[#allocation2 + $0x9c] sm:$0xe] }
 0x146   : > { %v1079_v47 = vor.u32 %v1078_v44, %v1074_v42  ;;  %v1257_v62 = vrot.slane %v1255_v49, 4  ;;  %v1274_v63 = vshll.u32 %v932_v37, 16  ;;  %v4327_v58 = vrot.slane %v1451_v28, 9  ;;  %v1479_v43 = vld [vmem:[#allocation2 + $0xa0] sm:$0xf] }
 0x147   : > { %v1070_v41 = vrot.slane %v1069_v48, 4  ;;  %v1260_v4 = vrot.slane %v1258_v52, 5  ;;  %v1266_v5 = vrot.slane %v1264_v54, 5  ;;  %v1270_v16 = vrot.slane %v1268_v55, 4  ;;  %v5649_v11 = vpop.permute.xlu1 %2937  ;;  %v1480_v53 = vld [vmem:[#allocation2 + $0xa4] sm:$0x1] }
 0x148   : > { %v1080_v56 = vrot.slane %v1079_v47, 4  ;;  %v1276_v0 = vrot.slane %v1274_v63, 5  ;;  %v1568_v7 = vrot.slane %v1452_v38, 5  ;;  %v1571_v8 = vrot.slane %v1453_v46, 5  ;;  %v283_v38 = vld [vmem:[%s5082_s6 + $0x28] sm:$0xf] }
 0x149   : > { %3807 = vrot.lane.b32.xlu1 %v4478_v32, %s4876_s29  ;;  %v1075_v12 = vsel %vm5166_vm11, %v1070_v41, %v1074_v42  ;;  %v1261_v59 = vor.u32 %v1260_v4, %v1257_v62  ;;  %v1271_v14 = vor.u32 %v1270_v16, %v1266_v5  ;;  %vm2468_vm3 = vcmask 162944   ;;  %v5666_v23 = vpop.permute.xlu0 %3464  ;;  %v284_v42 = vld [vmem:[%s5082_s6 + $0x2c] sm:$0xf] }
 0x14a   : > { %v1085_v15 = vsel %vm5166_vm11, %v1080_v56, %v1084_v45  ;;  %v1569_v27 = vsel %vm5146_vm6, %v4327_v58, %v1568_v7  ;;  %v1570_v17 = vrot.slane %v1568_v7, 4  ;;  %2469 = vst.msk [vmem:[#allocation3] sm:$0xff] %vm2468_vm3, %v5593_v40  ;;  %v4335_v18 = vrot.slane %v1475_v22, 9  ;;  %2477 = vst.msk [vmem:[#allocation3 + $0x40] sm:$0xff] %vm2468_vm3, %v5600_v2  ;;  %v669_v56 = vld [vmem:[#allocation2 + $0x48] sm:$0xf] }
 0x14b   : > { %2470 = vst.msk [vmem:[#allocation3 + $0x8] sm:$0xff] %vm2468_vm3, %v5604_v6  ;;  %2478 = vst.msk [vmem:[#allocation3 + $0x48] sm:$0xff] %vm2468_vm3, %v5615_v30  ;;  %v4312_v24 = vcombine.low %v1075_v12, %v1085_v15  ;;  %v1262_v25 = vrot.slane %v1261_v59, 4  ;;  %v1272_v40 = vrot.slane %v1271_v14, 4  ;;  %v1624_v26 = vrot.slane %v1476_v3, 5  ;;  %v5679_v44 = vpop.permute.xlu1 %3480 }
 0x14c   : > { %v1572_v28 = vsel %vm5146_vm6, %v1570_v17, %v1571_v8  ;;  %v1627_v31 = vrot.slane %v1477_v57, 5  ;;  %v4328_v32 = vrot.slane %v1454_v9, 9  ;;  %v1575_v2 = vrot.slane %v1455_v10, 5  ;;  %v299_v3 = vld [vmem:[%s5082_s6 + $0x68] sm:$0xf]  ;;  %v4696_v10 = vld [vmem:[#allocation2 + $0x30] sm:$0xff]  }
 0x14d   : > { %1384 = vrot.lane.b32.xlu0 %v4312_v24, %s4870_s20  ;;  %v1267_v6 = vsel %vm5166_vm11, %v1262_v25, %v1266_v5  ;;  %v1277_v30 = vsel %vm5166_vm11, %v1272_v40, %v1276_v0  ;;  %v4343_v35 = vcombine.low %v1569_v27, %v1572_v28  ;;  %v1625_v37 = vsel %vm5146_vm6, %v4335_v18, %v1624_v26  ;;  %v300_v0 = vld [vmem:[%s5082_s6 + $0x6c] sm:$0xf]  ;;  %v1952_v7 = vld [vmem:[#allocation2 + $0x3c] sm:$0xf]  ;;  %v1953_v14 = vld [vmem:[#allocation2 + $0x40] sm:$0xf] }
 0x14e   : > { %v4320_v45 = vcombine.low %v1267_v6, %v1277_v30  ;;  %v1626_v49 = vrot.slane %v1624_v26, 4  ;;  %v1576_v46 = vsel %vm5146_vm6, %v4328_v32, %v1575_v2  ;;  %v1577_v48 = vrot.slane %v1575_v2, 4  ;;  %v1954_v18 = vld [vmem:[#allocation2 + $0x44] sm:$0x1]  ;;  %v725_v26 = vld [vmem:[#allocation2 + $0xa8] sm:$0xf] }
 0x14f   : > { %v1578_v52 = vrot.slane %v1456_v20, 5  ;;  %v4336_v54 = vrot.slane %v1478_v21, 9  ;;  %v1631_v55 = vrot.slane %v1479_v43, 5  ;;  %v1634_v22 = vrot.slane %v1480_v53, 5  ;;  %v4674_v43 = vld [vmem:[#allocation2 + $0x3c] sm:$0xff]   ;;  %879 = vst.msk [vmem:[#allocation3 + $0x20] sm:$0xff] %vm874_vm14, %v4696_v10 }
 0x150   : > { %1400 = vrot.lane.b32.xlu1 %v4320_v45, %s4870_s20  ;;  %v1628_v47 = vsel %vm5146_vm6, %v1626_v49, %v1627_v31  ;;  %v394_v62 = vshrl.u32 %v283_v38, 16  ;;  %v397_v63 = vshll.u32 %v283_v38, 16  ;;  %v402_v58 = vshrl.u32 %v284_v42, 16  ;;  %v4675_v53 = vld [vmem:[#allocation2 + $0x9c] sm:$0xff]   ;;  %v4698_v45 = vld [vmem:[#allocation2 + $0x90] sm:$0xff]  }
 0x151   : > { %v5687_v41 = vpop.permute.xlu0 %3466  ;;  %1706 = vrot.lane.b32.xlu0 %v4343_v35, %s4869_s18  ;;  %v4351_v4 = vcombine.low %v1625_v37, %v1628_v47  ;;  %v1579_v5 = vsel %vm5146_vm6, %v1577_v48, %v1578_v52  ;;  %v1632_v16 = vsel %vm5146_vm6, %v4336_v54, %v1631_v55  ;;  %v1633_v57 = vrot.slane %v1631_v55, 4  ;;  %v1976_v30 = vld [vmem:[#allocation2 + $0x9c] sm:$0xf]  ;;  %v1977_v54 = vld [vmem:[#allocation2 + $0xa0] sm:$0xf]  ;;  %887 = vst.msk [vmem:[#allocation3 + $0x60] sm:$0xff] %vm874_vm14, %v4698_v45 }
 0x152   : > { %v4344_v8 = vcombine.low %v1576_v46, %v1579_v5  ;;  %v396_v9 = vrot.slane %v394_v62, 7  ;;  %v5695_v12 = vrot.slane %v402_v58, 7  ;;  %v405_v59 = vshll.u32 %v284_v42, 16  ;;  %v673_v55 = vld [vmem:[#allocation2 + $0x50] sm:$0x1] }
 0x153   : > { %v1635_v15 = vsel %vm5146_vm6, %v1633_v57, %v1634_v22  ;;  %vm2789_vm4 = vcmask 195744   ;;  %v530_v27 = vshrl.u32 %v299_v3, 16  ;;  %v533_v17 = vshll.u32 %v299_v3, 16  ;;  %v1978_v58 = vld [vmem:[#allocation2 + $0xa4] sm:$0x1] }
 0x154   : > { %v5699_v20 = vpop.permute.xlu1 %3482  ;;  %1722 = vrot.lane.b32.xlu1 %v4351_v4, %s4869_s18  ;;  %v4352_v21 = vcombine.low %v1632_v16, %v1635_v15  ;;  %v399_v24 = vor.u32 %v397_v63, %v396_v9  ;;  %v400_v25 = vrot.slane %v396_v9, 4  ;;  %v407_v40 = vor.u32 %v405_v59, %v5695_v12  ;;  %2791 = vst.msk [vmem:[#allocation3 + $0x8] sm:$0xff] %vm2789_vm4, %v5619_v39  ;;  %v729_v3 = vld [vmem:[#allocation2 + $0xb0] sm:$0x1] }
 0x155   : > { %2790 = vst.msk [vmem:[#allocation3] sm:$0xff] %vm2789_vm4, %v5515_v33  ;;  %2798 = vst.msk [vmem:[#allocation3 + $0x40] sm:$0xff] %vm2789_vm4, %v5537_v60  ;;  %1708 = vrot.lane.b32.xlu0 %v4344_v8, %s4869_s18  ;;  %v409_v28 = vrot.slane %v5695_v12, 4  ;;  %v532_v31 = vrot.slane %v530_v27, 7  ;;  %v538_v32 = vshrl.u32 %v300_v0, 16  ;;  %v541_v2 = vshll.u32 %v300_v0, 16  ;;  %v5714_v39 = vpop.permute.xlu0 %3785 }
 0x156   : > { %2799 = vst.msk [vmem:[#allocation3 + $0x48] sm:$0xff] %vm2789_vm4, %v5621_v50  ;;  %v408_v33 = vsel %vm5180_vm12, %v400_v25, %v407_v40  ;;  %v670_v60 = vsel %vm5160_vm10, %v399_v24, %v669_v56  ;;  %v2085_v6 = vshrl.u32 %v1952_v7, 16  ;;  %v2088_v50 = vshll.u32 %v1952_v7, 16  ;;  %v4699_v56 = vld [vmem:[#allocation2 + $0x3c] sm:$0xff]  }
 0x157   : > { %671 = vst [vmem:[#allocation2 + $0x48] sm:$0xf] %v670_v60  ;;  %672 = vst.msk [vmem:[#allocation2 + $0x4c] sm:$0xf] %vm217_vm0, %v408_v33  ;;  %v535_v35 = vor.u32 %v533_v17, %v532_v31  ;;  %v536_v37 = vrot.slane %v532_v31, 4  ;;  %v540_v38 = vrot.slane %v538_v32, 7 }
 0x158   : > { %v2094_v42 = vshll.u32 %v1953_v14, 16  ;;  %1724 = vrot.lane.b32.xlu1 %v4352_v21, %s4869_s18  ;;  %v2087_v49 = vrot.slane %v2085_v6, 4  ;;  %v2090_v46 = vrot.slane %v2088_v50, 5  ;;  %v2098_v48 = vshrl.u32 %v1953_v14, 16  ;;  %v5725_v4 = vpop.permute.xlu1 %3801  ;;  %880 = vst.msk [vmem:[#allocation3 + $0x28] sm:$0xff] %vm874_vm14, %v4699_v56 }
 0x159   : > { %v2104_v52 = vshll.u32 %v1954_v18, 16  ;;  %1883 = vrot.lane.b32.xlu0 %v4674_v43, %s4871_s7  ;;  %v543_v22 = vor.u32 %v541_v2, %v540_v38  ;;  %v545_v47 = vrot.slane %v540_v38, 4  ;;  %v726_v62 = vsel %vm5160_vm10, %v535_v35, %v725_v26  ;;  %v2497_v31 = vld [vmem:[#allocation2 + $0x3c] sm:$0xe]  ;;  %v2498_v60 = vld [vmem:[#allocation2 + $0x40] sm:$0xf] }
 0x15a   : > { %v2096_v63 = vrot.slane %v2094_v42, 5  ;;  %727 = vst [vmem:[#allocation2 + $0xa8] sm:$0xf] %v726_v62  ;;  %v2091_v5 = vor.u32 %v2090_v46, %v2087_v49  ;;  %v2100_v16 = vrot.slane %v2098_v48, 4  ;;  %vm2967_vm5 = vcmask 228544  }
 0x15b   : > { %v2106_v57 = vrot.slane %v2104_v52, 5  ;;  %v544_v0 = vsel %vm5180_vm12, %v536_v37, %v543_v22  ;;  %2968 = vst.msk [vmem:[#allocation3] sm:$0xff] %vm2967_vm5, %v5632_v13  ;;  %v2277_v7 = vshrl.u32 %v1976_v30, 16  ;;  %v2280_v8 = vshll.u32 %v1976_v30, 16  ;;  %2976 = vst.msk [vmem:[#allocation3 + $0x40] sm:$0xff] %vm2967_vm5, %v5643_v29  ;;  %v1379_v12 = vpop.permute.xlu0 %1378 }
 0x15c   : > { %v2286_v9 = vshll.u32 %v1977_v54, 16  ;;  %2969 = vst.msk [vmem:[#allocation3 + $0x8] sm:$0xff] %vm2967_vm5, %v5647_v61  ;;  %2977 = vst.msk [vmem:[#allocation3 + $0x48] sm:$0xff] %vm2967_vm5, %v5649_v11  ;;  %1899 = vrot.lane.b32.xlu1 %v4675_v53, %s4871_s7  ;;  %v2092_v59 = vrot.slane %v2091_v5, 4  ;;  %v2101_v14 = vor.u32 %v2100_v16, %v2096_v63  ;;  %v2290_v13 = vshrl.u32 %v1977_v54, 16 }
 0x15d   : > { %728 = vst.msk [vmem:[#allocation2 + $0xac] sm:$0xf] %vm217_vm0, %v544_v0  ;;  %v2296_v10 = vshll.u32 %v1978_v58, 16  ;;  %v2279_v29 = vrot.slane %v2277_v7, 4  ;;  %v2282_v15 = vrot.slane %v2280_v8, 5  ;;  %v674_v61 = vsel %vm5204_vm13, %v409_v28, %v673_v55 }
 0x15e   : > { %1425 = vst.msk [vmem:[#allocation3 + $0x10] sm:$0xff] %vm1422_vm15, %v1379_v12  ;;  %v2288_v27 = vrot.slane %v2286_v9, 5  ;;  %v4676_v11 = vld [vmem:[#allocation2 + $0x48] sm:$0xff]   ;;  %v2097_v17 = vsel %vm5166_vm11, %v2092_v59, %v2096_v63  ;;  %v2102_v18 = vrot.slane %v2101_v14, 4  ;;  %675 = vst [vmem:[#allocation2 + $0x50] sm:$0x1] %v674_v61  ;;  %v730_v21 = vsel %vm5204_vm13, %v545_v47, %v729_v3 }
 0x15f   : > { %v2283_v43 = vor.u32 %v2282_v15, %v2279_v29  ;;  %v2292_v24 = vrot.slane %v2290_v13, 4  ;;  %v2298_v25 = vrot.slane %v2296_v10, 5  ;;  %v1955_v40 = vld [vmem:[#allocation2 + $0x48] sm:$0xf]  ;;  %v1956_v26 = vld [vmem:[#allocation2 + $0x4c] sm:$0xf]  ;;  %v1395_v32 = vpop.permute.xlu1 %1394  ;;  %1885 = vrot.lane.b32.xlu0 %v4676_v11, %s4871_s7  ;;  %v5754_v22 = vpop.permute.xlu0 %3787 }
 0x160   : > { %731 = vst [vmem:[#allocation2 + $0xb0] sm:$0x1] %v730_v21  ;;  %v2107_v28 = vsel %vm5166_vm11, %v2102_v18, %v2106_v57  ;;  %v2109_v2 = vshrl.u32 %v1955_v40, 16  ;;  %v2112_v53 = vshll.u32 %v1955_v40, 16  ;;  %v2118_v33 = vshll.u32 %v1956_v26, 16  ;;  %1433 = vst.msk [vmem:[#allocation3 + $0x50] sm:$0xff] %vm1422_vm15, %v1395_v32 }
 0x161   : > { %v4375_v6 = vcombine.low %v2097_v17, %v2107_v28  ;;  %v2284_v50 = vrot.slane %v2283_v43, 4  ;;  %v2293_v30 = vor.u32 %v2292_v24, %v2288_v27  ;;  %v2122_v35 = vshrl.u32 %v1956_v26, 16  ;;  %v1979_v37 = vld [vmem:[#allocation2 + $0xa8] sm:$0xf]  ;;  %v2499_v58 = vld [vmem:[#allocation2 + $0x44] sm:$0x1] }
 0x162   : > { %v2111_v38 = vrot.slane %v2109_v2, 4  ;;  %v2114_v42 = vrot.slane %v2112_v53, 5  ;;  %v2120_v45 = vrot.slane %v2118_v33, 5  ;;  %v2301_v49 = vshrl.u32 %v1979_v37, 16  ;;  %v2521_v9 = vld [vmem:[#allocation2 + $0x9c] sm:$0xe] }
 0x163   : > { %v2289_v48 = vsel %vm5166_vm11, %v2284_v50, %v2288_v27  ;;  %v2294_v52 = vrot.slane %v2293_v30, 4  ;;  %v2124_v54 = vrot.slane %v2122_v35, 4  ;;  %v2304_v55 = vshll.u32 %v1979_v37, 16  ;;  %2428 = vrot.lane.b32.xlu0 %v4375_v6, %s4873_s26  ;;  %v5757_v16 = vpop.permute.xlu1 %3803  ;;  %v2522_v29 = vld [vmem:[#allocation2 + $0xa0] sm:$0xf] }
 0x164   : > { %v4677_v46 = vld [vmem:[#allocation2 + $0xa8] sm:$0xff]   ;;  %v2115_v47 = vor.u32 %v2114_v42, %v2111_v38  ;;  %v2303_v63 = vrot.slane %v2301_v49, 4  ;;  %v4391_v3 = vrot.slane %v2497_v31, 9  ;;  %v2611_v5 = vrot.slane %v2498_v60, 5  ;;  %v4700_v15 = vld [vmem:[#allocation2 + $0x9c] sm:$0xff]  }
 0x165   : > { %v1980_v62 = vld [vmem:[#allocation2 + $0xac] sm:$0xf]  ;;  %1901 = vrot.lane.b32.xlu1 %v4677_v46, %s4871_s7  ;;  %v2299_v57 = vsel %vm5166_vm11, %v2294_v52, %v2298_v25  ;;  %v1957_v56 = vld [vmem:[#allocation2 + $0x50] sm:$0x1]  ;;  %v2125_v0 = vor.u32 %v2124_v54, %v2120_v45  ;;  %v2306_v7 = vrot.slane %v2304_v55, 5  ;;  %888 = vst.msk [vmem:[#allocation3 + $0x68] sm:$0xff] %vm874_vm14, %v4700_v15 }
 0x166   : > { %v2310_v8 = vshll.u32 %v1980_v62, 16  ;;  %v4383_v12 = vcombine.low %v2289_v48, %v2299_v57  ;;  %v2116_v59 = vrot.slane %v2115_v47, 4  ;;  %v2128_v14 = vshll.u32 %v1957_v56, 16  ;;  %v2523_v18 = vld [vmem:[#allocation2 + $0xa4] sm:$0x1] }
 0x167   : > { %v1981_v13 = vld [vmem:[#allocation2 + $0xb0] sm:$0x1]  ;;  %v2314_v10 = vshrl.u32 %v1980_v62, 16  ;;  %v2126_v27 = vrot.slane %v2125_v0, 4  ;;  %v2307_v61 = vor.u32 %v2306_v7, %v2303_v63  ;;  %v2500_v21 = vld [vmem:[#allocation2 + $0x48] sm:$0xe]  ;;  %v2612_v40 = vsel %vm5146_vm6, %v4391_v3, %v2611_v5 }
 0x168   : > { %v2312_v11 = vrot.slane %v2310_v8, 5  ;;  %v2320_v17 = vshll.u32 %v1981_v13, 16  ;;  %v2121_v43 = vsel %vm5166_vm11, %v2116_v59, %v2120_v45  ;;  %v2130_v24 = vrot.slane %v2128_v14, 5  ;;  %v2501_v26 = vld [vmem:[#allocation2 + $0x4c] sm:$0xf] }
 0x169   : > { %v2316_v25 = vrot.slane %v2314_v10, 4  ;;  %v2502_v31 = vld [vmem:[#allocation2 + $0x50] sm:$0x1]  ;;  %2444 = vrot.lane.b32.xlu1 %v4383_v12, %s4873_s26  ;;  %v2308_v32 = vrot.slane %v2307_v61, 4  ;;  %v2613_v2 = vrot.slane %v2611_v5, 4  ;;  %v2614_v53 = vrot.slane %v2499_v58, 5  ;;  %v1381_v6 = vpop.permute.xlu0 %1380 }
 0x16a   : > { %v2322_v28 = vrot.slane %v2320_v17, 5  ;;  %v2524_v33 = vld [vmem:[#allocation2 + $0xa8] sm:$0xe]  ;;  %v2525_v60 = vld [vmem:[#allocation2 + $0xac] sm:$0xf]  ;;  %v2131_v50 = vsel %vm5166_vm11, %v2126_v27, %v2130_v24  ;;  %vm3512_vm7 = vcmask 261344   ;;  %v1397_v37 = vpop.permute.xlu1 %1396 }
 0x16b   : > { %v2317_v30 = vor.u32 %v2316_v25, %v2312_v11  ;;  %v4399_v35 = vrot.slane %v2521_v9, 9  ;;  %1426 = vst.msk [vmem:[#allocation3 + $0x18] sm:$0xff] %vm1422_vm15, %v1381_v6  ;;  %v4376_v38 = vcombine.low %v2121_v43, %v2131_v50  ;;  %v2313_v42 = vsel %vm5166_vm11, %v2308_v32, %v2312_v11  ;;  %v2526_v46 = vld [vmem:[#allocation2 + $0xb0] sm:$0x1]  ;;  %1434 = vst.msk [vmem:[#allocation3 + $0x58] sm:$0xff] %vm1422_vm15, %v1397_v37 }
 0x16c   : > { %v2615_v45 = vsel %vm5146_vm6, %v2613_v2, %v2614_v53  ;;  %3513 = vst.msk [vmem:[#allocation3] sm:$0xff] %vm3512_vm7, %v5666_v23  ;;  %v2667_v49 = vrot.slane %v2522_v29, 5  ;;  %3521 = vst.msk [vmem:[#allocation3 + $0x40] sm:$0xff] %vm3512_vm7, %v5679_v44  ;;  %v2670_v54 = vrot.slane %v2523_v18, 5  ;;  %v4392_v55 = vrot.slane %v2500_v21, 9 }
 0x16d   : > { %3514 = vst.msk [vmem:[#allocation3 + $0x8] sm:$0xff] %vm3512_vm7, %v5687_v41  ;;  %3522 = vst.msk [vmem:[#allocation3 + $0x48] sm:$0xff] %vm3512_vm7, %v5699_v20  ;;  %v2318_v48 = vrot.slane %v2317_v30, 4  ;;  %v4407_v52 = vcombine.low %v2612_v40, %v2615_v45  ;;  %2430 = vrot.lane.b32.xlu0 %v4376_v38, %s4873_s26  ;;  %v2618_v47 = vrot.slane %v2501_v26, 5  ;;  %v2621_v41 = vrot.slane %v2502_v31, 5  ;;  %v1703_v63 = vpop.permute.xlu0 %1702 }
 0x16e   : > { %v2668_v23 = vsel %vm5146_vm6, %v4399_v35, %v2667_v49  ;;  %v2669_v44 = vrot.slane %v2667_v49, 4  ;;  %v285_v62 = vld [vmem:[%s5082_s6 + $0x30] sm:$0xf]  ;;  %v4400_v58 = vrot.slane %v2524_v33, 9  ;;  %v2674_v3 = vrot.slane %v2525_v60, 5  ;;  %1749 = vst.msk [vmem:[#allocation3 + $0x10] sm:$0xff] %vm6310_vm1, %v1703_v63  ;;  %v1719_v56 = vpop.permute.xlu1 %1718 }
 0x16f   : > { %v2323_v20 = vsel %vm5166_vm11, %v2318_v48, %v2322_v28  ;;  %v2677_v5 = vrot.slane %v2526_v46, 5  ;;  %v286_v57 = vld [vmem:[%s5082_s6 + $0x34] sm:$0xf]  ;;  %v2619_v8 = vsel %vm5146_vm6, %v4392_v55, %v2618_v47  ;;  %v2620_v9 = vrot.slane %v2618_v47, 4  ;;  %v301_v12 = vld [vmem:[%s5082_s6 + $0x70] sm:$0xf] }
 0x170   : > { %v4384_v0 = vcombine.low %v2313_v42, %v2323_v20  ;;  %v2671_v7 = vsel %vm5146_vm6, %v2669_v44, %v2670_v54  ;;  %1757 = vst.msk [vmem:[#allocation3 + $0x50] sm:$0xff] %vm6310_vm1, %v1719_v56  ;;  %v5800_v14 = vsel %vm5146_vm6, %v4400_v58, %v2674_v3  ;;  %v2676_v13 = vrot.slane %v2674_v3, 4  ;;  %v302_v10 = vld [vmem:[%s5082_s6 + $0x74] sm:$0xf]  ;;  %v2996_v11 = vld [vmem:[#allocation2 + $0x48] sm:$0xf] }
 0x171   : > { %v4415_v59 = vcombine.low %v2668_v23, %v2671_v7  ;;  %vm3833_vm8 = vcmask 294144   ;;  %2749 = vrot.lane.b32.xlu0 %v4407_v52, %s4872_s8  ;;  %v2622_v29 = vsel %vm5146_vm6, %v2620_v9, %v2621_v41  ;;  %v411_v15 = vshrl.u32 %v285_v62, 16  ;;  %v1705_v17 = vpop.permute.xlu0 %1704  ;;  %v732_v31 = vld [vmem:[#allocation2 + $0xb4] sm:$0xf]  ;;  %v2997_v2 = vld [vmem:[#allocation2 + $0x4c] sm:$0xf] }
 0x172   : > { %2446 = vrot.lane.b32.xlu1 %v4384_v0, %s4873_s26  ;;  %3834 = vst.msk [vmem:[#allocation3] sm:$0xff] %vm3833_vm8, %v5714_v39  ;;  %v414_v27 = vshll.u32 %v285_v62, 16  ;;  %v419_v61 = vshrl.u32 %v286_v57, 16  ;;  %3842 = vst.msk [vmem:[#allocation3 + $0x40] sm:$0xff] %vm3833_vm8, %v5725_v4  ;;  %v4408_v18 = vcombine.low %v2619_v8, %v2622_v29  ;;  %v2678_v21 = vsel %vm5146_vm6, %v2676_v13, %v2677_v5  ;;  %v676_v39 = vld [vmem:[#allocation2 + $0x54] sm:$0xf]  ;;  %v1721_v25 = vpop.permute.xlu1 %1720 }
 0x173   : > { %3835 = vst.msk [vmem:[#allocation3 + $0x8] sm:$0xff] %vm3833_vm8, %v5754_v22  ;;  %3843 = vst.msk [vmem:[#allocation3 + $0x48] sm:$0xff] %vm3833_vm8, %v5757_v16  ;;  %v422_v43 = vshll.u32 %v286_v57, 16  ;;  %v547_v24 = vshrl.u32 %v301_v12, 16  ;;  %v4416_v4 = vcombine.low %v5800_v14, %v2678_v21  ;;  %v413_v40 = vrot.slane %v411_v15, 7  ;;  %v4678_v33 = vld [vmem:[#allocation2 + $0x48] sm:$0xff]  }
 0x174   : > { %1750 = vst.msk [vmem:[#allocation3 + $0x18] sm:$0xff] %vm6310_vm1, %v1705_v17  ;;  %v5819_v26 = vrot.slane %v419_v61, 7  ;;  %v550_v22 = vshll.u32 %v301_v12, 16  ;;  %1758 = vst.msk [vmem:[#allocation3 + $0x58] sm:$0xff] %vm6310_vm1, %v1721_v25  ;;  %v555_v32 = vshrl.u32 %v302_v10, 16  ;;  %v558_v28 = vshll.u32 %v302_v10, 16 }
 0x175   : > { %v549_v16 = vrot.slane %v547_v24, 7  ;;  %v3129_v53 = vshrl.u32 %v2996_v11, 16  ;;  %2751 = vrot.lane.b32.xlu0 %v4408_v18, %s4872_s8  ;;  %v416_v60 = vor.u32 %v414_v27, %v413_v40  ;;  %v417_v6 = vrot.slane %v413_v40, 4  ;;  %v2998_v35 = vld [vmem:[#allocation2 + $0x50] sm:$0x1]  ;;  %v1880_v37 = vpop.permute.xlu0 %1879  ;;  %v4679_v47 = vld [vmem:[#allocation2 + $0xa8] sm:$0xff]  }
 0x176   : > { %2765 = vrot.lane.b32.xlu1 %v4415_v59, %s4872_s8  ;;  %v424_v50 = vor.u32 %v422_v43, %v5819_v26  ;;  %v426_v30 = vrot.slane %v5819_v26, 4  ;;  %v5826_v45 = vrot.slane %v555_v32, 7  ;;  %v3020_v46 = vld [vmem:[#allocation2 + $0xa8] sm:$0xf]  ;;  %1926 = vst.msk [vmem:[#allocation3 + $0x10] sm:$0xff] %vm1923_vm2, %v1880_v37  ;;  %v1896_v48 = vpop.permute.xlu1 %1895  ;;  %v3132_v55 = vshll.u32 %v2996_v11, 16 }
 0x177   : > { %v552_v38 = vor.u32 %v550_v22, %v549_v16  ;;  %v553_v42 = vrot.slane %v549_v16, 4  ;;  %v3131_v49 = vrot.slane %v3129_v53, 4  ;;  %v677_v54 = vsel %vm5160_vm10, %v416_v60, %v676_v39  ;;  %v3021_v44 = vld [vmem:[#allocation2 + $0xac] sm:$0xf]  ;;  %1934 = vst.msk [vmem:[#allocation3 + $0x50] sm:$0xff] %vm1923_vm2, %v1896_v48 }
 0x178   : > { %v425_v52 = vsel %vm5180_vm12, %v417_v6, %v424_v50  ;;  %v3138_v23 = vshll.u32 %v2997_v2, 16  ;;  %678 = vst [vmem:[#allocation2 + $0x54] sm:$0xf] %v677_v54  ;;  %v560_v41 = vor.u32 %v558_v28, %v5826_v45  ;;  %v562_v62 = vrot.slane %v5826_v45, 4  ;;  %v680_v58 = vld [vmem:[#allocation2 + $0x5c] sm:$0x1] }
 0x179   : > { %679 = vst.msk [vmem:[#allocation2 + $0x58] sm:$0xf] %vm217_vm0, %v425_v52  ;;  %v733_v63 = vsel %vm5160_vm10, %v552_v38, %v732_v31  ;;  %v3142_v20 = vshrl.u32 %v2997_v2, 16  ;;  %2927 = vrot.lane.b32.xlu0 %v4678_v33, %s4874_s28  ;;  %v3134_v3 = vrot.slane %v3132_v55, 5  ;;  %v3148_v57 = vshll.u32 %v2998_v35, 16  ;;  %v3858_v27 = vld [vmem:[#allocation3 + $0x40] sm:$0xff] }
 0x17a   : > { %2767 = vrot.lane.b32.xlu1 %v4416_v4, %s4872_s8  ;;  %734 = vst [vmem:[#allocation2 + $0xb4] sm:$0xf] %v733_v63  ;;  %v3140_v5 = vrot.slane %v3138_v23, 5  ;;  %v3022_v56 = vld [vmem:[#allocation2 + $0xb0] sm:$0x1]  ;;  %v3321_v0 = vshrl.u32 %v3020_v46, 16  ;;  %v561_v7 = vsel %vm5180_vm12, %v553_v42, %v560_v41  ;;  %v681_v4 = vsel %vm5204_vm13, %v426_v30, %v680_v58 }
 0x17b   : > { %v3144_v8 = vrot.slane %v3142_v20, 4  ;;  %v3324_v9 = vshll.u32 %v3020_v46, 16  ;;  %v3330_v12 = vshll.u32 %v3021_v44, 16  ;;  %v4687_v59 = vld [vmem:[#allocation7 + $0x10] ss:$0 sps:$4 sm:$0x33]   ;;  %v3135_v13 = vor.u32 %v3134_v3, %v3131_v49  ;;  %v1882_v39 = vpop.permute.xlu0 %1881 }
 0x17c   : > { %v736_v14 = vld [vmem:[#allocation2 + $0xbc] sm:$0x1]  ;;  %735 = vst.msk [vmem:[#allocation2 + $0xb8] sm:$0xf] %vm217_vm0, %v561_v7  ;;  %v3150_v10 = vrot.slane %v3148_v57, 5  ;;  %v3323_v29 = vrot.slane %v3321_v0, 4 }
 0x17d   : > { %v3334_v15 = vshrl.u32 %v3021_v44, 16  ;;  %v3850_v61 = vld [vmem:[#allocation3] sm:$0xff]  ;;  %v3145_v11 = vor.u32 %v3144_v8, %v3140_v5  ;;  %v3326_v17 = vrot.slane %v3324_v9, 5  ;;  %v3332_v18 = vrot.slane %v3330_v12, 5  ;;  %v5844_v43 = vld [vmem:[#allocation2 + $0x48] sm:$0xe]  ;;  %v1898_v26 = vpop.permute.xlu1 %1897 }
 0x17e   : > { %v3340_v21 = vshll.u32 %v3022_v56, 16  ;;  %2943 = vrot.lane.b32.xlu1 %v4679_v47, %s4874_s28  ;;  %v3136_v24 = vrot.slane %v3135_v13, 4  ;;  %vm3893_vm9 = vcmask 293888   ;;  %v5849_v40 = vld [vmem:[#allocation2 + $0x4c] sm:$0xf]  ;;  %1927 = vst.msk [vmem:[#allocation3 + $0x18] sm:$0xff] %vm1923_vm2, %v1882_v39  ;;  %v737_v60 = vsel %vm5204_vm13, %v562_v62, %v736_v14 }
 0x17f   : > { %v3336_v25 = vrot.slane %v3334_v15, 4  ;;  %v3146_v22 = vrot.slane %v3145_v11, 4  ;;  %v3327_v31 = vor.u32 %v3326_v17, %v3323_v29  ;;  %682 = vst [vmem:[#allocation2 + $0x5c] sm:$0x1] %v681_v4  ;;  %4551 = vmatprep.mubr.msk.bf16.mxu1 %vm3893_vm9, %v3858_v27  ;;  %4535 = vmatprep.mubr.msk.bf16.mxu0 %vm3893_vm9, %v3850_v61  ;;  %vm3942_vm1 = vcmask 1041408   ;;  %v3851_v32 = vld [vmem:[#allocation3 + $0x8] sm:$0xff]  ;;  %v2425_v38 = vpop.permute.xlu0 %2424 }
 0x180   : > { %v3342_v16 = vrot.slane %v3340_v21, 5  ;;  %v3859_v28 = vld [vmem:[#allocation3 + $0x48] sm:$0xff]  ;;  %1935 = vst.msk [vmem:[#allocation3 + $0x58] sm:$0xff] %vm1923_vm2, %v1898_v26  ;;  %v4680_v2 = vld [vmem:[#allocation2 + $0x54] sm:$0xff]   ;;  %v3141_v53 = vsel %vm5166_vm11, %v3136_v24, %v3140_v5  ;;  %4573 = vmatprep.subr.msk.bf16.mxu0 %vm3942_vm1, %v4687_v59  ;;  %v3944_v6 = vsel %vm3942_vm1, %v4687_v59, 0  ;;  %4574 = vmatprep.subr.msk.bf16.mxu1 %vm3942_vm1, %v4687_v59  ;;  %v4455_v37 = vrot.slane %v5844_v43, 9 }
 0x181   : > { %v3337_v33 = vor.u32 %v3336_v25, %v3332_v18  ;;  %v3151_v50 = vsel %vm5166_vm11, %v3146_v22, %v3150_v10  ;;  %v3328_v30 = vrot.slane %v3327_v31, 4  ;;  %v2999_v35 = vld [vmem:[#allocation2 + $0x54] sm:$0xf]  ;;  %738 = vst [vmem:[#allocation2 + $0xbc] sm:$0x1] %v737_v60  ;;  %4534 = vmatpush3.bf16.msra.mxu0 %v3944_v6  ;;  %4572 = vmatpush3.bf16.msra.mxu1 %v3944_v6  ;;  %2471 = vst.msk [vmem:[#allocation3 + $0x10] sm:$0xff] %vm2468_vm3, %v2425_v38  ;;  %v2441_v52 = vpop.permute.xlu1 %2440 }
 0x182   : > { %2929 = vrot.lane.b32.xlu0 %v4680_v2, %s4874_s28  ;;  %v4439_v42 = vcombine.low %v3141_v53, %v3151_v50  ;;  %v3000_v49 = vld [vmem:[#allocation2 + $0x58] sm:$0xf]  ;;  %v3153_v46 = vshrl.u32 %v2999_v35, 16  ;;  %v3156_v48 = vshll.u32 %v2999_v35, 16  ;;  %v3655_v47 = vrot.slane %v5849_v40, 5  ;;  %2479 = vst.msk [vmem:[#allocation3 + $0x50] sm:$0xff] %vm2468_vm3, %v2441_v52 }
 0x183   : > { %v3338_v45 = vrot.slane %v3337_v33, 4  ;;  %v4683_v54 = vld [vmem:[#allocation2 + $0xb4] sm:$0xff]   ;;  %v3333_v55 = vsel %vm5166_vm11, %v3328_v30, %v3332_v18  ;;  %v3162_v23 = vshll.u32 %v3000_v49, 16  ;;  %v3166_v44 = vshrl.u32 %v3000_v49, 16  ;;  %v3543_v0 = vld [vmem:[#allocation2 + $0x50] sm:$0x1] }
 0x184   : > { %v3155_v62 = vrot.slane %v3153_v46, 4  ;;  %v3158_v63 = vrot.slane %v3156_v48, 5  ;;  %v3023_v20 = vld [vmem:[#allocation2 + $0xb4] sm:$0xf]  ;;  %v3024_v58 = vld [vmem:[#allocation2 + $0xb8] sm:$0xf]  ;;  %4536 = vmatmul.mubr.msk.bf16.vlgmr.msra.gmra.mrb[0].mxu0 %vm3893_vm9, %v3851_v32  ;;  %4552 = vmatmul.mubr.msk.bf16.vlgmr.msra.gmra.mrb[0].mxu1 %vm3893_vm9, %v3859_v28  ;;  %v5876_v29 = vsel %vm5146_vm6, %v4455_v37, %v3655_v47 }
 0x185   : > { %v3343_v41 = vsel %vm5166_vm11, %v3338_v45, %v3342_v16  ;;  %2945 = vrot.lane.b32.xlu1 %v4683_v54, %s4874_s28  ;;  %v3164_v5 = vrot.slane %v3162_v23, 5  ;;  %v3168_v57 = vrot.slane %v3166_v44, 4  ;;  %v3345_v56 = vshrl.u32 %v3023_v20, 16  ;;  %v3565_v15 = vld [vmem:[#allocation2 + $0xa8] sm:$0xe]  ;;  %v4690_v34 = vld [vmem:[#allocation2 + $0xb4] sm:$0xff]  }
 0x186   : > { %v4447_v3 = vcombine.low %v3333_v55, %v3343_v41  ;;  %3472 = vrot.lane.b32.xlu0 %v4439_v42, %s4875_s22  ;;  %v3001_v7 = vld [vmem:[#allocation2 + $0x5c] sm:$0x1]  ;;  %v3159_v8 = vor.u32 %v3158_v63, %v3155_v62  ;;  %v3348_v9 = vshll.u32 %v3023_v20, 16  ;;  %v3354_v12 = vshll.u32 %v3024_v58, 16  ;;  %v3566_v27 = vld [vmem:[#allocation2 + $0xac] sm:$0xf] }
 0x187   : > { %v3358_v59 = vshrl.u32 %v3024_v58, 16  ;;  %v3169_v14 = vor.u32 %v3168_v57, %v3164_v5  ;;  %v3172_v13 = vshll.u32 %v3001_v7, 16  ;;  %v3347_v10 = vrot.slane %v3345_v56, 4  ;;  %v3567_v16 = vld [vmem:[#allocation2 + $0xb0] sm:$0x1]  ;;  %v4701_v32 = vld [vmem:[#allocation2 + $0x48] sm:$0xff]  }
 0x188   : > { %v3160_v61 = vrot.slane %v3159_v8, 4  ;;  %v3025_v11 = vld [vmem:[#allocation2 + $0xbc] sm:$0x1]  ;;  %v3350_v17 = vrot.slane %v3348_v9, 5  ;;  %v3356_v18 = vrot.slane %v3354_v12, 5  ;;  %v3657_v25 = vrot.slane %v3655_v47, 4  ;;  %v2427_v4 = vpop.permute.xlu0 %2426 }
 0x189   : > { %v3360_v21 = vrot.slane %v3358_v59, 4  ;;  %3488 = vrot.lane.b32.xlu1 %v4447_v3, %s4875_s22  ;;  %v3170_v43 = vrot.slane %v3169_v14, 4  ;;  %v3174_v39 = vrot.slane %v3172_v13, 5  ;;  %v3364_v24 = vshll.u32 %v3025_v11, 16  ;;  %2472 = vst.msk [vmem:[#allocation3 + $0x18] sm:$0xff] %vm2468_vm3, %v2427_v4  ;;  %v4702_v12 = vld [vmem:[#allocation2 + $0xa8] sm:$0xff]  }
 0x18a   : > { %v3165_v40 = vsel %vm5166_vm11, %v3160_v61, %v3164_v5  ;;  %v3351_v26 = vor.u32 %v3350_v17, %v3347_v10  ;;  %v3658_v31 = vrot.slane %v3543_v0, 5  ;;  %v4463_v53 = vrot.slane %v3565_v15, 9  ;;  %v909_v60 = vld [vmem:[#allocation2 + $0x48] sm:$0xf]  ;;  %v2443_v6 = vpop.permute.xlu1 %2442  ;;  %v910_v38 = vld [vmem:[#allocation2 + $0x4c] sm:$0xf] }
 0x18b   : > { %v3361_v22 = vor.u32 %v3360_v21, %v3356_v18  ;;  %v3175_v28 = vsel %vm5166_vm11, %v3170_v43, %v3174_v39  ;;  %v3366_v2 = vrot.slane %v3364_v24, 5  ;;  %v3711_v33 = vrot.slane %v3566_v27, 5  ;;  %2480 = vst.msk [vmem:[#allocation3 + $0x58] sm:$0xff] %vm2468_vm3, %v2443_v6  ;;  %v911_v48 = vld [vmem:[#allocation2 + $0x50] sm:$0x1]  ;;  %v4703_v6 = vld [vmem:[#allocation2 + $0x54] sm:$0xff]  }
 0x18c   : > { %v4440_v50 = vcombine.low %v3165_v40, %v3175_v28  ;;  %v3352_v30 = vrot.slane %v3351_v26, 4  ;;  %v3659_v37 = vsel %vm5146_vm6, %v3657_v25, %v3658_v31  ;;  %881 = vst.msk [vmem:[#allocation3 + $0x30] sm:$0xff] %vm874_vm14, %v4701_v32  ;;  %v3714_v46 = vrot.slane %v3567_v16, 5  ;;  %v2746_v52 = vpop.permute.xlu0 %2745  ;;  %v933_v47 = vld [vmem:[#allocation2 + $0xa8] sm:$0xf]  ;;  %889 = vst.msk [vmem:[#allocation3 + $0x70] sm:$0xff] %vm874_vm14, %v4702_v12 }
 0x18d   : > { %v3362_v35 = vrot.slane %v3361_v22, 4  ;;  %v4471_v42 = vcombine.low %v5876_v29, %v3659_v37  ;;  %v3712_v45 = vsel %vm5146_vm6, %v4463_v53, %v3711_v33  ;;  %v3713_v49 = vrot.slane %v3711_v33, 4  ;;  %v934_v41 = vld [vmem:[#allocation2 + $0xac] sm:$0xf]  ;;  %2792 = vst.msk [vmem:[#allocation3 + $0x10] sm:$0xff] %vm2789_vm4, %v2746_v52 }
 0x18e   : > { %3474 = vrot.lane.b32.xlu0 %v4440_v50, %s4875_s22  ;;  %v3357_v54 = vsel %vm5166_vm11, %v3352_v30, %v3356_v18  ;;  %v1087_v23 = vshrl.u32 %v909_v60, 16  ;;  %v1090_v44 = vshll.u32 %v909_v60, 16  ;;  %v1096_v20 = vshll.u32 %v910_v38, 16  ;;  %v935_v3 = vld [vmem:[#allocation2 + $0xb0] sm:$0x1]  ;;  %v2762_v57 = vpop.permute.xlu1 %2761  ;;  %882 = vst.msk [vmem:[#allocation3 + $0x38] sm:$0xff] %vm874_vm14, %v4703_v6 }
 0x18f   : > { %v3367_v55 = vsel %vm5166_vm11, %v3362_v35, %v3366_v2  ;;  %v3715_v63 = vsel %vm5146_vm6, %v3713_v49, %v3714_v46  ;;  %v1100_v58 = vshrl.u32 %v910_v38, 16  ;;  %v3544_v5 = vld [vmem:[#allocation2 + $0x54] sm:$0xe]  ;;  %v1106_v8 = vshll.u32 %v911_v48, 16  ;;  %v3545_v9 = vld [vmem:[#allocation2 + $0x58] sm:$0xf] }
 0x190   : > { %v4448_v62 = vcombine.low %v3357_v54, %v3367_v55  ;;  %v4479_v56 = vcombine.low %v3712_v45, %v3715_v63  ;;  %v1089_v0 = vrot.slane %v1087_v23, 4  ;;  %v1092_v7 = vrot.slane %v1090_v44, 5  ;;  %2800 = vst.msk [vmem:[#allocation3 + $0x50] sm:$0xff] %vm2789_vm4, %v2762_v57  ;;  %v3546_v29 = vld [vmem:[#allocation2 + $0x5c] sm:$0x1]  ;;  %v2748_v15 = vpop.permute.xlu0 %2747 }
 0x191   : > { %v1098_v59 = vrot.slane %v1096_v20, 5  ;;  %v1102_v14 = vrot.slane %v1100_v58, 4  ;;  %v1279_v13 = vshrl.u32 %v933_v47, 16  ;;  %v1282_v10 = vshll.u32 %v933_v47, 16  ;;  %v3568_v18 = vld [vmem:[#allocation2 + $0xb4] sm:$0xe] }
 0x192   : > { %3490 = vrot.lane.b32.xlu1 %v4448_v62, %s4875_s22  ;;  %3793 = vrot.lane.b32.xlu0 %v4471_v42, %s4876_s29  ;;  %v1093_v27 = vor.u32 %v1092_v7, %v1089_v0  ;;  %v1108_v61 = vrot.slane %v1106_v8, 5  ;;  %v1288_v11 = vshll.u32 %v934_v41, 16  ;;  %v1292_v17 = vshrl.u32 %v934_v41, 16  ;;  %2793 = vst.msk [vmem:[#allocation3 + $0x18] sm:$0xff] %vm2789_vm4, %v2748_v15  ;;  %v3569_v25 = vld [vmem:[#allocation2 + $0xb8] sm:$0xf]  ;;  %v2764_v40 = vpop.permute.xlu1 %2763 }
 0x193   : > { %v1103_v21 = vor.u32 %v1102_v14, %v1098_v59  ;;  %v1281_v43 = vrot.slane %v1279_v13, 4  ;;  %v1284_v39 = vrot.slane %v1282_v10, 5  ;;  %v1298_v24 = vshll.u32 %v935_v3, 16  ;;  %v3570_v4 = vld [vmem:[#allocation2 + $0xbc] sm:$0x1]  ;;  %2801 = vst.msk [vmem:[#allocation3 + $0x58] sm:$0xff] %vm2789_vm4, %v2764_v40 }
 0x194   : > { %v1094_v26 = vrot.slane %v1093_v27, 4  ;;  %v1290_v22 = vrot.slane %v1288_v11, 5  ;;  %v1294_v31 = vrot.slane %v1292_v17, 4  ;;  %v4456_v16 = vrot.slane %v3544_v5, 9  ;;  %v912_v32 = vld [vmem:[#allocation2 + $0x54] sm:$0xf]  ;;  %v2924_v60 = vpop.permute.xlu0 %2923 }
 0x195   : > { %v1104_v28 = vrot.slane %v1103_v21, 4  ;;  %v1285_v2 = vor.u32 %v1284_v39, %v1281_v43  ;;  %v1300_v53 = vrot.slane %v1298_v24, 5  ;;  %v3662_v33 = vrot.slane %v3545_v9, 5  ;;  %2970 = vst.msk [vmem:[#allocation3 + $0x10] sm:$0xff] %vm2967_vm5, %v2924_v60  ;;  %v913_v23 = vld [vmem:[#allocation2 + $0x58] sm:$0xf] }
 0x196   : > { %3809 = vrot.lane.b32.xlu1 %v4479_v56, %s4876_s29  ;;  %v1099_v50 = vsel %vm5166_vm11, %v1094_v26, %v1098_v59  ;;  %v1295_v30 = vor.u32 %v1294_v31, %v1290_v22  ;;  %v3665_v35 = vrot.slane %v3546_v29, 5  ;;  %v4464_v37 = vrot.slane %v3568_v18, 9  ;;  %v2940_v46 = vpop.permute.xlu1 %2939  ;;  %v914_v41 = vld [vmem:[#allocation2 + $0x5c] sm:$0x1]  ;;  %v936_v20 = vld [vmem:[#allocation2 + $0xb4] sm:$0xf] }
 0x197   : > { %v1109_v38 = vsel %vm5166_vm11, %v1104_v28, %v1108_v61  ;;  %v1286_v42 = vrot.slane %v1285_v2, 4  ;;  %v3663_v45 = vsel %vm5146_vm6, %v4456_v16, %v3662_v33  ;;  %v3664_v49 = vrot.slane %v3662_v33, 4  ;;  %2978 = vst.msk [vmem:[#allocation3 + $0x50] sm:$0xff] %vm2967_vm5, %v2940_v46  ;;  %v4704_v56 = vld [vmem:[#allocation2 + $0xb4] sm:$0xff]   ;;  %v1457_v59 = vld [vmem:[#allocation2 + $0x48] sm:$0xe] }
 0x198   : > { %v4313_v48 = vcombine.low %v1099_v50, %v1109_v38  ;;  %v1296_v52 = vrot.slane %v1295_v30, 4  ;;  %v3718_v54 = vrot.slane %v3569_v25, 5  ;;  %v3721_v55 = vrot.slane %v3570_v4, 5  ;;  %v937_v12 = vld [vmem:[#allocation2 + $0xb8] sm:$0xf]  ;;  %890 = vst.msk [vmem:[#allocation3 + $0x78] sm:$0xff] %vm874_vm14, %v4704_v56 }
 0x199   : > { %v1291_v44 = vsel %vm5166_vm11, %v1286_v42, %v1290_v22  ;;  %v3666_v47 = vsel %vm5146_vm6, %v3664_v49, %v3665_v35  ;;  %v1111_v62 = vshrl.u32 %v912_v32, 16  ;;  %v1114_v63 = vshll.u32 %v912_v32, 16  ;;  %v938_v29 = vld [vmem:[#allocation2 + $0xbc] sm:$0x1]  ;;  %v1458_v18 = vld [vmem:[#allocation2 + $0x4c] sm:$0xf] }
 0x19a   : > { %1386 = vrot.lane.b32.xlu0 %v4313_v48, %s4870_s20  ;;  %v1301_v58 = vsel %vm5166_vm11, %v1296_v52, %v1300_v53  ;;  %v4472_v3 = vcombine.low %v3663_v45, %v3666_v47  ;;  %v3719_v5 = vsel %vm5146_vm6, %v4464_v37, %v3718_v54  ;;  %v3720_v57 = vrot.slane %v3718_v54, 4  ;;  %v1459_v21 = vld [vmem:[#allocation2 + $0x50] sm:$0x1]  ;;  %v2926_v43 = vpop.permute.xlu0 %2925  ;;  %v1481_v40 = vld [vmem:[#allocation2 + $0xa8] sm:$0xe] }
 0x19b   : > { %v4321_v0 = vcombine.low %v1291_v44, %v1301_v58  ;;  %v1113_v7 = vrot.slane %v1111_v62, 4  ;;  %v1116_v8 = vrot.slane %v1114_v63, 5  ;;  %v1120_v9 = vshll.u32 %v913_v23, 16  ;;  %v1482_v26 = vld [vmem:[#allocation2 + $0xac] sm:$0xf]  ;;  %2971 = vst.msk [vmem:[#allocation3 + $0x18] sm:$0xff] %vm2967_vm5, %v2926_v43 }
 0x19c   : > { %v3722_v14 = vsel %vm5146_vm6, %v3720_v57, %v3721_v55  ;;  %v1124_v13 = vshrl.u32 %v913_v23, 16  ;;  %v1130_v10 = vshll.u32 %v914_v41, 16  ;;  %v1303_v15 = vshrl.u32 %v936_v20, 16  ;;  %v1483_v28 = vld [vmem:[#allocation2 + $0xb0] sm:$0x1] }
 0x19d   : > { %1402 = vrot.lane.b32.xlu1 %v4321_v0, %s4870_s20  ;;  %v4480_v27 = vcombine.low %v3719_v5, %v3722_v14  ;;  %v1117_v61 = vor.u32 %v1116_v8, %v1113_v7  ;;  %v1122_v11 = vrot.slane %v1120_v9, 5  ;;  %v1306_v17 = vshll.u32 %v936_v20, 16  ;;  %v1460_v2 = vld [vmem:[#allocation2 + $0x54] sm:$0xe]  ;;  %v1461_v42 = vld [vmem:[#allocation2 + $0x58] sm:$0xf] }
 0x19e   : > { %3795 = vrot.lane.b32.xlu0 %v4472_v3, %s4876_s29  ;;  %v1126_v39 = vrot.slane %v1124_v13, 4  ;;  %v1132_v24 = vrot.slane %v1130_v10, 5  ;;  %v1305_v25 = vrot.slane %v1303_v15, 4  ;;  %v1312_v4 = vshll.u32 %v937_v12, 16  ;;  %v3469_v45 = vpop.permute.xlu0 %3468  ;;  %v1462_v54 = vld [vmem:[#allocation2 + $0x5c] sm:$0x1] }
 0x19f   : > { %v1118_v22 = vrot.slane %v1117_v61, 4  ;;  %v1308_v31 = vrot.slane %v1306_v17, 5  ;;  %v1316_v16 = vshrl.u32 %v937_v12, 16  ;;  %v1322_v32 = vshll.u32 %v938_v29, 16  ;;  %3515 = vst.msk [vmem:[#allocation3 + $0x10] sm:$0xff] %vm3512_vm7, %v3469_v45 }
 0x1a0   : > { %v1127_v53 = vor.u32 %v1126_v39, %v1122_v11  ;;  %v1314_v33 = vrot.slane %v1312_v4, 5  ;;  %v4329_v60 = vrot.slane %v1457_v59, 9  ;;  %v1582_v6 = vrot.slane %v1458_v18, 5  ;;  %v2942_v50 = vpop.permute.xlu1 %2941  ;;  %v1484_v41 = vld [vmem:[#allocation2 + $0xb4] sm:$0xe] }
 0x1a1   : > { %3811 = vrot.lane.b32.xlu1 %v4480_v27, %s4876_s29  ;;  %v1123_v30 = vsel %vm5166_vm11, %v1118_v22, %v1122_v11  ;;  %v1309_v35 = vor.u32 %v1308_v31, %v1305_v25  ;;  %v1318_v37 = vrot.slane %v1316_v16, 4  ;;  %v1324_v38 = vrot.slane %v1322_v32, 5  ;;  %2979 = vst.msk [vmem:[#allocation3 + $0x58] sm:$0xff] %vm2967_vm5, %v2942_v50  ;;  %v1485_v3 = vld [vmem:[#allocation2 + $0xb8] sm:$0xf] }
 0x1a2   : > { %v1128_v49 = vrot.slane %v1127_v53, 4  ;;  %v1583_v46 = vsel %vm5146_vm6, %v4329_v60, %v1582_v6  ;;  %v1584_v48 = vrot.slane %v1582_v6, 4  ;;  %v1585_v52 = vrot.slane %v1459_v21, 5  ;;  %v1486_v5 = vld [vmem:[#allocation2 + $0xbc] sm:$0x1] }
 0x1a3   : > { %v1310_v55 = vrot.slane %v1309_v35, 4  ;;  %v1319_v23 = vor.u32 %v1318_v37, %v1314_v33  ;;  %v4337_v44 = vrot.slane %v1481_v40, 9  ;;  %v1638_v47 = vrot.slane %v1482_v26, 5  ;;  %v303_v9 = vld [vmem:[%s5082_s6 + $0x78] sm:$0xf] }
 0x1a4   : > { %v1133_v62 = vsel %vm5166_vm11, %v1128_v49, %v1132_v24  ;;  %v1586_v63 = vsel %vm5146_vm6, %v1584_v48, %v1585_v52  ;;  %v1641_v20 = vrot.slane %v1483_v28, 5  ;;  %v4330_v58 = vrot.slane %v1460_v2, 9  ;;  %v3485_v57 = vpop.permute.xlu1 %3484  ;;  %v304_v61 = vld [vmem:[%s5082_s6 + $0x7c] sm:$0xf]  ;;  %v1959_v26 = vld [vmem:[#allocation2 + $0x58] sm:$0xf] }
 0x1a5   : > { %v4314_v56 = vcombine.low %v1123_v30, %v1133_v62  ;;  %v1315_v0 = vsel %vm5166_vm11, %v1310_v55, %v1314_v33  ;;  %v1320_v7 = vrot.slane %v1319_v23, 4  ;;  %v4345_v8 = vcombine.low %v1583_v46, %v1586_v63  ;;  %3523 = vst.msk [vmem:[#allocation3 + $0x50] sm:$0xff] %vm3512_vm7, %v3485_v57  ;;  %v1958_v43 = vld [vmem:[#allocation2 + $0x54] sm:$0xf]  ;;  %v739_v28 = vld [vmem:[#allocation2 + $0xc0] sm:$0xf] }
 0x1a6   : > { %v1639_v12 = vsel %vm5146_vm6, %v4337_v44, %v1638_v47  ;;  %v1640_v59 = vrot.slane %v1638_v47, 4  ;;  %v1589_v14 = vrot.slane %v1461_v42, 5  ;;  %v1592_v13 = vrot.slane %v1462_v54, 5  ;;  %v1960_v2 = vld [vmem:[#allocation2 + $0x5c] sm:$0x1]  ;;  %v4689_v63 = vld [vmem:[#allocation2 + $0x54] sm:$0xff]  }
 0x1a7   : > { %1388 = vrot.lane.b32.xlu0 %v4314_v56, %s4870_s20  ;;  %v1325_v10 = vsel %vm5166_vm11, %v1320_v7, %v1324_v38  ;;  %v4338_v29 = vrot.slane %v1484_v41, 9  ;;  %v1645_v15 = vrot.slane %v1485_v3, 5  ;;  %v1648_v27 = vrot.slane %v1486_v5, 5  ;;  %v3471_v39 = vpop.permute.xlu0 %3470  ;;  %v1982_v53 = vld [vmem:[#allocation2 + $0xb4] sm:$0xf]  ;;  %s4877_s6 = smov [#allocation10]  }
 0x1a8   : > { %v4322_v11 = vcombine.low %v1315_v0, %v1325_v10  ;;  %v1642_v17 = vsel %vm5146_vm6, %v1640_v59, %v1641_v20  ;;  %v1590_v18 = vsel %vm5146_vm6, %v4330_v58, %v1589_v14  ;;  %v1591_v21 = vrot.slane %v1589_v14, 4  ;;  %3516 = vst.msk [vmem:[#allocation3 + $0x18] sm:$0xff] %vm3512_vm7, %v3471_v39  ;;  %v1983_v30 = vld [vmem:[#allocation2 + $0xb8] sm:$0xf]  ;;  %v1984_v55 = vld [vmem:[#allocation2 + $0xbc] sm:$0x1] }
 0x1a9   : > { %v4353_v24 = vcombine.low %v1639_v12, %v1642_v17  ;;  %v1646_v25 = vsel %vm5146_vm6, %v4338_v29, %v1645_v15  ;;  %v1647_v4 = vrot.slane %v1645_v15, 4  ;;  %v564_v40 = vshrl.u32 %v303_v9, 16  ;;  %v1961_v62 = vld [vmem:[#allocation2 + $0x60] sm:$0xf]  ;;  %v1963_v17 = vld [vmem:[#allocation2 + $0x68] sm:$0x1] }
 0x1aa   : > { %1404 = vrot.lane.b32.xlu1 %v4322_v11, %s4870_s20  ;;  %v1593_v22 = vsel %vm5146_vm6, %v1591_v21, %v1592_v13  ;;  %v567_v31 = vshll.u32 %v303_v9, 16  ;;  %v572_v16 = vshrl.u32 %v304_v61, 16  ;;  %v575_v32 = vshll.u32 %v304_v61, 16  ;;  %v1962_v13 = vld [vmem:[#allocation2 + $0x64] sm:$0xf]  ;;  %s4795_s20 = sshll.u32 %s4877_s6, 4  ;;  %s4796_s20 = int_to_ptr.vmem [resolvable:$false] %s4795_s20 }
 0x1ab   : > { %1710 = vrot.lane.b32.xlu0 %v4345_v8, %s4869_s18  ;;  %v4346_v33 = vcombine.low %v1590_v18, %v1593_v22  ;;  %v1649_v60 = vsel %vm5146_vm6, %v1647_v4, %v1648_v27  ;;  %v566_v6 = vrot.slane %v564_v40, 7  ;;  %v2133_v50 = vshrl.u32 %v1958_v43, 16  ;;  %v3790_v49 = vpop.permute.xlu0 %3789  ;;  %v4691_v10 = vld [vmem:[#allocation2 + $0x60] sm:$0xff]   ;;  %v743_v4 = vld [vmem:[#allocation2 + $0xc8] sm:$0x1]  ;;  %p4798_p7 = scmp.lt.s32.totalorder %s6254_s21, %s4796_s20 }
 0x1ac   : > { %v4354_v35 = vcombine.low %v1646_v25, %v1649_v60  ;;  %v5964_v37 = vrot.slane %v572_v16, 7  ;;  %v2136_v38 = vshll.u32 %v1958_v43, 16  ;;  %v2142_v42 = vshll.u32 %v1959_v26, 16  ;;  %v3487_v45 = vpop.permute.xlu1 %3486  ;;  %3836 = vst.msk [vmem:[#allocation3 + $0x10] sm:$0xff] %vm3833_vm8, %v3790_v49  ;;  %v2503_v60 = vld [vmem:[#allocation2 + $0x54] sm:$0xe] }
 0x1ad   : > { %v569_v46 = vor.u32 %v567_v31, %v566_v6  ;;  %v570_v48 = vrot.slane %v566_v6, 4  ;;  %v2135_v52 = vrot.slane %v2133_v50, 4  ;;  %v2146_v54 = vshrl.u32 %v1959_v26, 16  ;;  %3524 = vst.msk [vmem:[#allocation3 + $0x58] sm:$0xff] %vm3512_vm7, %v3487_v45  ;;  %v2527_v19 = vld [vmem:[#allocation2 + $0xb4] sm:$0xe] }
 0x1ae   : > { %1726 = vrot.lane.b32.xlu1 %v4353_v24, %s4869_s18  ;;  %v577_v23 = vor.u32 %v575_v32, %v5964_v37  ;;  %v579_v44 = vrot.slane %v5964_v37, 4  ;;  %v2138_v47 = vrot.slane %v2136_v38, 5  ;;  %v2144_v41 = vrot.slane %v2142_v42, 5  ;;  %v2504_v38 = vld [vmem:[#allocation2 + $0x58] sm:$0xf] }
 0x1af   : > { %1712 = vrot.lane.b32.xlu0 %v4346_v33, %s4869_s18  ;;  %v740_v20 = vsel %vm5160_vm10, %v569_v46, %v739_v28  ;;  %v2148_v58 = vrot.slane %v2146_v54, 4  ;;  %v2152_v3 = vshll.u32 %v1960_v2, 16  ;;  %v2325_v5 = vshrl.u32 %v1982_v53, 16 }
 0x1b0   : > { %v578_v57 = vsel %vm5180_vm12, %v570_v48, %v577_v23  ;;  %741 = vst [vmem:[#allocation2 + $0xc0] sm:$0xf] %v740_v20  ;;  %v2139_v56 = vor.u32 %v2138_v47, %v2135_v52  ;;  %v2328_v0 = vshll.u32 %v1982_v53, 16  ;;  %v2334_v7 = vshll.u32 %v1983_v30, 16  ;;  %v3806_v8 = vpop.permute.xlu1 %3805  ;;  %v2505_v48 = vld [vmem:[#allocation2 + $0x5c] sm:$0x1] }
 0x1b1   : > { %742 = vst.msk [vmem:[#allocation2 + $0xc4] sm:$0xf] %vm217_vm0, %v578_v57  ;;  %v2149_v9 = vor.u32 %v2148_v58, %v2144_v41  ;;  %v2154_v12 = vrot.slane %v2152_v3, 5  ;;  %v2327_v59 = vrot.slane %v2325_v5, 4  ;;  %v2338_v14 = vshrl.u32 %v1983_v30, 16 }
 0x1b2   : > { %3844 = vst.msk [vmem:[#allocation3 + $0x50] sm:$0xff] %vm3833_vm8, %v3806_v8  ;;  %1728 = vrot.lane.b32.xlu1 %v4354_v35, %s4869_s18  ;;  %v2140_v51 = vrot.slane %v2139_v56, 4  ;;  %v2330_v29 = vrot.slane %v2328_v0, 5  ;;  %v2336_v15 = vrot.slane %v2334_v7, 5  ;;  %v2344_v27 = vshll.u32 %v1984_v55, 16 }
 0x1b3   : > { %1887 = vrot.lane.b32.xlu0 %v4689_v63, %s4871_s7  ;;  %v2150_v61 = vrot.slane %v2149_v9, 4  ;;  %v2340_v11 = vrot.slane %v2338_v14, 4  ;;  %v2157_v18 = vshrl.u32 %v1961_v62, 16  ;;  %v2160_v21 = vshll.u32 %v1961_v62, 16  ;;  %v1383_v40 = vpop.permute.xlu0 %1382  ;;  %v3852_v26 = vld [vmem:[#allocation3 + $0x10] sm:$0xff] }
 0x1b4   : > { %v2145_v43 = vsel %vm5166_vm11, %v2140_v51, %v2144_v41  ;;  %v2331_v39 = vor.u32 %v2330_v29, %v2327_v59  ;;  %v2346_v24 = vrot.slane %v2344_v27, 5  ;;  %v2166_v25 = vshll.u32 %v1962_v13, 16  ;;  %1427 = vst.msk [vmem:[#allocation3 + $0x20] sm:$0xff] %vm1422_vm15, %v1383_v40  ;;  %4539 = vmatprep.mubr.msk.bf16.mxu0 %vm3893_vm9, %v3852_v26  ;;  %v2528_v58 = vld [vmem:[#allocation2 + $0xb8] sm:$0xf] }
 0x1b5   : > { %v2155_v22 = vsel %vm5166_vm11, %v2150_v61, %v2154_v12  ;;  %v2341_v31 = vor.u32 %v2340_v11, %v2336_v15  ;;  %v2159_v16 = vrot.slane %v2157_v18, 4  ;;  %v2162_v32 = vrot.slane %v2160_v21, 5  ;;  %v2506_v59 = vld [vmem:[#allocation2 + $0x60] sm:$0xe]  ;;  %v2508_v18 = vld [vmem:[#allocation2 + $0x68] sm:$0x1] }
 0x1b6   : > { %1903 = vrot.lane.b32.xlu1 %v4690_v34, %s4871_s7  ;;  %v4377_v28 = vcombine.low %v2145_v43, %v2155_v22  ;;  %v2332_v2 = vrot.slane %v2331_v39, 4  ;;  %v2168_v53 = vrot.slane %v2166_v25, 5  ;;  %v2170_v33 = vshrl.u32 %v1962_v13, 16  ;;  %v3002_v40 = vld [vmem:[#allocation2 + $0x60] sm:$0xf] }
 0x1b7   : > { %1889 = vrot.lane.b32.xlu0 %v4691_v10, %s4871_s7  ;;  %v2342_v6 = vrot.slane %v2341_v31, 4  ;;  %v2163_v50 = vor.u32 %v2162_v32, %v2159_v16  ;;  %v2176_v30 = vshll.u32 %v1963_v17, 16  ;;  %v744_v35 = vsel %vm5204_vm13, %v579_v44, %v743_v4  ;;  %v1985_v37 = vld [vmem:[#allocation2 + $0xc0] sm:$0xf]  ;;  %v1399_v52 = vpop.permute.xlu1 %1398  ;;  %v3792_v54 = vpop.permute.xlu0 %3791  ;;  %v2529_v10 = vld [vmem:[#allocation2 + $0xbc] sm:$0x1] }
 0x1b8   : > { %v4692_v42 = vld [vmem:[#allocation2 + $0xc0] sm:$0xff]   ;;  %v2337_v45 = vsel %vm5166_vm11, %v2332_v2, %v2336_v15  ;;  %v2172_v49 = vrot.slane %v2170_v33, 4  ;;  %745 = vst [vmem:[#allocation2 + $0xc8] sm:$0x1] %v744_v35  ;;  %v2349_v41 = vshrl.u32 %v1985_v37, 16  ;;  %1435 = vst.msk [vmem:[#allocation3 + $0x60] sm:$0xff] %vm1422_vm15, %v1399_v52 }
 0x1b9   : > { %v1986_v46 = vld [vmem:[#allocation2 + $0xc4] sm:$0xf]  ;;  %v2347_v55 = vsel %vm5166_vm11, %v2342_v6, %v2346_v24  ;;  %v2164_v23 = vrot.slane %v2163_v50, 4  ;;  %v2178_v47 = vrot.slane %v2176_v30, 5  ;;  %3837 = vst.msk [vmem:[#allocation3 + $0x18] sm:$0xff] %vm3833_vm8, %v3792_v54  ;;  %v2352_v63 = vshll.u32 %v1985_v37, 16 }
 0x1ba   : > { %1905 = vrot.lane.b32.xlu1 %v4692_v42, %s4871_s7  ;;  %v4385_v44 = vcombine.low %v2337_v45, %v2347_v55  ;;  %v2173_v62 = vor.u32 %v2172_v49, %v2168_v53  ;;  %v2358_v20 = vshll.u32 %v1986_v46, 16  ;;  %v2351_v5 = vrot.slane %v2349_v41, 4  ;;  %v3860_v0 = vld [vmem:[#allocation3 + $0x50] sm:$0xff]  ;;  %v2507_v17 = vld [vmem:[#allocation2 + $0x64] sm:$0xf]  ;;  %s4797_s7 = scalar_lea.vmem %s4796_s20, 8192 }
 0x1bb   : > { %2432 = vrot.lane.b32.xlu0 %v4377_v28, %s4873_s26  ;;  %v2169_v3 = vsel %vm5166_vm11, %v2164_v23, %v2168_v53  ;;  %v2362_v57 = vshrl.u32 %v1986_v46, 16  ;;  %v4393_v56 = vrot.slane %v2503_v60, 9  ;;  %v2354_v8 = vrot.slane %v2352_v63, 5  ;;  %v3808_v14 = vpop.permute.xlu1 %3807  ;;  %4555 = vmatprep.mubr.msk.bf16.mxu1 %vm3893_vm9, %v3860_v0  ;;  %v2530_v4 = vld [vmem:[#allocation2 + $0xc0] sm:$0xe]  ;;  %p4799_p9 = scmp.lt.s32.totalorder %s4797_s7, %s4791_s23 }
 0x1bc   : > { %v2174_v7 = vrot.slane %v2173_v62, 4  ;;  %v2360_v9 = vrot.slane %v2358_v20, 5  ;;  %v2625_v12 = vrot.slane %v2504_v38, 5  ;;  %v2628_v34 = vrot.slane %v2505_v48, 5  ;;  %3845 = vst.msk [vmem:[#allocation3 + $0x58] sm:$0xff] %vm3833_vm8, %v3808_v14 }
 0x1bd   : > { %v2364_v13 = vrot.slane %v2362_v57, 4  ;;  %v4401_v51 = vrot.slane %v2527_v19, 9  ;;  %v2681_v29 = vrot.slane %v2528_v58, 5  ;;  %v2355_v27 = vor.u32 %v2354_v8, %v2351_v5  ;;  %v2531_v32 = vld [vmem:[#allocation2 + $0xc4] sm:$0xf]  ;;  %p4800_p12 = por %p4799_p9, %p4798_p7 }
 0x1be   : > { %2448 = vrot.lane.b32.xlu1 %v4385_v44, %s4873_s26  ;;  %v2179_v15 = vsel %vm5166_vm11, %v2174_v7, %v2178_v47  ;;  %v2626_v61 = vsel %vm5146_vm6, %v4393_v56, %v2625_v12  ;;  %v2627_v11 = vrot.slane %v2625_v12, 4  ;;  %v2684_v16 = vrot.slane %v2529_v10, 5  ;;  %v3003_v42 = vld [vmem:[#allocation2 + $0x64] sm:$0xf]  ;;  %v3004_v47 = vld [vmem:[#allocation2 + $0x68] sm:$0x1] }
 0x1bf   : > { %v4378_v21 = vcombine.low %v2169_v3, %v2179_v15  ;;  %v1987_v43 = vld [vmem:[#allocation2 + $0xc8] sm:$0x1]  ;;  %v2365_v39 = vor.u32 %v2364_v13, %v2360_v9  ;;  %v6009_v24 = vsel %vm5146_vm6, %v4401_v51, %v2681_v29  ;;  %v2683_v25 = vrot.slane %v2681_v29, 4  ;;  %v1385_v28 = vpop.permute.xlu0 %1384  ;;  %v3026_v3 = vld [vmem:[#allocation2 + $0xc0] sm:$0xf]  ;;  %p4801_p1 = pnand %p4800_p12, %p4794_p3 }
 0x1c0   : > { %v2356_v26 = vrot.slane %v2355_v27, 4  ;;  %v2368_v22 = vshll.u32 %v1987_v43, 16  ;;  %v2629_v31 = vsel %vm5146_vm6, %v2627_v11, %v2628_v34  ;;  %v3853_v2 = vld [vmem:[#allocation3 + $0x18] sm:$0xff]  ;;  %v4394_v60 = vrot.slane %v2506_v59, 9  ;;  %v2532_v50 = vld [vmem:[#allocation2 + $0xc8] sm:$0x1] }
 0x1c1   : > { %2434 = vrot.lane.b32.xlu0 %v4378_v21, %s4873_s26  ;;  %v2366_v53 = vrot.slane %v2365_v39, 4  ;;  %v4409_v33 = vcombine.low %v2626_v61, %v2629_v31  ;;  %v2632_v6 = vrot.slane %v2507_v17, 5  ;;  %1428 = vst.msk [vmem:[#allocation3 + $0x28] sm:$0xff] %vm1422_vm15, %v1385_v28  ;;  %4540 = vmatmul.mubr.msk.bf16.gmra.mrb[4].mxu0 %vm3893_vm9, %v3853_v2  ;;  %v2685_v37 = vsel %vm5146_vm6, %v2683_v25, %v2684_v16  ;;  %v3027_v5 = vld [vmem:[#allocation2 + $0xc4] sm:$0xf] }
 0x1c2   : > { %v2361_v30 = vsel %vm5166_vm11, %v2356_v26, %v2360_v9  ;;  %v2370_v35 = vrot.slane %v2368_v22, 5  ;;  %v2635_v38 = vrot.slane %v2508_v18, 5  ;;  %v4417_v45 = vcombine.low %v6009_v24, %v2685_v37  ;;  %v1401_v52 = vpop.permute.xlu1 %1400  ;;  %v3005_v14 = vld [vmem:[#allocation2 + $0x6c] sm:$0xf]  ;;  %v3028_v10 = vld [vmem:[#allocation2 + $0xc8] sm:$0x1] }
 0x1c3   : > { %v2633_v49 = vsel %vm5146_vm6, %v4394_v60, %v2632_v6  ;;  %v2634_v46 = vrot.slane %v2632_v6, 4  ;;  %v4402_v48 = vrot.slane %v2530_v4, 9  ;;  %v2688_v55 = vrot.slane %v2531_v32, 5  ;;  %1436 = vst.msk [vmem:[#allocation3 + $0x68] sm:$0xff] %vm1422_vm15, %v1401_v52  ;;  %v1707_v19 = vpop.permute.xlu0 %1706  ;;  %v3861_v44 = vld [vmem:[#allocation3 + $0x58] sm:$0xff]  ;;  %v4693_v11 = vld [vmem:[#allocation2 + $0x60] sm:$0xff]  }
 0x1c4   : > { %v2371_v54 = vsel %vm5166_vm11, %v2366_v53, %v2370_v35  ;;  %v2691_v23 = vrot.slane %v2532_v50, 5  ;;  %v3177_v41 = vshrl.u32 %v3002_v40, 16  ;;  %v3180_v20 = vshll.u32 %v3002_v40, 16  ;;  %4556 = vmatmul.mubr.msk.bf16.gmra.mrb[4].mxu1 %vm3893_vm9, %v3861_v44  ;;  %v3006_v43 = vld [vmem:[#allocation2 + $0x70] sm:$0xf] }
 0x1c5   : > { %v4386_v62 = vcombine.low %v2361_v30, %v2371_v54  ;;  %2753 = vrot.lane.b32.xlu0 %v4409_v33, %s4872_s8  ;;  %v2636_v63 = vsel %vm5146_vm6, %v2634_v46, %v2635_v38  ;;  %v3186_v58 = vshll.u32 %v3003_v42, 16  ;;  %vm6331_vm0 = vcmask 97344   ;;  %v3007_v31 = vld [vmem:[#allocation2 + $0x74] sm:$0x1]  ;;  %v3029_v60 = vld [vmem:[#allocation2 + $0xcc] sm:$0xf] }
 0x1c6   : > { %1751 = vst.msk [vmem:[#allocation3 + $0x20] sm:$0xff] %vm6331_vm0, %v1707_v19  ;;  %v4410_v57 = vcombine.low %v2633_v49, %v2636_v63  ;;  %v2689_v56 = vsel %vm5146_vm6, %v4402_v48, %v2688_v55  ;;  %v2690_v0 = vrot.slane %v2688_v55, 4  ;;  %v3179_v7 = vrot.slane %v3177_v41, 4  ;;  %v1723_v13 = vpop.permute.xlu1 %1722  ;;  %vm6332_vm10 = vmmov %vm6331_vm0  ;;  %v4695_v50 = vld [vmem:[#allocation2 + $0x6c] sm:$0xff]   ;;  %v4694_v48 = vld [vmem:[#allocation2 + $0xc0] sm:$0xff]  }
 0x1c7   : > { %2450 = vrot.lane.b32.xlu1 %v4386_v62, %s4873_s26  ;;  %v3182_v8 = vrot.slane %v3180_v20, 5  ;;  %v3188_v9 = vrot.slane %v3186_v58, 5  ;;  %v3190_v12 = vshrl.u32 %v3003_v42, 16  ;;  %v3196_v59 = vshll.u32 %v3004_v47, 16  ;;  %1759 = vst.msk [vmem:[#allocation3 + $0x60] sm:$0xff] %vm6332_vm10, %v1723_v13  ;;  %v1709_v27 = vpop.permute.xlu0 %1708  ;;  %vm6333_vm12 = vmmov %vm6331_vm0 }
 0x1c8   : > { %v2692_v34 = vsel %vm5146_vm6, %v2690_v0, %v2691_v23  ;;  %v3369_v51 = vshrl.u32 %v3026_v3, 16  ;;  %v3372_v29 = vshll.u32 %v3026_v3, 16  ;;  %v3378_v15 = vshll.u32 %v3027_v5, 16  ;;  %1752 = vst.msk [vmem:[#allocation3 + $0x28] sm:$0xff] %vm6333_vm12, %v1709_v27  ;;  %vm6334_vm13 = vmmov %vm6331_vm0  ;;  %v3030_v23 = vld [vmem:[#allocation2 + $0xd0] sm:$0xf] }
 0x1c9   : > { %2755 = vrot.lane.b32.xlu0 %v4410_v57, %s4872_s8  ;;  %v4418_v61 = vcombine.low %v2689_v56, %v2692_v34  ;;  %v3183_v17 = vor.u32 %v3182_v8, %v3179_v7  ;;  %v3192_v18 = vrot.slane %v3190_v12, 4  ;;  %v3198_v21 = vrot.slane %v3196_v59, 5  ;;  %v3031_v20 = vld [vmem:[#allocation2 + $0xd4] sm:$0x1]  ;;  %v3547_v58 = vld [vmem:[#allocation2 + $0x60] sm:$0xe]  ;;  %vm6337_vm14 = vmmov %vm6331_vm0 }
 0x1ca   : > { %v3371_v39 = vrot.slane %v3369_v51, 4  ;;  %v3374_v24 = vrot.slane %v3372_v29, 5  ;;  %v3380_v25 = vrot.slane %v3378_v15, 5  ;;  %v3382_v4 = vshrl.u32 %v3027_v5, 16  ;;  %v1725_v32 = vpop.permute.xlu1 %1724  ;;  %v3548_v0 = vld [vmem:[#allocation2 + $0x64] sm:$0xf]  ;;  %vm6338_vm1 = vmmov %vm6331_vm0 }
 0x1cb   : > { %2769 = vrot.lane.b32.xlu1 %v4417_v45, %s4872_s8  ;;  %v3184_v40 = vrot.slane %v3183_v17, 4  ;;  %v3193_v26 = vor.u32 %v3192_v18, %v3188_v9  ;;  %v3388_v22 = vshll.u32 %v3028_v10, 16  ;;  %v3201_v16 = vshrl.u32 %v3005_v14, 16  ;;  %1760 = vst.msk [vmem:[#allocation3 + $0x68] sm:$0xff] %vm6334_vm13, %v1725_v32  ;;  %v1884_v6 = vpop.permute.xlu0 %1883  ;;  %v4697_v7 = vld [vmem:[#allocation2 + $0xcc] sm:$0xff]  }
 0x1cc   : > { %v3375_v28 = vor.u32 %v3374_v24, %v3371_v39  ;;  %v3384_v2 = vrot.slane %v3382_v4, 4  ;;  %v3204_v53 = vshll.u32 %v3005_v14, 16  ;;  %v3210_v33 = vshll.u32 %v3006_v43, 16  ;;  %1928 = vst.msk [vmem:[#allocation3 + $0x20] sm:$0xff] %vm1923_vm2, %v1884_v6  ;;  %v3549_v14 = vld [vmem:[#allocation2 + $0x68] sm:$0x1] }
 0x1cd   : > { %2931 = vrot.lane.b32.xlu0 %v4693_v11, %s4874_s28  ;;  %v3189_v30 = vsel %vm5166_vm11, %v3184_v40, %v3188_v9  ;;  %v3194_v35 = vrot.slane %v3193_v26, 4  ;;  %v3390_v37 = vrot.slane %v3388_v22, 5  ;;  %v3203_v38 = vrot.slane %v3201_v16, 4  ;;  %v3571_v29 = vld [vmem:[#allocation2 + $0xc0] sm:$0xe] }
 0x1ce   : > { %v3376_v42 = vrot.slane %v3375_v28, 4  ;;  %v3385_v45 = vor.u32 %v3384_v2, %v3380_v25  ;;  %v3206_v49 = vrot.slane %v3204_v53, 5  ;;  %v3212_v46 = vrot.slane %v3210_v33, 5  ;;  %v1900_v41 = vpop.permute.xlu1 %1899  ;;  %v3572_v15 = vld [vmem:[#allocation2 + $0xc4] sm:$0xf] }
 0x1cf   : > { %2771 = vrot.lane.b32.xlu1 %v4418_v61, %s4872_s8  ;;  %v3199_v52 = vsel %vm5166_vm11, %v3194_v35, %v3198_v21  ;;  %v3214_v54 = vshrl.u32 %v3006_v43, 16  ;;  %v3220_v55 = vshll.u32 %v3007_v31, 16  ;;  %v3393_v47 = vshrl.u32 %v3029_v60, 16  ;;  %1936 = vst.msk [vmem:[#allocation3 + $0x60] sm:$0xff] %vm1923_vm2, %v1900_v41  ;;  %v3573_v26 = vld [vmem:[#allocation2 + $0xc8] sm:$0x1] }
 0x1d0   : > { %v4441_v19 = vcombine.low %v3189_v30, %v3199_v52  ;;  %v3381_v44 = vsel %vm5166_vm11, %v3376_v42, %v3380_v25  ;;  %v3386_v62 = vrot.slane %v3385_v45, 4  ;;  %v3207_v63 = vor.u32 %v3206_v49, %v3203_v38  ;;  %v3550_v25 = vld [vmem:[#allocation2 + $0x6c] sm:$0xe]  ;;  %v3551_v53 = vld [vmem:[#allocation2 + $0x70] sm:$0xf] }
 0x1d1   : > { %2933 = vrot.lane.b32.xlu0 %v4695_v50, %s4874_s28  ;;  %v3216_v3 = vrot.slane %v3214_v54, 4  ;;  %v3222_v5 = vrot.slane %v3220_v55, 5  ;;  %v3395_v57 = vrot.slane %v3393_v47, 4  ;;  %v3396_v56 = vshll.u32 %v3029_v60, 16  ;;  %v1886_v27 = vpop.permute.xlu0 %1885  ;;  %v3552_v33 = vld [vmem:[#allocation2 + $0x74] sm:$0x1] }
 0x1d2   : > { %v3391_v8 = vsel %vm5166_vm11, %v3386_v62, %v3390_v37  ;;  %v3208_v9 = vrot.slane %v3207_v63, 4  ;;  %v3402_v12 = vshll.u32 %v3030_v23, 16  ;;  %v3406_v59 = vshrl.u32 %v3030_v23, 16  ;;  %1929 = vst.msk [vmem:[#allocation3 + $0x28] sm:$0xff] %vm1923_vm2, %v1886_v27  ;;  %v3575_v35 = vld [vmem:[#allocation2 + $0xd0] sm:$0xf] }
 0x1d3   : > { %2947 = vrot.lane.b32.xlu1 %v4694_v48, %s4874_s28  ;;  %v4449_v13 = vcombine.low %v3381_v44, %v3391_v8  ;;  %v3217_v34 = vor.u32 %v3216_v3, %v3212_v46  ;;  %v3398_v10 = vrot.slane %v3396_v56, 5  ;;  %v3412_v51 = vshll.u32 %v3031_v20, 16  ;;  %v3576_v48 = vld [vmem:[#allocation2 + $0xd4] sm:$0x1] }
 0x1d4   : > { %v3213_v61 = vsel %vm5166_vm11, %v3208_v9, %v3212_v46  ;;  %v3404_v11 = vrot.slane %v3402_v12, 5  ;;  %v3408_v17 = vrot.slane %v3406_v59, 4  ;;  %v4457_v18 = vrot.slane %v3547_v58, 9  ;;  %v3574_v46 = vld [vmem:[#allocation2 + $0xcc] sm:$0xe] }
 0x1d5   : > { %3476 = vrot.lane.b32.xlu0 %v4441_v19, %s4875_s22  ;;  %v3218_v21 = vrot.slane %v3217_v34, 4  ;;  %v3399_v43 = vor.u32 %v3398_v10, %v3395_v57  ;;  %v3414_v39 = vrot.slane %v3412_v51, 5  ;;  %v3669_v24 = vrot.slane %v3548_v0, 5  ;;  %v2429_v60 = vpop.permute.xlu0 %2428 }
 0x1d6   : > { %v3409_v4 = vor.u32 %v3408_v17, %v3404_v11  ;;  %v3672_v40 = vrot.slane %v3549_v14, 5  ;;  %v4465_v22 = vrot.slane %v3571_v29, 9  ;;  %v3725_v31 = vrot.slane %v3572_v15, 5  ;;  %2473 = vst.msk [vmem:[#allocation3 + $0x20] sm:$0xff] %vm2468_vm3, %v2429_v60 }
 0x1d7   : > { %2949 = vrot.lane.b32.xlu1 %v4697_v7, %s4874_s28  ;;  %v3223_v16 = vsel %vm5166_vm11, %v3218_v21, %v3222_v5  ;;  %v3400_v32 = vrot.slane %v3399_v43, 4  ;;  %v3670_v28 = vsel %vm5146_vm6, %v4457_v18, %v3669_v24  ;;  %v3671_v2 = vrot.slane %v3669_v24, 4  ;;  %v1902_v37 = vpop.permute.xlu1 %1901 }
 0x1d8   : > { %v4442_v6 = vcombine.low %v3213_v61, %v3223_v16  ;;  %v3410_v50 = vrot.slane %v3409_v4, 4  ;;  %v3727_v30 = vrot.slane %v3725_v31, 4  ;;  %v3728_v45 = vrot.slane %v3573_v26, 5  ;;  %1937 = vst.msk [vmem:[#allocation3 + $0x68] sm:$0xff] %vm1923_vm2, %v1902_v37 }
 0x1d9   : > { %v3405_v38 = vsel %vm5166_vm11, %v3400_v32, %v3404_v11  ;;  %v3673_v42 = vsel %vm5146_vm6, %v3671_v2, %v3672_v40  ;;  %v4458_v49 = vrot.slane %v3550_v25, 9  ;;  %v3676_v55 = vrot.slane %v3551_v53, 5 }
 0x1da   : > { %3478 = vrot.lane.b32.xlu0 %v4442_v6, %s4875_s22  ;;  %v3415_v52 = vsel %vm5166_vm11, %v3410_v50, %v3414_v39  ;;  %v4473_v54 = vcombine.low %v3670_v28, %v3673_v42  ;;  %v3679_v23 = vrot.slane %v3552_v33, 5  ;;  %v3726_v41 = vsel %vm5146_vm6, %v4465_v22, %v3725_v31  ;;  %vm6336_vm11 = vmmov %vm6331_vm0 }
 0x1db   : > { %3492 = vrot.lane.b32.xlu1 %v4449_v13, %s4875_s22  ;;  %v4450_v47 = vcombine.low %v3405_v38, %v3415_v52  ;;  %v3729_v19 = vsel %vm5146_vm6, %v3727_v30, %v3728_v45  ;;  %v3732_v44 = vrot.slane %v3575_v35, 5  ;;  %v3677_v62 = vsel %vm5146_vm6, %v4458_v49, %v3676_v55  ;;  %v2445_v58 = vpop.permute.xlu1 %2444 }
 0x1dc   : > { %v3678_v63 = vrot.slane %v3676_v55, 4  ;;  %v4466_v20 = vrot.slane %v3574_v46, 9  ;;  %v3735_v36 = vrot.slane %v3576_v48, 5  ;;  %2481 = vst.msk [vmem:[#allocation3 + $0x60] sm:$0xff] %vm2468_vm3, %v2445_v58  ;;  %v4481_v57 = vcombine.low %v3726_v41, %v3729_v19 }
 0x1dd   : > { %v3734_v3 = vrot.slane %v3732_v44, 4 }
 0x1de   : > { %3797 = vrot.lane.b32.xlu0 %v4473_v54, %s4876_s29  ;;  %v3680_v5 = vsel %vm5146_vm6, %v3678_v63, %v3679_v23  ;;  %v3733_v0 = vsel %vm5146_vm6, %v4466_v20, %v3732_v44  ;;  %v6144_v63 = vld [vmem:[#allocation9] ss:$0 sm:$0xff] }
 0x1df   : > { %3494 = vrot.lane.b32.xlu1 %v4450_v47, %s4875_s22  ;;  %v4474_v56 = vcombine.low %v3677_v62, %v3680_v5  ;;  %v3736_v7 = vsel %vm5146_vm6, %v3734_v3, %v3735_v36  ;;  %v2431_v8 = vpop.permute.xlu0 %2430  ;;  %vm6335_vm6 = vmmov %vm6331_vm0 }
 0x1e0   : > { %2474 = vst.msk [vmem:[#allocation3 + $0x28] sm:$0xff] %vm2468_vm3, %v2431_v8  ;;  %v4482_v9 = vcombine.low %v3733_v0, %v3736_v7 }
 0x1e2   : > { %3799 = vrot.lane.b32.xlu0 %v4474_v56, %s4876_s29 }
 0x1e3   : > { %3813 = vrot.lane.b32.xlu1 %v4481_v57, %s4876_s29  ;;  %v2750_v59 = vpop.permute.xlu0 %2749 }
 0x1e4   : > { %v2447_v12 = vpop.permute.xlu1 %2446  ;;  %2794 = vst.msk [vmem:[#allocation3 + $0x20] sm:$0xff] %vm2789_vm4, %v2750_v59 }
 0x1e5   : > { %2482 = vst.msk [vmem:[#allocation3 + $0x68] sm:$0xff] %vm2468_vm3, %v2447_v12 }
 0x1e7   : > { %3815 = vrot.lane.b32.xlu1 %v4482_v9, %s4876_s29  ;;  %v2752_v13 = vpop.permute.xlu0 %2751 }
 0x1e8   : > { %v2766_v14 = vpop.permute.xlu1 %2765  ;;  %2795 = vst.msk [vmem:[#allocation3 + $0x28] sm:$0xff] %vm2789_vm4, %v2752_v13 }
 0x1e9   : > { %2802 = vst.msk [vmem:[#allocation3 + $0x60] sm:$0xff] %vm2789_vm4, %v2766_v14 }
 0x1eb   : > { %v2928_v34 = vpop.permute.xlu0 %2927 }
 0x1ec   : > { %v2768_v1 = vpop.permute.xlu1 %2767  ;;  %2972 = vst.msk [vmem:[#allocation3 + $0x20] sm:$0xff] %vm2967_vm5, %v2928_v34 }
 0x1ed   : > { %2803 = vst.msk [vmem:[#allocation3 + $0x68] sm:$0xff] %vm2789_vm4, %v2768_v1 }
 0x1f0   : > { %v2944_v10 = vpop.permute.xlu1 %2943 }
 0x1f1   : > { %2980 = vst.msk [vmem:[#allocation3 + $0x60] sm:$0xff] %vm2967_vm5, %v2944_v10 }
 0x1f4   : > { %v2930_v51 = vpop.permute.xlu0 %2929 }
 0x1f5   : > { %2973 = vst.msk [vmem:[#allocation3 + $0x28] sm:$0xff] %vm2967_vm5, %v2930_v51 }
 0x1f7   : > { %v2946_v29 = vpop.permute.xlu1 %2945 }
 0x1f8   : > { %2981 = vst.msk [vmem:[#allocation3 + $0x68] sm:$0xff] %vm2967_vm5, %v2946_v29  ;;  %v3473_v15 = vpop.permute.xlu0 %3472 }
 0x1f9   : > { %3517 = vst.msk [vmem:[#allocation3 + $0x20] sm:$0xff] %vm3512_vm7, %v3473_v15 }
 0x1fb   : > { %v3489_v27 = vpop.permute.xlu1 %3488 }
 0x1fc   : > { %3525 = vst.msk [vmem:[#allocation3 + $0x60] sm:$0xff] %vm3512_vm7, %v3489_v27 }
 0x200   : > { %v3475_v61 = vpop.permute.xlu0 %3474 }
 0x201   : > { %3518 = vst.msk [vmem:[#allocation3 + $0x28] sm:$0xff] %vm3512_vm7, %v3475_v61 }
 0x204   : > { %v3491_v11 = vpop.permute.xlu1 %3490  ;;  %v3794_v17 = vpop.permute.xlu0 %3793 }
 0x205   : > { %3526 = vst.msk [vmem:[#allocation3 + $0x68] sm:$0xff] %vm3512_vm7, %v3491_v11 }
 0x206   : > { %3838 = vst.msk [vmem:[#allocation3 + $0x20] sm:$0xff] %vm3833_vm8, %v3794_v17 }
 0x208   : > { %v3810_v18 = vpop.permute.xlu1 %3809 }
 0x209   : > { %3846 = vst.msk [vmem:[#allocation3 + $0x60] sm:$0xff] %vm3833_vm8, %v3810_v18 }
 0x20c   : > { %v1387_v21 = vpop.permute.xlu0 %1386 }
 0x20d   : > { %v3854_v43 = vld [vmem:[#allocation3 + $0x20] sm:$0xff]  ;;  %1429 = vst.msk [vmem:[#allocation3 + $0x30] sm:$0xff] %vm1422_vm15, %v1387_v21 }
 0x20e   : > { %4543 = vmatprep.mubr.msk.bf16.mxu0 %vm3893_vm9, %v3854_v43 }
 0x20f   : > { %v1403_v39 = vpop.permute.xlu1 %1402 }
 0x210   : > { %v3862_v24 = vld [vmem:[#allocation3 + $0x60] sm:$0xff]  ;;  %1437 = vst.msk [vmem:[#allocation3 + $0x70] sm:$0xff] %vm1422_vm15, %v1403_v39  ;;  %v3796_v25 = vpop.permute.xlu0 %3795 }
 0x211   : > { %4559 = vmatprep.mubr.msk.bf16.mxu1 %vm3893_vm9, %v3862_v24  ;;  %3839 = vst.msk [vmem:[#allocation3 + $0x28] sm:$0xff] %vm3833_vm8, %v3796_v25 }
 0x213   : > { %v3812_v4 = vpop.permute.xlu1 %3811 }
 0x214   : > { %3847 = vst.msk [vmem:[#allocation3 + $0x68] sm:$0xff] %vm3833_vm8, %v3812_v4 }
 0x218   : > { %v3855_v40 = vld [vmem:[#allocation3 + $0x28] sm:$0xff] }
 0x219   : > { %v1389_v26 = vpop.permute.xlu0 %1388  ;;  %4544 = vmatmul.mubr.msk.bf16.gmra.mrb[8].mxu0 %vm3893_vm9, %v3855_v40 }
 0x21a   : > { %1430 = vst.msk [vmem:[#allocation3 + $0x38] sm:$0xff] %vm1422_vm15, %v1389_v26 }
 0x21b   : > { %v3863_v22 = vld [vmem:[#allocation3 + $0x68] sm:$0xff] }
 0x21c   : > { %v1405_v31 = vpop.permute.xlu1 %1404  ;;  %4560 = vmatmul.mubr.msk.bf16.gmra.mrb[8].mxu1 %vm3893_vm9, %v3863_v22 }
 0x21d   : > { %1438 = vst.msk [vmem:[#allocation3 + $0x78] sm:$0xff] %vm1422_vm15, %v1405_v31  ;;  %v1711_v16 = vpop.permute.xlu0 %1710  ;;  %vm4139_vm15 = vcmask 64512  }
 0x21e   : > { %1753 = vst.msk [vmem:[#allocation3 + $0x30] sm:$0xff] %vm6335_vm6, %v1711_v16 }
 0x220   : > { %v1727_v32 = vpop.permute.xlu1 %1726 }
 0x221   : > { %1761 = vst.msk [vmem:[#allocation3 + $0x70] sm:$0xff] %vm6336_vm11, %v1727_v32  ;;  %v1713_v28 = vpop.permute.xlu0 %1712 }
 0x222   : > { %1754 = vst.msk [vmem:[#allocation3 + $0x38] sm:$0xff] %vm6337_vm14, %v1713_v28 }
 0x224   : > { %v1729_v2 = vpop.permute.xlu1 %1728 }
 0x225   : > { %1762 = vst.msk [vmem:[#allocation3 + $0x78] sm:$0xff] %vm6338_vm1, %v1729_v2  ;;  %v1888_v53 = vpop.permute.xlu0 %1887 }
 0x226   : > { %1930 = vst.msk [vmem:[#allocation3 + $0x30] sm:$0xff] %vm1923_vm2, %v1888_v53 }
 0x228   : > { %v1904_v33 = vpop.permute.xlu1 %1903 }
 0x229   : > { %1938 = vst.msk [vmem:[#allocation3 + $0x70] sm:$0xff] %vm1923_vm2, %v1904_v33  ;;  %v1890_v60 = vpop.permute.xlu0 %1889 }
 0x22a   : > { %1931 = vst.msk [vmem:[#allocation3 + $0x38] sm:$0xff] %vm1923_vm2, %v1890_v60 }
 0x22c   : > { %v1906_v6 = vpop.permute.xlu1 %1905 }
 0x22d   : > { %1939 = vst.msk [vmem:[#allocation3 + $0x78] sm:$0xff] %vm1923_vm2, %v1906_v6  ;;  %v2433_v50 = vpop.permute.xlu0 %2432 }
 0x22e   : > { %2475 = vst.msk [vmem:[#allocation3 + $0x30] sm:$0xff] %vm2468_vm3, %v2433_v50 }
 0x230   : > { %v2449_v30 = vpop.permute.xlu1 %2448 }
 0x231   : > { %2483 = vst.msk [vmem:[#allocation3 + $0x70] sm:$0xff] %vm2468_vm3, %v2449_v30 }
 0x233   : > { %v2435_v35 = vpop.permute.xlu0 %2434 }
 0x234   : > { %2476 = vst.msk [vmem:[#allocation3 + $0x38] sm:$0xff] %vm2468_vm3, %v2435_v35 }
 0x237   : > { %v2754_v37 = vpop.permute.xlu0 %2753 }
 0x238   : > { %2796 = vst.msk [vmem:[#allocation3 + $0x30] sm:$0xff] %vm2789_vm4, %v2754_v37 }
 0x239   : > { %v2451_v38 = vpop.permute.xlu1 %2450 }
 0x23a   : > { %2484 = vst.msk [vmem:[#allocation3 + $0x78] sm:$0xff] %vm2468_vm3, %v2451_v38 }
 0x23b   : > { %v2756_v42 = vpop.permute.xlu0 %2755 }
 0x23c   : > { %2797 = vst.msk [vmem:[#allocation3 + $0x38] sm:$0xff] %vm2789_vm4, %v2756_v42 }
 0x23d   : > { %v2770_v45 = vpop.permute.xlu1 %2769 }
 0x23e   : > { %2804 = vst.msk [vmem:[#allocation3 + $0x70] sm:$0xff] %vm2789_vm4, %v2770_v45 }
 0x23f   : > { %v2932_v49 = vpop.permute.xlu0 %2931 }
 0x240   : > { %2974 = vst.msk [vmem:[#allocation3 + $0x30] sm:$0xff] %vm2967_vm5, %v2932_v49 }
 0x241   : > { %v2772_v46 = vpop.permute.xlu1 %2771 }
 0x242   : > { %2805 = vst.msk [vmem:[#allocation3 + $0x78] sm:$0xff] %vm2789_vm4, %v2772_v46 }
 0x243   : > { %v2934_v48 = vpop.permute.xlu0 %2933 }
 0x244   : > { %2975 = vst.msk [vmem:[#allocation3 + $0x38] sm:$0xff] %vm2967_vm5, %v2934_v48 }
 0x245   : > { %v2948_v52 = vpop.permute.xlu1 %2947 }
 0x246   : > { %2982 = vst.msk [vmem:[#allocation3 + $0x70] sm:$0xff] %vm2967_vm5, %v2948_v52 }
 0x247   : > { %v3477_v54 = vpop.permute.xlu0 %3476 }
 0x248   : > { %3519 = vst.msk [vmem:[#allocation3 + $0x30] sm:$0xff] %vm3512_vm7, %v3477_v54 }
 0x249   : > { %v2950_v55 = vpop.permute.xlu1 %2949 }
 0x24a   : > { %2983 = vst.msk [vmem:[#allocation3 + $0x78] sm:$0xff] %vm2967_vm5, %v2950_v55 }
 0x24c   : > { %v3479_v23 = vpop.permute.xlu0 %3478 }
 0x24d   : > { %v3493_v47 = vpop.permute.xlu1 %3492  ;;  %3520 = vst.msk [vmem:[#allocation3 + $0x38] sm:$0xff] %vm3512_vm7, %v3479_v23 }
 0x24e   : > { %3527 = vst.msk [vmem:[#allocation3 + $0x70] sm:$0xff] %vm3512_vm7, %v3493_v47 }
 0x250   : > { %v3798_v41 = vpop.permute.xlu0 %3797 }
 0x251   : > { %v3495_v19 = vpop.permute.xlu1 %3494  ;;  %3840 = vst.msk [vmem:[#allocation3 + $0x30] sm:$0xff] %vm3833_vm8, %v3798_v41 }
 0x252   : > { %3528 = vst.msk [vmem:[#allocation3 + $0x78] sm:$0xff] %vm3512_vm7, %v3495_v19 }
 0x254   : > { %v3800_v44 = vpop.permute.xlu0 %3799 }
 0x255   : > { %v3814_v62 = vpop.permute.xlu1 %3813  ;;  %3841 = vst.msk [vmem:[#allocation3 + $0x38] sm:$0xff] %vm3833_vm8, %v3800_v44 }
 0x256   : > { %3848 = vst.msk [vmem:[#allocation3 + $0x70] sm:$0xff] %vm3833_vm8, %v3814_v62 }
 0x257   : > { %v4537_v20 = vpop.f32.mrb[0].mxu0  ;;  %v4553_v36 = vpop.f32.mrb[0].mxu1 }
 0x258   : > { %v3856_v58 = vld [vmem:[#allocation3 + $0x30] sm:$0xff]  ;;  %v3989_v3 = vadd.f32 %v4537_v20, %v6144_v63  ;;  %v3980_v5 = vpop.f32.mrb[1].mxu0  ;;  %v4053_v57 = vadd.f32 %v4553_v36, %v6144_v63  ;;  %v4044_v56 = vpop.f32.mrb[1].mxu1 }
 0x259   : > { %v3816_v0 = vpop.permute.xlu1 %3815  ;;  %4547 = vmatprep.mubr.msk.bf16.mxu0 %vm3893_vm9, %v3856_v58  ;;  %v3981_v7 = vadd.f32 %v6144_v63, %v3980_v5  ;;  %v4538_v8 = vpop.f32.mrb[2].mxu0  ;;  %v4045_v9 = vadd.f32 %v6144_v63, %v4044_v56 }
 0x25a   : > { %3849 = vst.msk [vmem:[#allocation3 + $0x78] sm:$0xff] %vm3833_vm8, %v3816_v0  ;;  %v4109_v12 = vmax.f32 %v3989_v3, 0.0  ;;  %v3992_v59 = vadd.f32 %v4538_v8, %v6144_v63  ;;  %v3983_v14 = vpop.f32.mrb[3].mxu0  ;;  %v4125_v13 = vmax.f32 %v4053_v57, 0.0  ;;  %v4554_v1 = vpop.f32.mrb[2].mxu1 }
 0x25b   : > { %v4107_v34 = vmax.f32 %v3981_v7, 0.0  ;;  %v3984_v10 = vadd.f32 %v6144_v63, %v3983_v14  ;;  %v4123_v51 = vmax.f32 %v4045_v9, 0.0  ;;  %v4056_v29 = vadd.f32 %v4554_v1, %v6144_v63  ;;  %v4047_v15 = vpop.f32.mrb[3].mxu1 }
 0x25c   : > { %v3857_v27 = vld [vmem:[#allocation3 + $0x38] sm:$0xff]  ;;  %4142 = vst.msk [vmem:[%s6157_s25 + $0x10] sm:$0xff] %vm4139_vm15, %v4109_v12  ;;  %v4110_v61 = vmax.f32 %v3992_v59, 0.0  ;;  %4158 = vst.msk [vmem:[%s6157_s25 + $0x90] sm:$0xff] %vm4139_vm15, %v4125_v13  ;;  %v4048_v11 = vadd.f32 %v6144_v63, %v4047_v15 }
 0x25d   : > { %v3864_v17 = vld [vmem:[#allocation3 + $0x70] sm:$0xff]  ;;  %4548 = vmatmul.mubr.msk.bf16.gmra.mrb[12].mxu0 %vm3893_vm9, %v3857_v27  ;;  %4140 = vst.msk [vmem:[%s6157_s25] sm:$0xff] %vm4139_vm15, %v4107_v34  ;;  %v4108_v18 = vmax.f32 %v3984_v10, 0.0  ;;  %4156 = vst.msk [vmem:[%s6157_s25 + $0x80] sm:$0xff] %vm4139_vm15, %v4123_v51  ;;  %v4126_v21 = vmax.f32 %v4056_v29, 0.0 }
 0x25e   : > { %4563 = vmatprep.mubr.msk.bf16.mxu1 %vm3893_vm9, %v3864_v17  ;;  %4143 = vst.msk [vmem:[%s6157_s25 + $0x18] sm:$0xff] %vm4139_vm15, %v4110_v61  ;;  %v4124_v43 = vmax.f32 %v4048_v11, 0.0 }
 0x25f   : > { %4141 = vst.msk [vmem:[%s6157_s25 + $0x8] sm:$0xff] %vm4139_vm15, %v4108_v18  ;;  %4159 = vst.msk [vmem:[%s6157_s25 + $0x98] sm:$0xff] %vm4139_vm15, %v4126_v21 }
 0x260   : > { %4157 = vst.msk [vmem:[%s6157_s25 + $0x88] sm:$0xff] %vm4139_vm15, %v4124_v43 }
 0x261   : > { %v3865_v39 = vld [vmem:[#allocation3 + $0x78] sm:$0xff] }
 0x262   : > { %4564 = vmatmul.mubr.msk.bf16.gmra.mrb[12].mxu1 %vm3893_vm9, %v3865_v39 }
 0x294   : > { %v4541_v24 = vpop.f32.mrb[4].mxu0 }
 0x295   : > { %v4005_v25 = vadd.f32 %v4541_v24, %v6144_v63  ;;  %v3996_v4 = vpop.f32.mrb[5].mxu0 }
 0x296   : > { %v3997_v40 = vadd.f32 %v6144_v63, %v3996_v4  ;;  %v4542_v26 = vpop.f32.mrb[6].mxu0 }
 0x297   : > { %v4113_v22 = vmax.f32 %v4005_v25, 0.0  ;;  %v4008_v31 = vadd.f32 %v4542_v26, %v6144_v63  ;;  %v3999_v16 = vpop.f32.mrb[7].mxu0  ;;  %v4557_v2 = vpop.f32.mrb[4].mxu1 }
 0x298   : > { %v4111_v32 = vmax.f32 %v3997_v40, 0.0  ;;  %v4000_v28 = vadd.f32 %v6144_v63, %v3999_v16  ;;  %v4069_v33 = vadd.f32 %v4557_v2, %v6144_v63  ;;  %v4060_v60 = vpop.f32.mrb[5].mxu1 }
 0x299   : > { %4146 = vst.msk [vmem:[%s6157_s25 + $0x30] sm:$0xff] %vm4139_vm15, %v4113_v22  ;;  %v4114_v53 = vmax.f32 %v4008_v31, 0.0  ;;  %v4061_v50 = vadd.f32 %v6144_v63, %v4060_v60  ;;  %v4558_v30 = vpop.f32.mrb[6].mxu1 }
 0x29a   : > { %4144 = vst.msk [vmem:[%s6157_s25 + $0x20] sm:$0xff] %vm4139_vm15, %v4111_v32  ;;  %v4112_v6 = vmax.f32 %v4000_v28, 0.0  ;;  %v4129_v35 = vmax.f32 %v4069_v33, 0.0  ;;  %v4072_v37 = vadd.f32 %v4558_v30, %v6144_v63  ;;  %v4063_v38 = vpop.f32.mrb[7].mxu1 }
 0x29b   : > { %4147 = vst.msk [vmem:[%s6157_s25 + $0x38] sm:$0xff] %vm4139_vm15, %v4114_v53  ;;  %v4127_v42 = vmax.f32 %v4061_v50, 0.0  ;;  %v4064_v45 = vadd.f32 %v6144_v63, %v4063_v38 }
 0x29c   : > { %4145 = vst.msk [vmem:[%s6157_s25 + $0x28] sm:$0xff] %vm4139_vm15, %v4112_v6  ;;  %4162 = vst.msk [vmem:[%s6157_s25 + $0xb0] sm:$0xff] %vm4139_vm15, %v4129_v35  ;;  %v4130_v49 = vmax.f32 %v4072_v37, 0.0 }
 0x29d   : > { %4160 = vst.msk [vmem:[%s6157_s25 + $0xa0] sm:$0xff] %vm4139_vm15, %v4127_v42  ;;  %v4128_v46 = vmax.f32 %v4064_v45, 0.0 }
 0x29e   : > { %4163 = vst.msk [vmem:[%s6157_s25 + $0xb8] sm:$0xff] %vm4139_vm15, %v4130_v49 }
 0x29f   : > { %4161 = vst.msk [vmem:[%s6157_s25 + $0xa8] sm:$0xff] %vm4139_vm15, %v4128_v46 }
 0x2ec   : > { %v4545_v48 = vpop.f32.mrb[8].mxu0 }
 0x2ed   : > { %v4021_v52 = vadd.f32 %v4545_v48, %v6144_v63  ;;  %v4012_v54 = vpop.f32.mrb[9].mxu0 }
 0x2ee   : > { %v4013_v55 = vadd.f32 %v6144_v63, %v4012_v54  ;;  %v4546_v23 = vpop.f32.mrb[10].mxu0 }
 0x2ef   : > { %v4117_v47 = vmax.f32 %v4021_v52, 0.0  ;;  %v4024_v41 = vadd.f32 %v4546_v23, %v6144_v63  ;;  %v4015_v19 = vpop.f32.mrb[11].mxu0  ;;  %v4561_v44 = vpop.f32.mrb[8].mxu1 }
 0x2f0   : > { %v4115_v62 = vmax.f32 %v4013_v55, 0.0  ;;  %v4016_v20 = vadd.f32 %v6144_v63, %v4015_v19  ;;  %v4085_v36 = vadd.f32 %v4561_v44, %v6144_v63  ;;  %v4076_v58 = vpop.f32.mrb[9].mxu1 }
 0x2f1   : > { %4150 = vst.msk [vmem:[%s6157_s25 + $0x50] sm:$0xff] %vm4139_vm15, %v4117_v47  ;;  %v4118_v3 = vmax.f32 %v4024_v41, 0.0  ;;  %v4077_v5 = vadd.f32 %v6144_v63, %v4076_v58  ;;  %v4562_v57 = vpop.f32.mrb[10].mxu1 }
 0x2f2   : > { %4148 = vst.msk [vmem:[%s6157_s25 + $0x40] sm:$0xff] %vm4139_vm15, %v4115_v62  ;;  %v4116_v56 = vmax.f32 %v4016_v20, 0.0  ;;  %v4133_v0 = vmax.f32 %v4085_v36, 0.0  ;;  %v4088_v7 = vadd.f32 %v4562_v57, %v6144_v63  ;;  %v4079_v8 = vpop.f32.mrb[11].mxu1 }
 0x2f3   : > { %4151 = vst.msk [vmem:[%s6157_s25 + $0x58] sm:$0xff] %vm4139_vm15, %v4118_v3  ;;  %v4131_v9 = vmax.f32 %v4077_v5, 0.0  ;;  %v4080_v12 = vadd.f32 %v6144_v63, %v4079_v8 }
 0x2f4   : > { %4149 = vst.msk [vmem:[%s6157_s25 + $0x48] sm:$0xff] %vm4139_vm15, %v4116_v56  ;;  %4166 = vst.msk [vmem:[%s6157_s25 + $0xd0] sm:$0xff] %vm4139_vm15, %v4133_v0  ;;  %v4134_v59 = vmax.f32 %v4088_v7, 0.0 }
 0x2f5   : > { %4164 = vst.msk [vmem:[%s6157_s25 + $0xc0] sm:$0xff] %vm4139_vm15, %v4131_v9  ;;  %v4132_v14 = vmax.f32 %v4080_v12, 0.0 }
 0x2f6   : > { %4167 = vst.msk [vmem:[%s6157_s25 + $0xd8] sm:$0xff] %vm4139_vm15, %v4134_v59 }
 0x2f7   : > { %4165 = vst.msk [vmem:[%s6157_s25 + $0xc8] sm:$0xff] %vm4139_vm15, %v4132_v14 }
 0x330   : > { %v4549_v13 = vpop.f32.mrb[12].mxu0 }
 0x331   : > { %v4037_v1 = vadd.f32 %v4549_v13, %v6144_v63  ;;  %v4028_v34 = vpop.f32.mrb[13].mxu0 }
 0x332   : > { %v4029_v10 = vadd.f32 %v6144_v63, %v4028_v34  ;;  %v4550_v51 = vpop.f32.mrb[14].mxu0 }
 0x333   : > { %v4121_v29 = vmax.f32 %v4037_v1, 0.0  ;;  %v4040_v15 = vadd.f32 %v4550_v51, %v6144_v63  ;;  %v4031_v27 = vpop.f32.mrb[15].mxu0 }
 0x334   : > { %v4119_v61 = vmax.f32 %v4029_v10, 0.0  ;;  %v4032_v11 = vadd.f32 %v6144_v63, %v4031_v27 }
 0x335   : > { %4154 = vst.msk [vmem:[%s6157_s25 + $0x70] sm:$0xff] %vm4139_vm15, %v4121_v29  ;;  %v4122_v17 = vmax.f32 %v4040_v15, 0.0  ;;  %v4565_v18 = vpop.f32.mrb[12].mxu1 }
 0x336   : > { %4152 = vst.msk [vmem:[%s6157_s25 + $0x60] sm:$0xff] %vm4139_vm15, %v4119_v61  ;;  %v4120_v21 = vmax.f32 %v4032_v11, 0.0  ;;  %v4101_v43 = vadd.f32 %v4565_v18, %v6144_v63  ;;  %v4092_v39 = vpop.f32.mrb[13].mxu1 }
 0x337   : > { %4155 = vst.msk [vmem:[%s6157_s25 + $0x78] sm:$0xff] %vm4139_vm15, %v4122_v17  ;;  %v4093_v24 = vadd.f32 %v6144_v63, %v4092_v39  ;;  %v4566_v25 = vpop.f32.mrb[14].mxu1 }
 0x338   : > { %4153 = vst.msk [vmem:[%s6157_s25 + $0x68] sm:$0xff] %vm4139_vm15, %v4120_v21  ;;  %v4137_v4 = vmax.f32 %v4101_v43, 0.0  ;;  %v4104_v40 = vadd.f32 %v4566_v25, %v6144_v63  ;;  %v4095_v26 = vpop.f32.mrb[15].mxu1 }
 0x339   : > { %v4135_v22 = vmax.f32 %v4093_v24, 0.0  ;;  %v4096_v31 = vadd.f32 %v6144_v63, %v4095_v26 }
 0x33a   : > { %4170 = vst.msk [vmem:[%s6157_s25 + $0xf0] sm:$0xff] %vm4139_vm15, %v4137_v4  ;;  %v4138_v16 = vmax.f32 %v4104_v40, 0.0 }
 0x33b   : > { %4168 = vst.msk [vmem:[%s6157_s25 + $0xe0] sm:$0xff] %vm4139_vm15, %v4135_v22  ;;  %v4136_v32 = vmax.f32 %v4096_v31, 0.0 }
 0x33c   : > { %4171 = vst.msk [vmem:[%s6157_s25 + $0xf8] sm:$0xff] %vm4139_vm15, %v4138_v16 }
 0x33d   : > { %4169 = vst.msk [vmem:[%s6157_s25 + $0xe8] sm:$0xff] %vm4139_vm15, %v4136_v32 }
 0x33e   : > { %4804 = shalt.err (!%p4801_p1)
}
 0x33f   : > { %s4805_s8 = scalar_lea.hbm %s6250_s4, 4096  ;;  %s4809_s22 = scalar_lea.hbm %s6306_s3, 8192 }
 0x340   : > { %p4806_p13 = scmp.ne.s32.totalorder %s6250_s4, %s4805_s8  ;;  %p4810_p4 = scmp.lt.u32.totalorder %s6250_s4, %s6306_s3 }
 0x341   : > { %p4811_p5 = scmp.lt.u32.totalorder %s4809_s22, %s4805_s8  ;;  %p4813_p11 = scmp.lt.u32.totalorder %s4805_s8, %s6250_s4 }
 0x342   : > { %p4807_p6 = pnand %p4806_p13, %p6339_p0 }
 0x343   : > { %p4812_p8 = por %p4811_p5, %p4810_p4 }
 0x344   : > { %p4808_p10 = pneg %p4807_p6 }
 0x345   : > { %p4814_p2 = por %p4813_p11, %p4812_p8 }
 0x347   : > { %p4815_p3 = pnand %p4814_p2, %p4808_p10 }
 0x349   : > { %4818 = shalt.err (!%p4815_p3)
}
 0x34a   : > { %s4878_s25 = smov 128  }
 0x34b   : > { %4585 = dma.vmem_to_hbm [thread:$0]  (%p6339_p0), %s6254_s21, 4096, %s6250_s4, %s4173_s16, %s4878_s25, %s4878_s25, %s4869_s18  }
 0x34c PF: > { %s4201_s11 = sand.u32 1, %s4849_s12   ;;  %p6340_p7 = scmp.ne.s32.totalorder %s6312_s19, 0 }
 0x34d   : > { %p6341_p9 = scmp.ge.s32.totalorder %s4861_s15, 2  ;;  %s4202_s24 = scalar_lea.sflag [#allocation6], %s4201_s11 }
 0x34f   : > { %p4599_p12 = pnand %p6341_p9, %p6340_p7 }
 0x351   : > { %4844 = dma.done.wait (!%p4599_p12), %s4202_s24, 4096  }
 0x352   : > { %4846 = vsyncadd (!%p4599_p12), %s4202_s24, 4294963200  ;;  %p17_p1 = scmp.ge.s32.totalorder %s5013_s5, 4   ;;  %s6342_s12 = smov %s4853_s13 }
 0x353   : > { %s6343_s13 = smov %s4857_s14  ;;  %s6344_s14 = smov %s5029_s10 }
 0x354   : > { %s6345_s15 = smov %s5013_s5  ;;  %19 = sbr.rel (!%p17_p1) target bundleno = 6 (0x6), region = 87 }
 0x35b   :  { %4207 = vsyncpa [#allocation5], 1 }
 0x35c   :  { %4209 = vsyncpa [#allocation5 + $0x1], 1 }
 0x35d   :  { %4210 = vsyncpa [#allocation8], 1 }
 0x35e   :  { %4211 = vsyncpa [#allocation6], 1 }
 0x35f   :  { %4213 = vsyncpa [#allocation6 + $0x1], 1 }

</bundles_post_ra>
